<compile_context>
chip_gen: v7x
topology: tpu7x:2x2x1
jax: 0.10.0
libtpu: 0.0.40
codegen_flags: <defaults>
</compile_context>

<pallas_src>
import jax
import jax.numpy as jnp
from jax import lax
from jax.experimental import pallas as pl
from jax.experimental.pallas import tpu as pltpu


# ----------------------------------------------------------------------------- helpers
def make_divisible(v, divisor=8, min_value=None):
    min_value = min_value or divisor
    new_v = max(min_value, int(v + divisor / 2) // divisor * divisor)
    if new_v < 0.9 * v:
        new_v += divisor
    return new_v


def fold_bn(gamma, beta, mean, var, eps=1e-5):
    scale = gamma / jnp.sqrt(var + eps)
    bias = beta - mean * scale
    return scale[None, :].astype(jnp.float32), bias[None, :].astype(jnp.float32)


# ----------------------------------------------------------------------------- fused Pallas kernel
def fused_head_kernel(x_ref, w1_ref, s1_ref, b1_ref, wdw_ref, s2_ref, b2_ref,
                      w2_ref, s3_ref, b3_ref, wds_ref, bds_ref, o_ref,
                      pad_dw_ref, pad_ds_ref):
    """IR block(s) + 3x3/stride-2 downsample for ONE batch element (grid axis = batch)."""
    _, H, W, Cin = x_ref.shape
    num_blocks = w1_ref.shape[0]
    Cmid = w1_ref.shape[2]
    Cout = wds_ref.shape[1]
    M = H * W
    Hout = (H - 1) // 2 + 1
    Wout = (W - 1) // 2 + 1

    # Zero only the 1-px borders of the padded scratches; interiors are always overwritten.
    def zero_border(pref, c):
        zr = jnp.zeros((1, W + 2, c), jnp.float32)
        pref[0:1, :, :] = zr
        pref[H + 1:H + 2, :, :] = zr
        zc = jnp.zeros((H + 2, 1, c), jnp.float32)
        pref[:, 0:1, :] = zc
        pref[:, W + 1:W + 2, :] = zc

    zero_border(pad_dw_ref, Cmid)
    zero_border(pad_ds_ref, Cin)

    # -------------------- InvertedResidual block(s) --------------------
    x2d = x_ref[0].reshape(M, Cin)                          # f32 residual stream (M, Cin)
    for blk in range(num_blocks):
        # 1x1 expand (MXU bf16, f32 acc) + folded BN1 + ReLU
        xb = x2d.astype(jnp.bfloat16)                       # single cast of the expand LHS
        h = jnp.dot(xb, w1_ref[blk], preferred_element_type=jnp.float32)   # (M, Cmid)
        h = jnp.maximum(h * s1_ref[blk] + b1_ref[blk], 0.0)
        h3 = h.reshape(H, W, Cmid)

        # 3x3 depthwise, stride 1, pad 1 (VPU f32): padded scratch + 8 shifted MACs,
        # accumulator initialized from the register-resident center tap.
        # TODO(synk): Cmid=64 fills only half the 128-lane vregs; lane-packing (W,Cmid) would
        #             roughly halve the VPU work of this phase.
        pad_dw_ref[1:H + 1, 1:W + 1, :] = h3
        w_dw = wdw_ref[blk]                                 # (9, Cmid)
        acc = h3 * w_dw[4]
        for k in range(9):
            if k == 4:
                continue
            dh, dw = divmod(k, 3)
            acc = acc + pad_dw_ref[dh:dh + H, dw:dw + W, :] * w_dw[k]
        acc = jnp.maximum(acc * s2_ref[blk] + b2_ref[blk], 0.0)

        # 1x1 project (MXU bf16) + folded BN3 + residual (f32)
        y = jnp.dot(acc.reshape(M, Cmid).astype(jnp.bfloat16), w2_ref[blk],
                    preferred_element_type=jnp.float32)     # (M, Cin)
        x2d = y * s3_ref[blk] + b3_ref[blk] + x2d

    # -------------------- 3x3 stride-2 downsample (output positions only) --------------------
    pad_ds_ref[1:H + 1, 1:W + 1, :] = x2d.reshape(H, W, Cin)

    # W-direction stride-2 taps via strided sublane reads, fused along K with a lane concat.
    taps_w = [pad_ds_ref[:, pl.ds(dw, Wout, 2), :] for dw in range(3)]    # each (H+2, Wout, Cin)
    wcat = jnp.concatenate(taps_w, axis=-1)                               # (H+2, Wout, 3*Cin)

    # H-direction stride-2 via leading-dim row pairing (cheap reshape + static index).
    hp = wcat.reshape((H + 2) // 2, 2, Wout, 3 * Cin)                     # (Hout+1, 2, Wout, 3*Cin)
    lhs = jnp.concatenate([hp[:Hout, 0], hp[:Hout, 1], hp[1:Hout + 1, 0]],
                          axis=-1)                                        # (Hout, Wout, 9*Cin)
    lhs = lhs.reshape(Hout * Wout, 9 * Cin).astype(jnp.bfloat16)          # one im2col LHS, one cast

    # Single K = 9*Cin MXU matmul; bias folded in once.
    ds = jnp.dot(lhs, wds_ref[...], preferred_element_type=jnp.float32)   # (Hout*Wout, Cout)
    ds = ds + bds_ref[...]
    ds3 = ds.reshape(Hout, Wout, Cout)

    # Assemble one lane-dense (Hout, Wout*Cout) slab and store it with a single write.
    dense = jnp.concatenate([ds3[:, jo, :] for jo in range(Wout)], axis=-1)
    o_ref[0] = dense.astype(o_ref.dtype)


# ----------------------------------------------------------------------------- wrapper
def efficient_conv_head(x_nchw, params):
    # TODO(synk): only the default headtype='ir' path is implemented (CondConvResidual 'cc' omitted).
    x = jnp.transpose(x_nchw, (0, 2, 3, 1)).astype(jnp.float32)           # NCHW -> NHWC
    N, H, W, Cin = x.shape
    assert H % 2 == 0 and W % 2 == 0, "kernel assumes even spatial dims"
    blocks = params['blocks']
    B = len(blocks)
    Cmid = blocks[0]['w1'].shape[1]
    Cout = params['w_ds'].shape[-1]
    Hout = (H - 1) // 2 + 1
    Wout = (W - 1) // 2 + 1

    # Stack per-block weights (leading block dim); MXU operands cast to bf16, BN params stay f32.
    w1_all = jnp.stack([p['w1'] for p in blocks]).astype(jnp.bfloat16)    # (B, Cin, Cmid)
    s1_all = jnp.stack([p['s1'] for p in blocks])                         # (B, 1, Cmid)
    b1_all = jnp.stack([p['b1'] for p in blocks])
    wdw_all = jnp.stack([p['wdw'].reshape(9, Cmid) for p in blocks])      # (B, 9, Cmid) f32
    s2_all = jnp.stack([p['s2'] for p in blocks])
    b2_all = jnp.stack([p['b2'] for p in blocks])
    w2_all = jnp.stack([p['w2'] for p in blocks]).astype(jnp.bfloat16)    # (B, Cmid, Cin)
    s3_all = jnp.stack([p['s3'] for p in blocks])
    b3_all = jnp.stack([p['b3'] for p in blocks])
    wds = params['w_ds'].reshape(9 * Cin, Cout).astype(jnp.bfloat16)      # (9*Cin, Cout), (kh,kw,ci) major
    bds = params['b_ds'][None, :].astype(jnp.float32)                     # (1, Cout)

    def rep(*shape):
        nd = len(shape)
        return pl.BlockSpec(shape, lambda n, _nd=nd: (0,) * _nd)

    out = pl.pallas_call(
        fused_head_kernel,
        out_shape=jax.ShapeDtypeStruct((N, Hout, Wout * Cout), jnp.float32),
        grid=(N,),
        in_specs=[
            pl.BlockSpec((1, H, W, Cin), lambda n: (n, 0, 0, 0)),
            rep(B, Cin, Cmid), rep(B, 1, Cmid), rep(B, 1, Cmid),
            rep(B, 9, Cmid), rep(B, 1, Cmid), rep(B, 1, Cmid),
            rep(B, Cmid, Cin), rep(B, 1, Cin), rep(B, 1, Cin),
            rep(9 * Cin, Cout), rep(1, Cout),
        ],
        out_specs=pl.BlockSpec((1, Hout, Wout * Cout), lambda n: (n, 0, 0)),
        scratch_shapes=[
            pltpu.VMEM((H + 2, W + 2, Cmid), jnp.float32),    # padded expand activations (per element)
            pltpu.VMEM((H + 2, W + 2, Cin), jnp.float32),     # padded IR output (per element)
        ],
        compiler_params=pltpu.CompilerParams(
            dimension_semantics=("parallel",),                # batch axis -> 2nd TC on v7x
            vmem_limit_bytes=32 * 1024 * 1024),
    )(x, w1_all, s1_all, b1_all, wdw_all, s2_all, b2_all,
      w2_all, s3_all, b3_all, wds, bds)

    out = out.reshape(N, Hout, Wout, Cout)
    return jnp.transpose(out, (0, 3, 1, 2))                   # NHWC -> NCHW


# ----------------------------------------------------------------------------- param init
def init_bn(key, c):
    k1, k2, k3, k4 = jax.random.split(key, 4)
    gamma = jax.random.uniform(k1, (c,), jnp.float32, 0.5, 1.5)
    beta = jax.random.normal(k2, (c,), jnp.float32) * 0.1
    mean = jax.random.normal(k3, (c,), jnp.float32) * 0.1
    var = jax.random.uniform(k4, (c,), jnp.float32, 0.5, 1.5)
    return fold_bn(gamma, beta, mean, var)


def init_ir_block(key, cin, exp_ratio=2.0):
    cmid = make_divisible(cin * exp_ratio)
    ks = jax.random.split(key, 6)
    w1 = jax.random.normal(ks[0], (cin, cmid), jnp.float32) * 0.1
    wdw = jax.random.normal(ks[1], (3, 3, cmid), jnp.float32) * 0.1
    w2 = jax.random.normal(ks[2], (cmid, cin), jnp.float32) * 0.1
    s1, b1 = init_bn(ks[3], cmid)
    s2, b2 = init_bn(ks[4], cmid)
    s3, b3 = init_bn(ks[5], cin)
    return dict(w1=w1, s1=s1, b1=b1, wdw=wdw, s2=s2, b2=b2, w2=w2, s3=s3, b3=b3)


def init_params(key, embed_dim_in, embed_dim_out, num_blocks=1):
    keys = jax.random.split(key, num_blocks + 2)
    blocks = [init_ir_block(keys[i], embed_dim_in) for i in range(num_blocks)]
    w_ds = jax.random.normal(keys[-2], (3, 3, embed_dim_in, embed_dim_out), jnp.float32) * 0.1
    b_ds = jax.random.normal(keys[-1], (embed_dim_out,), jnp.float32) * 0.1
    return dict(blocks=blocks, w_ds=w_ds, b_ds=b_ds)


# ----------------------------------------------------------------------------- pure-JAX reference
def reference_forward(x_nchw, params):
    y = jnp.transpose(x_nchw, (0, 2, 3, 1))
    for p in params['blocks']:
        h = jnp.einsum('nhwc,cm->nhwm', y, p['w1'])
        h = jnp.maximum(h * p['s1'][0] + p['b1'][0], 0.0)
        h = lax.conv_general_dilated(
            h, p['wdw'][:, :, None, :], window_strides=(1, 1),
            padding=((1, 1), (1, 1)),
            dimension_numbers=('NHWC', 'HWIO', 'NHWC'),
            feature_group_count=h.shape[-1])
        h = jnp.maximum(h * p['s2'][0] + p['b2'][0], 0.0)
        h = jnp.einsum('nhwm,mc->nhwc', h, p['w2'])
        h = h * p['s3'][0] + p['b3'][0]
        y = y + h
    y = lax.conv_general_dilated(
        y, params['w_ds'], window_strides=(2, 2), padding=((1, 1), (1, 1)),
        dimension_numbers=('NHWC', 'HWIO', 'NHWC')) + params['b_ds']
    return jnp.transpose(y, (0, 3, 1, 2))


# ----------------------------------------------------------------------------- main
if __name__ == "__main__":
    N, C_IN, C_OUT, H, W = 2, 32, 64, 16, 16
    NUM_BLOCKS = 1

    key = jax.random.PRNGKey(0)
    kx, kp = jax.random.split(key)
    x = jax.random.normal(kx, (N, C_IN, H, W), jnp.float32)   # NCHW, like the PyTorch module
    params = init_params(kp, C_IN, C_OUT, NUM_BLOCKS)

    fwd = jax.jit(efficient_conv_head)
    out = jax.block_until_ready(fwd(x, params))
    assert out.shape == (N, C_OUT, H // 2, W // 2), out.shape

    ref = jax.block_until_ready(reference_forward(x, params))
    assert jnp.allclose(out, ref, atol=5e-2, rtol=5e-2), \
        float(jnp.max(jnp.abs(out - ref)))

    print("KERNEL_OK")
</pallas_src>

<mosaic_0001>
module attributes {stable_mosaic.version = 11 : i64} {
  func.func @fused_head_kernel(%arg0: i32, %arg1: memref<1x16x16x32xf32, #tpu.memory_space<vmem>>, %arg2: memref<1x32x64xbf16, #tpu.memory_space<vmem>>, %arg3: memref<1x1x64xf32, #tpu.memory_space<vmem>>, %arg4: memref<1x1x64xf32, #tpu.memory_space<vmem>>, %arg5: memref<1x9x64xf32, #tpu.memory_space<vmem>>, %arg6: memref<1x1x64xf32, #tpu.memory_space<vmem>>, %arg7: memref<1x1x64xf32, #tpu.memory_space<vmem>>, %arg8: memref<1x64x32xbf16, #tpu.memory_space<vmem>>, %arg9: memref<1x1x32xf32, #tpu.memory_space<vmem>>, %arg10: memref<1x1x32xf32, #tpu.memory_space<vmem>>, %arg11: memref<288x64xbf16, #tpu.memory_space<vmem>>, %arg12: memref<1x64xf32, #tpu.memory_space<vmem>>, %arg13: memref<1x8x512xf32, #tpu.memory_space<vmem>>, %arg14: memref<18x18x64xf32, #tpu.memory_space<vmem>>, %arg15: memref<18x18x32xf32, #tpu.memory_space<vmem>>) attributes {dimension_semantics = [#tpu.dimension_semantics<parallel>], iteration_bounds = array<i64: 2>, scalar_prefetch = 0 : i64, scratch_operands = 2 : i64, tpu.core_type = #tpu.core_type<tc>, window_params = [{transform_indices = @transform_0, window_bounds = array<i64: 1, 16, 16, 32>}, {pipeline_mode = #tpu.pipeline_mode<synchronous>, transform_indices = @transform_1, window_bounds = array<i64: 1, 32, 64>}, {pipeline_mode = #tpu.pipeline_mode<synchronous>, transform_indices = @transform_2, window_bounds = array<i64: 1, 1, 64>}, {pipeline_mode = #tpu.pipeline_mode<synchronous>, transform_indices = @transform_3, window_bounds = array<i64: 1, 1, 64>}, {pipeline_mode = #tpu.pipeline_mode<synchronous>, transform_indices = @transform_4, window_bounds = array<i64: 1, 9, 64>}, {pipeline_mode = #tpu.pipeline_mode<synchronous>, transform_indices = @transform_5, window_bounds = array<i64: 1, 1, 64>}, {pipeline_mode = #tpu.pipeline_mode<synchronous>, transform_indices = @transform_6, window_bounds = array<i64: 1, 1, 64>}, {pipeline_mode = #tpu.pipeline_mode<synchronous>, transform_indices = @transform_7, window_bounds = array<i64: 1, 64, 32>}, {pipeline_mode = #tpu.pipeline_mode<synchronous>, transform_indices = @transform_8, window_bounds = array<i64: 1, 1, 32>}, {pipeline_mode = #tpu.pipeline_mode<synchronous>, transform_indices = @transform_9, window_bounds = array<i64: 1, 1, 32>}, {pipeline_mode = #tpu.pipeline_mode<synchronous>, transform_indices = @transform_10, window_bounds = array<i64: 288, 64>}, {pipeline_mode = #tpu.pipeline_mode<synchronous>, transform_indices = @transform_11, window_bounds = array<i64: 1, 64>}, {transform_indices = @transform_12, window_bounds = array<i64: 1, 8, 512>}]} {
    %cst = arith.constant 0.000000e+00 : f32
    %0 = vector.broadcast %cst : f32 to vector<1x18x64xf32>
    %c0 = arith.constant 0 : index
    %c0_0 = arith.constant 0 : index
    %c0_1 = arith.constant 0 : index
    %1 = vector.load %arg14[%c0, %c0_0, %c0_1] : memref<18x18x64xf32, #tpu.memory_space<vmem>>, vector<1x18x64xf32>
    tpu.vector_store %arg14[%c0, %c0_0, %c0_1], %0 {strides = array<i32>} : memref<18x18x64xf32, #tpu.memory_space<vmem>>, vector<1x18x64xf32>,
    %c17 = arith.constant 17 : index
    %c0_2 = arith.constant 0 : index
    %c0_3 = arith.constant 0 : index
    %2 = vector.load %arg14[%c17, %c0_2, %c0_3] : memref<18x18x64xf32, #tpu.memory_space<vmem>>, vector<1x18x64xf32>
    tpu.vector_store %arg14[%c17, %c0_2, %c0_3], %0 {strides = array<i32>} : memref<18x18x64xf32, #tpu.memory_space<vmem>>, vector<1x18x64xf32>,
    %cst_4 = arith.constant 0.000000e+00 : f32
    %3 = vector.broadcast %cst_4 : f32 to vector<18x1x64xf32>
    %c0_5 = arith.constant 0 : index
    %c0_6 = arith.constant 0 : index
    %c0_7 = arith.constant 0 : index
    %4 = vector.load %arg14[%c0_5, %c0_6, %c0_7] : memref<18x18x64xf32, #tpu.memory_space<vmem>>, vector<18x1x64xf32>
    tpu.vector_store %arg14[%c0_5, %c0_6, %c0_7], %3 {strides = array<i32>} : memref<18x18x64xf32, #tpu.memory_space<vmem>>, vector<18x1x64xf32>,
    %c0_8 = arith.constant 0 : index
    %c17_9 = arith.constant 17 : index
    %c0_10 = arith.constant 0 : index
    %5 = vector.load %arg14[%c0_8, %c17_9, %c0_10] : memref<18x18x64xf32, #tpu.memory_space<vmem>>, vector<18x1x64xf32>
    tpu.vector_store %arg14[%c0_8, %c17_9, %c0_10], %3 {strides = array<i32>} : memref<18x18x64xf32, #tpu.memory_space<vmem>>, vector<18x1x64xf32>,
    %cst_11 = arith.constant 0.000000e+00 : f32
    %6 = vector.broadcast %cst_11 : f32 to vector<1x18x32xf32>
    %c0_12 = arith.constant 0 : index
    %c0_13 = arith.constant 0 : index
    %c0_14 = arith.constant 0 : index
    %7 = vector.load %arg15[%c0_12, %c0_13, %c0_14] : memref<18x18x32xf32, #tpu.memory_space<vmem>>, vector<1x18x32xf32>
    tpu.vector_store %arg15[%c0_12, %c0_13, %c0_14], %6 {strides = array<i32>} : memref<18x18x32xf32, #tpu.memory_space<vmem>>, vector<1x18x32xf32>,
    %c17_15 = arith.constant 17 : index
    %c0_16 = arith.constant 0 : index
    %c0_17 = arith.constant 0 : index
    %8 = vector.load %arg15[%c17_15, %c0_16, %c0_17] : memref<18x18x32xf32, #tpu.memory_space<vmem>>, vector<1x18x32xf32>
    tpu.vector_store %arg15[%c17_15, %c0_16, %c0_17], %6 {strides = array<i32>} : memref<18x18x32xf32, #tpu.memory_space<vmem>>, vector<1x18x32xf32>,
    %cst_18 = arith.constant 0.000000e+00 : f32
    %9 = vector.broadcast %cst_18 : f32 to vector<18x1x32xf32>
    %c0_19 = arith.constant 0 : index
    %c0_20 = arith.constant 0 : index
    %c0_21 = arith.constant 0 : index
    %10 = vector.load %arg15[%c0_19, %c0_20, %c0_21] : memref<18x18x32xf32, #tpu.memory_space<vmem>>, vector<18x1x32xf32>
    tpu.vector_store %arg15[%c0_19, %c0_20, %c0_21], %9 {strides = array<i32>} : memref<18x18x32xf32, #tpu.memory_space<vmem>>, vector<18x1x32xf32>,
    %c0_22 = arith.constant 0 : index
    %c17_23 = arith.constant 17 : index
    %c0_24 = arith.constant 0 : index
    %11 = vector.load %arg15[%c0_22, %c17_23, %c0_24] : memref<18x18x32xf32, #tpu.memory_space<vmem>>, vector<18x1x32xf32>
    tpu.vector_store %arg15[%c0_22, %c17_23, %c0_24], %9 {strides = array<i32>} : memref<18x18x32xf32, #tpu.memory_space<vmem>>, vector<18x1x32xf32>,
    %c0_25 = arith.constant 0 : index
    %c0_26 = arith.constant 0 : index
    %c0_27 = arith.constant 0 : index
    %c0_28 = arith.constant 0 : index
    %12 = vector.load %arg1[%c0_25, %c0_26, %c0_27, %c0_28] : memref<1x16x16x32xf32, #tpu.memory_space<vmem>>, vector<1x16x16x32xf32>
    %13 = vector.shape_cast %12 : vector<1x16x16x32xf32> to vector<16x16x32xf32>
    %14 = vector.shape_cast %13 : vector<16x16x32xf32> to vector<256x32xf32>
    %15 = arith.truncf %14 : vector<256x32xf32> to vector<256x32xbf16>
    %c0_29 = arith.constant 0 : index
    %c0_30 = arith.constant 0 : index
    %c0_31 = arith.constant 0 : index
    %16 = vector.load %arg2[%c0_29, %c0_30, %c0_31] : memref<1x32x64xbf16, #tpu.memory_space<vmem>>, vector<1x32x64xbf16>
    %17 = vector.shape_cast %16 : vector<1x32x64xbf16> to vector<32x64xbf16>
    %cst_32 = arith.constant dense<0.000000e+00> : vector<256x64xf32>
    %18 = tpu.matmul %15, %17, %cst_32 {dimension_numbers = #tpu.dot_dimension_numbers<[1], [0], [0], [1], [0, 0, 1, 1], [], []>} : vector<256x32xbf16>, vector<32x64xbf16>, vector<256x64xf32> -> vector<256x64xf32>
    %c0_33 = arith.constant 0 : index
    %c0_34 = arith.constant 0 : index
    %c0_35 = arith.constant 0 : index
    %19 = vector.load %arg3[%c0_33, %c0_34, %c0_35] : memref<1x1x64xf32, #tpu.memory_space<vmem>>, vector<1x1x64xf32>
    %20 = vector.shape_cast %19 : vector<1x1x64xf32> to vector<1x64xf32>
    %21 = vector.broadcast %20 : vector<1x64xf32> to vector<256x64xf32>
    %22 = arith.mulf %18, %21 : vector<256x64xf32>
    %c0_36 = arith.constant 0 : index
    %c0_37 = arith.constant 0 : index
    %c0_38 = arith.constant 0 : index
    %23 = vector.load %arg4[%c0_36, %c0_37, %c0_38] : memref<1x1x64xf32, #tpu.memory_space<vmem>>, vector<1x1x64xf32>
    %24 = vector.shape_cast %23 : vector<1x1x64xf32> to vector<1x64xf32>
    %25 = vector.broadcast %24 : vector<1x64xf32> to vector<256x64xf32>
    %26 = arith.addf %22, %25 : vector<256x64xf32>
    %cst_39 = arith.constant 0.000000e+00 : f32
    %27 = vector.broadcast %cst_39 : f32 to vector<256x64xf32>
    %28 = arith.maximumf %26, %27 : vector<256x64xf32>
    %29 = vector.shape_cast %28 : vector<256x64xf32> to vector<16x16x64xf32>
    %c1 = arith.constant 1 : index
    %c1_40 = arith.constant 1 : index
    %c0_41 = arith.constant 0 : index
    %30 = vector.load %arg14[%c1, %c1_40, %c0_41] : memref<18x18x64xf32, #tpu.memory_space<vmem>>, vector<16x16x64xf32>
    tpu.vector_store %arg14[%c1, %c1_40, %c0_41], %29 {strides = array<i32>} : memref<18x18x64xf32, #tpu.memory_space<vmem>>, vector<16x16x64xf32>,
    %c0_42 = arith.constant 0 : index
    %c0_43 = arith.constant 0 : index
    %c0_44 = arith.constant 0 : index
    %31 = vector.load %arg5[%c0_42, %c0_43, %c0_44] : memref<1x9x64xf32, #tpu.memory_space<vmem>>, vector<1x9x64xf32>
    %32 = vector.shape_cast %31 : vector<1x9x64xf32> to vector<9x64xf32>
    %33 = vector.extract_strided_slice %32 {offsets = [4, 0], sizes = [1, 64], strides = [1, 1]} : vector<9x64xf32> to vector<1x64xf32>
    %34 = vector.shape_cast %33 : vector<1x64xf32> to vector<64xf32>
    %35 = vector.shape_cast %34 : vector<64xf32> to vector<1x1x64xf32>
    %36 = vector.broadcast %35 : vector<1x1x64xf32> to vector<16x16x64xf32>
    %37 = arith.mulf %29, %36 : vector<16x16x64xf32>
    %c0_45 = arith.constant 0 : index
    %c0_46 = arith.constant 0 : index
    %c0_47 = arith.constant 0 : index
    %38 = vector.load %arg14[%c0_45, %c0_46, %c0_47] : memref<18x18x64xf32, #tpu.memory_space<vmem>>, vector<16x16x64xf32>
    %39 = vector.extract_strided_slice %32 {offsets = [0, 0], sizes = [1, 64], strides = [1, 1]} : vector<9x64xf32> to vector<1x64xf32>
    %40 = vector.shape_cast %39 : vector<1x64xf32> to vector<64xf32>
    %41 = vector.shape_cast %40 : vector<64xf32> to vector<1x1x64xf32>
    %42 = vector.broadcast %41 : vector<1x1x64xf32> to vector<16x16x64xf32>
    %43 = arith.mulf %38, %42 : vector<16x16x64xf32>
    %44 = arith.addf %37, %43 : vector<16x16x64xf32>
    %c0_48 = arith.constant 0 : index
    %c1_49 = arith.constant 1 : index
    %c0_50 = arith.constant 0 : index
    %45 = vector.load %arg14[%c0_48, %c1_49, %c0_50] : memref<18x18x64xf32, #tpu.memory_space<vmem>>, vector<16x16x64xf32>
    %46 = vector.extract_strided_slice %32 {offsets = [1, 0], sizes = [1, 64], strides = [1, 1]} : vector<9x64xf32> to vector<1x64xf32>
    %47 = vector.shape_cast %46 : vector<1x64xf32> to vector<64xf32>
    %48 = vector.shape_cast %47 : vector<64xf32> to vector<1x1x64xf32>
    %49 = vector.broadcast %48 : vector<1x1x64xf32> to vector<16x16x64xf32>
    %50 = arith.mulf %45, %49 : vector<16x16x64xf32>
    %51 = arith.addf %44, %50 : vector<16x16x64xf32>
    %c0_51 = arith.constant 0 : index
    %c2 = arith.constant 2 : index
    %c0_52 = arith.constant 0 : index
    %52 = vector.load %arg14[%c0_51, %c2, %c0_52] : memref<18x18x64xf32, #tpu.memory_space<vmem>>, vector<16x16x64xf32>
    %53 = vector.extract_strided_slice %32 {offsets = [2, 0], sizes = [1, 64], strides = [1, 1]} : vector<9x64xf32> to vector<1x64xf32>
    %54 = vector.shape_cast %53 : vector<1x64xf32> to vector<64xf32>
    %55 = vector.shape_cast %54 : vector<64xf32> to vector<1x1x64xf32>
    %56 = vector.broadcast %55 : vector<1x1x64xf32> to vector<16x16x64xf32>
    %57 = arith.mulf %52, %56 : vector<16x16x64xf32>
    %58 = arith.addf %51, %57 : vector<16x16x64xf32>
    %c1_53 = arith.constant 1 : index
    %c0_54 = arith.constant 0 : index
    %c0_55 = arith.constant 0 : index
    %59 = vector.load %arg14[%c1_53, %c0_54, %c0_55] : memref<18x18x64xf32, #tpu.memory_space<vmem>>, vector<16x16x64xf32>
    %60 = vector.extract_strided_slice %32 {offsets = [3, 0], sizes = [1, 64], strides = [1, 1]} : vector<9x64xf32> to vector<1x64xf32>
    %61 = vector.shape_cast %60 : vector<1x64xf32> to vector<64xf32>
    %62 = vector.shape_cast %61 : vector<64xf32> to vector<1x1x64xf32>
    %63 = vector.broadcast %62 : vector<1x1x64xf32> to vector<16x16x64xf32>
    %64 = arith.mulf %59, %63 : vector<16x16x64xf32>
    %65 = arith.addf %58, %64 : vector<16x16x64xf32>
    %c1_56 = arith.constant 1 : index
    %c2_57 = arith.constant 2 : index
    %c0_58 = arith.constant 0 : index
    %66 = vector.load %arg14[%c1_56, %c2_57, %c0_58] : memref<18x18x64xf32, #tpu.memory_space<vmem>>, vector<16x16x64xf32>
    %67 = vector.extract_strided_slice %32 {offsets = [5, 0], sizes = [1, 64], strides = [1, 1]} : vector<9x64xf32> to vector<1x64xf32>
    %68 = vector.shape_cast %67 : vector<1x64xf32> to vector<64xf32>
    %69 = vector.shape_cast %68 : vector<64xf32> to vector<1x1x64xf32>
    %70 = vector.broadcast %69 : vector<1x1x64xf32> to vector<16x16x64xf32>
    %71 = arith.mulf %66, %70 : vector<16x16x64xf32>
    %72 = arith.addf %65, %71 : vector<16x16x64xf32>
    %c2_59 = arith.constant 2 : index
    %c0_60 = arith.constant 0 : index
    %c0_61 = arith.constant 0 : index
    %73 = vector.load %arg14[%c2_59, %c0_60, %c0_61] : memref<18x18x64xf32, #tpu.memory_space<vmem>>, vector<16x16x64xf32>
    %74 = vector.extract_strided_slice %32 {offsets = [6, 0], sizes = [1, 64], strides = [1, 1]} : vector<9x64xf32> to vector<1x64xf32>
    %75 = vector.shape_cast %74 : vector<1x64xf32> to vector<64xf32>
    %76 = vector.shape_cast %75 : vector<64xf32> to vector<1x1x64xf32>
    %77 = vector.broadcast %76 : vector<1x1x64xf32> to vector<16x16x64xf32>
    %78 = arith.mulf %73, %77 : vector<16x16x64xf32>
    %79 = arith.addf %72, %78 : vector<16x16x64xf32>
    %c2_62 = arith.constant 2 : index
    %c1_63 = arith.constant 1 : index
    %c0_64 = arith.constant 0 : index
    %80 = vector.load %arg14[%c2_62, %c1_63, %c0_64] : memref<18x18x64xf32, #tpu.memory_space<vmem>>, vector<16x16x64xf32>
    %81 = vector.extract_strided_slice %32 {offsets = [7, 0], sizes = [1, 64], strides = [1, 1]} : vector<9x64xf32> to vector<1x64xf32>
    %82 = vector.shape_cast %81 : vector<1x64xf32> to vector<64xf32>
    %83 = vector.shape_cast %82 : vector<64xf32> to vector<1x1x64xf32>
    %84 = vector.broadcast %83 : vector<1x1x64xf32> to vector<16x16x64xf32>
    %85 = arith.mulf %80, %84 : vector<16x16x64xf32>
    %86 = arith.addf %79, %85 : vector<16x16x64xf32>
    %c2_65 = arith.constant 2 : index
    %c2_66 = arith.constant 2 : index
    %c0_67 = arith.constant 0 : index
    %87 = vector.load %arg14[%c2_65, %c2_66, %c0_67] : memref<18x18x64xf32, #tpu.memory_space<vmem>>, vector<16x16x64xf32>
    %88 = vector.extract_strided_slice %32 {offsets = [8, 0], sizes = [1, 64], strides = [1, 1]} : vector<9x64xf32> to vector<1x64xf32>
    %89 = vector.shape_cast %88 : vector<1x64xf32> to vector<64xf32>
    %90 = vector.shape_cast %89 : vector<64xf32> to vector<1x1x64xf32>
    %91 = vector.broadcast %90 : vector<1x1x64xf32> to vector<16x16x64xf32>
    %92 = arith.mulf %87, %91 : vector<16x16x64xf32>
    %93 = arith.addf %86, %92 : vector<16x16x64xf32>
    %c0_68 = arith.constant 0 : index
    %c0_69 = arith.constant 0 : index
    %c0_70 = arith.constant 0 : index
    %94 = vector.load %arg6[%c0_68, %c0_69, %c0_70] : memref<1x1x64xf32, #tpu.memory_space<vmem>>, vector<1x1x64xf32>
    %95 = vector.shape_cast %94 : vector<1x1x64xf32> to vector<1x64xf32>
    %96 = vector.shape_cast %95 : vector<1x64xf32> to vector<1x1x64xf32>
    %97 = vector.broadcast %96 : vector<1x1x64xf32> to vector<16x16x64xf32>
    %98 = arith.mulf %93, %97 : vector<16x16x64xf32>
    %c0_71 = arith.constant 0 : index
    %c0_72 = arith.constant 0 : index
    %c0_73 = arith.constant 0 : index
    %99 = vector.load %arg7[%c0_71, %c0_72, %c0_73] : memref<1x1x64xf32, #tpu.memory_space<vmem>>, vector<1x1x64xf32>
    %100 = vector.shape_cast %99 : vector<1x1x64xf32> to vector<1x64xf32>
    %101 = vector.shape_cast %100 : vector<1x64xf32> to vector<1x1x64xf32>
    %102 = vector.broadcast %101 : vector<1x1x64xf32> to vector<16x16x64xf32>
    %103 = arith.addf %98, %102 : vector<16x16x64xf32>
    %cst_74 = arith.constant 0.000000e+00 : f32
    %104 = vector.broadcast %cst_74 : f32 to vector<16x16x64xf32>
    %105 = arith.maximumf %103, %104 : vector<16x16x64xf32>
    %106 = vector.shape_cast %105 : vector<16x16x64xf32> to vector<256x64xf32>
    %107 = arith.truncf %106 : vector<256x64xf32> to vector<256x64xbf16>
    %c0_75 = arith.constant 0 : index
    %c0_76 = arith.constant 0 : index
    %c0_77 = arith.constant 0 : index
    %108 = vector.load %arg8[%c0_75, %c0_76, %c0_77] : memref<1x64x32xbf16, #tpu.memory_space<vmem>>, vector<1x64x32xbf16>
    %109 = vector.shape_cast %108 : vector<1x64x32xbf16> to vector<64x32xbf16>
    %cst_78 = arith.constant dense<0.000000e+00> : vector<256x32xf32>
    %110 = tpu.matmul %107, %109, %cst_78 {dimension_numbers = #tpu.dot_dimension_numbers<[1], [0], [0], [1], [0, 0, 1, 1], [], []>} : vector<256x64xbf16>, vector<64x32xbf16>, vector<256x32xf32> -> vector<256x32xf32>
    %c0_79 = arith.constant 0 : index
    %c0_80 = arith.constant 0 : index
    %c0_81 = arith.constant 0 : index
    %111 = vector.load %arg9[%c0_79, %c0_80, %c0_81] : memref<1x1x32xf32, #tpu.memory_space<vmem>>, vector<1x1x32xf32>
    %112 = vector.shape_cast %111 : vector<1x1x32xf32> to vector<1x32xf32>
    %113 = vector.broadcast %112 : vector<1x32xf32> to vector<256x32xf32>
    %114 = arith.mulf %110, %113 : vector<256x32xf32>
    %c0_82 = arith.constant 0 : index
    %c0_83 = arith.constant 0 : index
    %c0_84 = arith.constant 0 : index
    %115 = vector.load %arg10[%c0_82, %c0_83, %c0_84] : memref<1x1x32xf32, #tpu.memory_space<vmem>>, vector<1x1x32xf32>
    %116 = vector.shape_cast %115 : vector<1x1x32xf32> to vector<1x32xf32>
    %117 = vector.broadcast %116 : vector<1x32xf32> to vector<256x32xf32>
    %118 = arith.addf %114, %117 : vector<256x32xf32>
    %119 = arith.addf %118, %14 : vector<256x32xf32>
    %120 = vector.shape_cast %119 : vector<256x32xf32> to vector<16x16x32xf32>
    %c1_85 = arith.constant 1 : index
    %c1_86 = arith.constant 1 : index
    %c0_87 = arith.constant 0 : index
    %121 = vector.load %arg15[%c1_85, %c1_86, %c0_87] : memref<18x18x32xf32, #tpu.memory_space<vmem>>, vector<16x16x32xf32>
    tpu.vector_store %arg15[%c1_85, %c1_86, %c0_87], %120 {strides = array<i32>} : memref<18x18x32xf32, #tpu.memory_space<vmem>>, vector<16x16x32xf32>,
    %c0_88 = arith.constant 0 : index
    %c0_89 = arith.constant 0 : index
    %c0_90 = arith.constant 0 : index
    %122 = tpu.strided_load %arg15[%c0_88, %c0_89, %c0_90] {strides = array<i32: 1, 2, 1>} : memref<18x18x32xf32, #tpu.memory_space<vmem>>, vector<18x8x32xf32>
    %c0_91 = arith.constant 0 : index
    %c1_92 = arith.constant 1 : index
    %c0_93 = arith.constant 0 : index
    %123 = tpu.strided_load %arg15[%c0_91, %c1_92, %c0_93] {strides = array<i32: 1, 2, 1>} : memref<18x18x32xf32, #tpu.memory_space<vmem>>, vector<18x8x32xf32>
    %c0_94 = arith.constant 0 : index
    %c2_95 = arith.constant 2 : index
    %c0_96 = arith.constant 0 : index
    %124 = tpu.strided_load %arg15[%c0_94, %c2_95, %c0_96] {strides = array<i32: 1, 2, 1>} : memref<18x18x32xf32, #tpu.memory_space<vmem>>, vector<18x8x32xf32>
    %125 = tpu.concatenate %122, %123, %124 in 2 : vector<18x8x32xf32>, vector<18x8x32xf32>, vector<18x8x32xf32> -> vector<18x8x96xf32>
    %126 = vector.shape_cast %125 : vector<18x8x96xf32> to vector<9x2x8x96xf32>
    %127 = vector.extract_strided_slice %126 {offsets = [0, 0, 0, 0], sizes = [8, 1, 8, 96], strides = [1, 1, 1, 1]} : vector<9x2x8x96xf32> to vector<8x1x8x96xf32>
    %128 = vector.shape_cast %127 : vector<8x1x8x96xf32> to vector<8x8x96xf32>
    %129 = vector.extract_strided_slice %126 {offsets = [0, 1, 0, 0], sizes = [8, 1, 8, 96], strides = [1, 1, 1, 1]} : vector<9x2x8x96xf32> to vector<8x1x8x96xf32>
    %130 = vector.shape_cast %129 : vector<8x1x8x96xf32> to vector<8x8x96xf32>
    %131 = vector.extract_strided_slice %126 {offsets = [1, 0, 0, 0], sizes = [8, 1, 8, 96], strides = [1, 1, 1, 1]} : vector<9x2x8x96xf32> to vector<8x1x8x96xf32>
    %132 = vector.shape_cast %131 : vector<8x1x8x96xf32> to vector<8x8x96xf32>
    %133 = tpu.concatenate %128, %130, %132 in 2 : vector<8x8x96xf32>, vector<8x8x96xf32>, vector<8x8x96xf32> -> vector<8x8x288xf32>
    %134 = vector.shape_cast %133 : vector<8x8x288xf32> to vector<64x288xf32>
    %135 = arith.truncf %134 : vector<64x288xf32> to vector<64x288xbf16>
    %c0_97 = arith.constant 0 : index
    %c0_98 = arith.constant 0 : index
    %136 = vector.load %arg11[%c0_97, %c0_98] : memref<288x64xbf16, #tpu.memory_space<vmem>>, vector<288x64xbf16>
    %cst_99 = arith.constant dense<0.000000e+00> : vector<64x64xf32>
    %137 = tpu.matmul %135, %136, %cst_99 {dimension_numbers = #tpu.dot_dimension_numbers<[1], [0], [0], [1], [0, 0, 1, 1], [], []>} : vector<64x288xbf16>, vector<288x64xbf16>, vector<64x64xf32> -> vector<64x64xf32>
    %c0_100 = arith.constant 0 : index
    %c0_101 = arith.constant 0 : index
    %138 = vector.load %arg12[%c0_100, %c0_101] : memref<1x64xf32, #tpu.memory_space<vmem>>, vector<1x64xf32>
    %139 = vector.broadcast %138 : vector<1x64xf32> to vector<64x64xf32>
    %140 = arith.addf %137, %139 : vector<64x64xf32>
    %141 = vector.shape_cast %140 : vector<64x64xf32> to vector<8x8x64xf32>
    %142 = vector.extract_strided_slice %141 {offsets = [0, 0, 0], sizes = [8, 1, 64], strides = [1, 1, 1]} : vector<8x8x64xf32> to vector<8x1x64xf32>
    %143 = vector.shape_cast %142 : vector<8x1x64xf32> to vector<8x64xf32>
    %144 = vector.extract_strided_slice %141 {offsets = [0, 1, 0], sizes = [8, 1, 64], strides = [1, 1, 1]} : vector<8x8x64xf32> to vector<8x1x64xf32>
    %145 = vector.shape_cast %144 : vector<8x1x64xf32> to vector<8x64xf32>
    %146 = vector.extract_strided_slice %141 {offsets = [0, 2, 0], sizes = [8, 1, 64], strides = [1, 1, 1]} : vector<8x8x64xf32> to vector<8x1x64xf32>
    %147 = vector.shape_cast %146 : vector<8x1x64xf32> to vector<8x64xf32>
    %148 = vector.extract_strided_slice %141 {offsets = [0, 3, 0], sizes = [8, 1, 64], strides = [1, 1, 1]} : vector<8x8x64xf32> to vector<8x1x64xf32>
    %149 = vector.shape_cast %148 : vector<8x1x64xf32> to vector<8x64xf32>
    %150 = vector.extract_strided_slice %141 {offsets = [0, 4, 0], sizes = [8, 1, 64], strides = [1, 1, 1]} : vector<8x8x64xf32> to vector<8x1x64xf32>
    %151 = vector.shape_cast %150 : vector<8x1x64xf32> to vector<8x64xf32>
    %152 = vector.extract_strided_slice %141 {offsets = [0, 5, 0], sizes = [8, 1, 64], strides = [1, 1, 1]} : vector<8x8x64xf32> to vector<8x1x64xf32>
    %153 = vector.shape_cast %152 : vector<8x1x64xf32> to vector<8x64xf32>
    %154 = vector.extract_strided_slice %141 {offsets = [0, 6, 0], sizes = [8, 1, 64], strides = [1, 1, 1]} : vector<8x8x64xf32> to vector<8x1x64xf32>
    %155 = vector.shape_cast %154 : vector<8x1x64xf32> to vector<8x64xf32>
    %156 = vector.extract_strided_slice %141 {offsets = [0, 7, 0], sizes = [8, 1, 64], strides = [1, 1, 1]} : vector<8x8x64xf32> to vector<8x1x64xf32>
    %157 = vector.shape_cast %156 : vector<8x1x64xf32> to vector<8x64xf32>
    %158 = tpu.concatenate %143, %145, %147, %149, %151, %153, %155, %157 in 1 : vector<8x64xf32>, vector<8x64xf32>, vector<8x64xf32>, vector<8x64xf32>, vector<8x64xf32>, vector<8x64xf32>, vector<8x64xf32>, vector<8x64xf32> -> vector<8x512xf32>
    %c0_102 = arith.constant 0 : index
    %c0_103 = arith.constant 0 : index
    %c0_104 = arith.constant 0 : index
    %159 = vector.load %arg13[%c0_102, %c0_103, %c0_104] : memref<1x8x512xf32, #tpu.memory_space<vmem>>, vector<1x8x512xf32>
    %160 = vector.shape_cast %159 : vector<1x8x512xf32> to vector<8x512xf32>
    %161 = vector.shape_cast %158 : vector<8x512xf32> to vector<1x8x512xf32>
    tpu.vector_store %arg13[%c0_102, %c0_103, %c0_104], %161 {strides = array<i32>} : memref<1x8x512xf32, #tpu.memory_space<vmem>>, vector<1x8x512xf32>,
    return
  }
  func.func @transform_0(%arg0: i32) -> (i32, i32, i32, i32) {
    %c0_i32 = arith.constant 0 : i32
    %c0_i32_0 = arith.constant 0 : i32
    %c0_i32_1 = arith.constant 0 : i32
    %c0_i32_2 = arith.constant 0 : i32
    return %arg0, %c0_i32, %c0_i32_0, %c0_i32_1 : i32, i32, i32, i32
  }
  func.func @transform_1(%arg0: i32) -> (i32, i32, i32) {
    %c0_i32 = arith.constant 0 : i32
    %c0_i32_0 = arith.constant 0 : i32
    %c0_i32_1 = arith.constant 0 : i32
    %c0_i32_2 = arith.constant 0 : i32
    return %c0_i32, %c0_i32_0, %c0_i32_1 : i32, i32, i32
  }
  func.func @transform_2(%arg0: i32) -> (i32, i32, i32) {
    %c0_i32 = arith.constant 0 : i32
    %c0_i32_0 = arith.constant 0 : i32
    %c0_i32_1 = arith.constant 0 : i32
    %c0_i32_2 = arith.constant 0 : i32
    return %c0_i32, %c0_i32_0, %c0_i32_1 : i32, i32, i32
  }
  func.func @transform_3(%arg0: i32) -> (i32, i32, i32) {
    %c0_i32 = arith.constant 0 : i32
    %c0_i32_0 = arith.constant 0 : i32
    %c0_i32_1 = arith.constant 0 : i32
    %c0_i32_2 = arith.constant 0 : i32
    return %c0_i32, %c0_i32_0, %c0_i32_1 : i32, i32, i32
  }
  func.func @transform_4(%arg0: i32) -> (i32, i32, i32) {
    %c0_i32 = arith.constant 0 : i32
    %c0_i32_0 = arith.constant 0 : i32
    %c0_i32_1 = arith.constant 0 : i32
    %c0_i32_2 = arith.constant 0 : i32
    return %c0_i32, %c0_i32_0, %c0_i32_1 : i32, i32, i32
  }
  func.func @transform_5(%arg0: i32) -> (i32, i32, i32) {
    %c0_i32 = arith.constant 0 : i32
    %c0_i32_0 = arith.constant 0 : i32
    %c0_i32_1 = arith.constant 0 : i32
    %c0_i32_2 = arith.constant 0 : i32
    return %c0_i32, %c0_i32_0, %c0_i32_1 : i32, i32, i32
  }
  func.func @transform_6(%arg0: i32) -> (i32, i32, i32) {
    %c0_i32 = arith.constant 0 : i32
    %c0_i32_0 = arith.constant 0 : i32
    %c0_i32_1 = arith.constant 0 : i32
    %c0_i32_2 = arith.constant 0 : i32
    return %c0_i32, %c0_i32_0, %c0_i32_1 : i32, i32, i32
  }
  func.func @transform_7(%arg0: i32) -> (i32, i32, i32) {
    %c0_i32 = arith.constant 0 : i32
    %c0_i32_0 = arith.constant 0 : i32
    %c0_i32_1 = arith.constant 0 : i32
    %c0_i32_2 = arith.constant 0 : i32
    return %c0_i32, %c0_i32_0, %c0_i32_1 : i32, i32, i32
  }
  func.func @transform_8(%arg0: i32) -> (i32, i32, i32) {
    %c0_i32 = arith.constant 0 : i32
    %c0_i32_0 = arith.constant 0 : i32
    %c0_i32_1 = arith.constant 0 : i32
    %c0_i32_2 = arith.constant 0 : i32
    return %c0_i32, %c0_i32_0, %c0_i32_1 : i32, i32, i32
  }
  func.func @transform_9(%arg0: i32) -> (i32, i32, i32) {
    %c0_i32 = arith.constant 0 : i32
    %c0_i32_0 = arith.constant 0 : i32
    %c0_i32_1 = arith.constant 0 : i32
    %c0_i32_2 = arith.constant 0 : i32
    return %c0_i32, %c0_i32_0, %c0_i32_1 : i32, i32, i32
  }
  func.func @transform_10(%arg0: i32) -> (i32, i32) {
    %c0_i32 = arith.constant 0 : i32
    %c0_i32_0 = arith.constant 0 : i32
    %c0_i32_1 = arith.constant 0 : i32
    return %c0_i32, %c0_i32_0 : i32, i32
  }
  func.func @transform_11(%arg0: i32) -> (i32, i32) {
    %c0_i32 = arith.constant 0 : i32
    %c0_i32_0 = arith.constant 0 : i32
    %c0_i32_1 = arith.constant 0 : i32
    return %c0_i32, %c0_i32_0 : i32, i32
  }
  func.func @transform_12(%arg0: i32) -> (i32, i32, i32) {
    %c0_i32 = arith.constant 0 : i32
    %c0_i32_0 = arith.constant 0 : i32
    %c0_i32_1 = arith.constant 0 : i32
    return %arg0, %c0_i32, %c0_i32_0 : i32, i32, i32
  }
}

</mosaic_0001>

<bundles_post_ra>
// kernel: efficient_conv_head.1
= control target key start
LH: loop header
LB: loop body
LE: loop exit
PB: predicated region body
PF: predicated region fallthrough
CT: control target
= control target key end

     0   :  { %s3658_s21 = smov 0   ;;  %s5262_s0 = inlined_call_operand.vmem [shape: f32[2,16,16,32], index: 0, kind: input, shape index: {}]   ;;  %s5263_s1 = inlined_call_operand.vmem [shape: bf16[1,32,64], index: 1, kind: input, shape index: {}]   ;;  %s5264_s2 = inlined_call_operand.vmem [shape: f32[1,1,64], index: 2, kind: input, shape index: {}]   ;;  %s5265_s3 = inlined_call_operand.vmem [shape: f32[1,1,64], index: 3, kind: input, shape index: {}]   ;;  %s5266_s4 = inlined_call_operand.vmem [shape: f32[1,9,64], index: 4, kind: input, shape index: {}]   ;;  %s5267_s5 = inlined_call_operand.vmem [shape: f32[1,1,64], index: 5, kind: input, shape index: {}]   ;;  %s5268_s6 = inlined_call_operand.vmem [shape: f32[1,1,64], index: 6, kind: input, shape index: {}]   ;;  %s5269_s7 = inlined_call_operand.vmem [shape: bf16[1,64,32], index: 7, kind: input, shape index: {}]   ;;  %s5270_s8 = inlined_call_operand.vmem [shape: f32[1,1,32], index: 8, kind: input, shape index: {}]   ;;  %s5271_s9 = inlined_call_operand.vmem [shape: f32[1,1,32], index: 9, kind: input, shape index: {}]   ;;  %s5272_s10 = inlined_call_operand.vmem [shape: bf16[288,64], index: 10, kind: input, shape index: {}]   ;;  %s5273_s11 = inlined_call_operand.vmem [shape: f32[1,64], index: 11, kind: input, shape index: {}]   ;;  %s5274_s12 = inlined_call_operand.vmem [shape: f32[2,8,512], index: 12, kind: output, shape index: {}]  }
   0x1 LB: > { %s3135_s22 = sadd.s32 4294967295, %s3587_s21   ;;  %p3139_p0 = scmp.ge.s32.totalorder %s3587_s21, 1  ;;  %s3587_s21 = sphi %s3658_s21, %s22_s21  }
   0x2   : > { %p362_p1 = scmp.lt.s32.totalorder %s3587_s21, 3 }
   0x4   : > { %p363_p2 = pnand %p3139_p0, %p362_p1 }
   0x6   : > { %366 = sbr.rel (%p363_p2) target bundleno = 1264 (0x4f0), region = 68 }
   0xd   : > { %v3520_v0 = vld [vmem:[%s5263_s1] sm:$0xff]   ;;  %p404_p3 = scmp.lt.s32.totalorder %s3135_s22, 1  ;;  %v3521_v1 = vld [vmem:[%s5263_s1 + $0x8] sm:$0xff]   ;;  %vm461_vm0 = vcmask 261120   ;;  %vm415_vm1 = vcmask 523264   ;;  %v5275_v50 = vmov 0.0   ;;  %v925_v55 = vlaneseq }
   0xe   : > { %3300 = vmatprep.subr.bf16.mxu0 %v3520_v0  ;;  %416 = vst.msk [vmem:[#allocation2] sm:$0xff] %vm415_vm1, %v5275_v50  ;;  %417 = vst.msk [vmem:[#allocation2 + $0x8] sm:$0xff] %vm415_vm1, %v5275_v50  ;;  %vm424_vm2 = vcmask 516096   ;;  %vm418_vm3 = vcmask 517120   ;;  %v3522_v51 = vld [vmem:[%s5269_s7] sm:$0xff]   ;;  %v3523_v52 = vld [vmem:[%s5269_s7 + $0x8] sm:$0xff]  }
   0xf   : > { %s5444_s22 = smov (!%p404_p3, %s3135_s22), 1  ;;  %3301 = vmatpush3.bf16.msra.mxu0 %v3520_v0  ;;  %421 = vst.msk [vmem:[#allocation2 + $0x198] sm:$0xff] %vm415_vm1, %v5275_v50  ;;  %422 = vst.msk [vmem:[#allocation2 + $0x1a0] sm:$0xff] %vm415_vm1, %v5275_v50  ;;  %3336 = vmatprep.subr.bf16.mxu1 %v3522_v51  ;;  %v3524_v53 = vld [vmem:[%s5269_s7 + $0x10] sm:$0xff]   ;;  %v3525_v54 = vld [vmem:[%s5269_s7 + $0x18] sm:$0xff]   ;;  %v3826_v56 = vshrl.u32 %v925_v55, 7 }
  0x10   : > { %3302 = vmatprep.subr.bf16.mxu0 %v3521_v1  ;;  %s3214_s27 = sshll.u32 %s5444_s22, 8  ;;  %462 = vst.msk [vmem:[#allocation3] sm:$0xff] %vm461_vm0, %v5275_v50  ;;  %463 = vst.msk [vmem:[#allocation3 + $0x8] sm:$0xff] %vm461_vm0, %v5275_v50  ;;  %3337 = vmatpush3.bf16.msra.mxu1 %v3522_v51  ;;  %v3831_v57 = vld [vmem:[%s5264_s2] ss:$0 sm:$0xff]  ;;  %vm470_vm4 = vcmask 253952  }
  0x11   : > { %s3678_s30 = scalar_lea.vmem %s5262_s0, %s3214_s27  ;;  %425 = vst.msk [vmem:[#allocation2] sm:$0x1] %vm424_vm2, %v5275_v50  ;;  %426 = vst.msk [vmem:[#allocation2 + $0x18] sm:$0x1] %vm424_vm2, %v5275_v50  ;;  %3338 = vmatprep.subr.bf16.mxu1 %v3523_v52  ;;  %v995_v58 = vsub.s32 0, %v3826_v56  ;;  %v923_v59 = vld [vmem:[%s5266_s4] sm:$0xff] }
  0x12   : > { %v507_v2 = vld [vmem:[%s3678_s30] sm:$0xff]  ;;  %v508_v3 = vld [vmem:[%s3678_s30 + $0x8] sm:$0xff]  ;;  %v509_v4 = vld [vmem:[%s3678_s30 + $0x10] sm:$0xff]  ;;  %427 = vst.msk [vmem:[#allocation2 + $0x30] sm:$0x1] %vm424_vm2, %v5275_v50  ;;  %v1095_v60 = vsub.s32 1, %v3826_v56 }
  0x13   : > { %3303 = vmatpush3.bf16.msra.mxu0 %v3521_v1  ;;  %v539_v5 = vpack.c.bf16 %v508_v3, %v507_v2  ;;  %v510_v6 = vld [vmem:[%s3678_s30 + $0x18] sm:$0xff]  ;;  %v511_v7 = vld [vmem:[%s3678_s30 + $0x20] sm:$0xff]  ;;  %v512_v8 = vld [vmem:[%s3678_s30 + $0x28] sm:$0xff]  ;;  %428 = vst.msk [vmem:[#allocation2 + $0x48] sm:$0x1] %vm424_vm2, %v5275_v50  ;;  %v927_v63 = vsub.s32 4, %v3826_v56 }
  0x14   : > { %v540_v9 = vpack.c.bf16 %v510_v6, %v509_v4  ;;  %v541_v10 = vpack.c.bf16 %v512_v8, %v511_v7  ;;  %v513_v11 = vld [vmem:[%s3678_s30 + $0x30] sm:$0xff]  ;;  %v514_v12 = vld [vmem:[%s3678_s30 + $0x38] sm:$0xff]  ;;  %v515_v13 = vld [vmem:[%s3678_s30 + $0x40] sm:$0xff]  ;;  %429 = vst.msk [vmem:[#allocation2 + $0x60] sm:$0x1] %vm424_vm2, %v5275_v50  ;;  %3339 = vmatpush3.bf16.msra.mxu1 %v3523_v52  ;;  %v1195_v0 = vsub.s32 2, %v3826_v56  ;;  %v3847_v4 = vrot.slane %v923_v59, %v995_v58 }
  0x15   : > { %3304 = vmatprep.mubr.msk.bf16.mxu0 %vm461_vm0, %v539_v5  ;;  %v516_v14 = vld [vmem:[%s3678_s30 + $0x48] sm:$0xff]  ;;  %v542_v15 = vpack.c.bf16 %v514_v12, %v513_v11  ;;  %v517_v17 = vld [vmem:[%s3678_s30 + $0x50] sm:$0xff]  ;;  %v518_v18 = vld [vmem:[%s3678_s30 + $0x58] sm:$0xff]  ;;  %430 = vst.msk [vmem:[#allocation2 + $0x78] sm:$0x1] %vm424_vm2, %v5275_v50  ;;  %3340 = vmatprep.subr.bf16.mxu1 %v3524_v53  ;;  %v3850_v8 = vrot.slane %v923_v59, %v1095_v60  ;;  %vm464_vm5 = vcmask 254976  }
  0x16   : > { %3305 = vmatmul.mubr.msk.bf16.vlgmr.msra.gmra.mrb[0].mxu0 %vm461_vm0, %v540_v9  ;;  %v543_v16 = vpack.c.bf16 %v516_v14, %v515_v13  ;;  %v519_v19 = vld [vmem:[%s3678_s30 + $0x60] sm:$0xff]  ;;  %v520_v20 = vld [vmem:[%s3678_s30 + $0x68] sm:$0xff]  ;;  %v544_v21 = vpack.c.bf16 %v518_v18, %v517_v17  ;;  %v521_v23 = vld [vmem:[%s3678_s30 + $0x70] sm:$0xff]  ;;  %431 = vst.msk [vmem:[#allocation2 + $0x90] sm:$0x1] %vm424_vm2, %v5275_v50  ;;  %v3853_v11 = vrot.slane %v923_v59, %v927_v63  ;;  %v1295_v18 = vsub.s32 3, %v3826_v56 }
  0x17   : > { %3308 = vmatprep.mubr.msk.bf16.mxu0 %vm461_vm0, %v541_v10  ;;  %v545_v22 = vpack.c.bf16 %v520_v20, %v519_v19  ;;  %v522_v24 = vld [vmem:[%s3678_s30 + $0x78] sm:$0xff]  ;;  %v523_v25 = vld [vmem:[%s3678_s30 + $0x80] sm:$0xff]  ;;  %v524_v26 = vld [vmem:[%s3678_s30 + $0x88] sm:$0xff]  ;;  %432 = vst.msk [vmem:[#allocation2 + $0xa8] sm:$0x1] %vm424_vm2, %v5275_v50  ;;  %v3856_v14 = vrot.slane %v923_v59, %v1195_v0  ;;  %s3590_s17 = smov 64  }
  0x18   : > { %v546_v27 = vpack.c.bf16 %v522_v24, %v521_v23  ;;  %v547_v28 = vpack.c.bf16 %v524_v26, %v523_v25  ;;  %v525_v29 = vld [vmem:[%s3678_s30 + $0x90] sm:$0xff]  ;;  %v526_v30 = vld [vmem:[%s3678_s30 + $0x98] sm:$0xff]  ;;  %v527_v31 = vld [vmem:[%s3678_s30 + $0xa0] sm:$0xff]  ;;  %433 = vst.msk [vmem:[#allocation2 + $0xc0] sm:$0x1] %vm424_vm2, %v5275_v50  ;;  %3341 = vmatpush3.bf16.msra.mxu1 %v3524_v53  ;;  %v1496_v26 = vsub.s32 6, %v3826_v56 }
  0x19   : > { %v528_v32 = vld [vmem:[%s3678_s30 + $0xa8] sm:$0xff]  ;;  %v548_v33 = vpack.c.bf16 %v526_v30, %v525_v29  ;;  %v529_v35 = vld [vmem:[%s3678_s30 + $0xb0] sm:$0xff]  ;;  %v530_v36 = vld [vmem:[%s3678_s30 + $0xb8] sm:$0xff]  ;;  %434 = vst.msk [vmem:[#allocation2 + $0xd8] sm:$0x1] %vm424_vm2, %v5275_v50  ;;  %3342 = vmatprep.subr.bf16.mxu1 %v3525_v54  ;;  %v1395_v29 = vsub.s32 5, %v3826_v56 }
  0x1a   : > { %v549_v34 = vpack.c.bf16 %v528_v32, %v527_v31  ;;  %v531_v37 = vld [vmem:[%s3678_s30 + $0xc0] sm:$0xff]  ;;  %v532_v38 = vld [vmem:[%s3678_s30 + $0xc8] sm:$0xff]  ;;  %v550_v39 = vpack.c.bf16 %v530_v36, %v529_v35  ;;  %v533_v41 = vld [vmem:[%s3678_s30 + $0xd0] sm:$0xff]  ;;  %435 = vst.msk [vmem:[#allocation2 + $0xf0] sm:$0x1] %vm424_vm2, %v5275_v50  ;;  %v1596_v30 = vsub.s32 7, %v3826_v56  ;;  %v3872_v36 = vrot.slane %v923_v59, %v1295_v18 }
  0x1b   : > { %v551_v40 = vpack.c.bf16 %v532_v38, %v531_v37  ;;  %v534_v42 = vld [vmem:[%s3678_s30 + $0xd8] sm:$0xff]  ;;  %v535_v43 = vld [vmem:[%s3678_s30 + $0xe0] sm:$0xff]  ;;  %v536_v44 = vld [vmem:[%s3678_s30 + $0xe8] sm:$0xff]  ;;  %436 = vst.msk [vmem:[#allocation2 + $0x108] sm:$0x1] %vm424_vm2, %v5275_v50  ;;  %s3591_s18 = smov 32  }
  0x1c   : > { %v552_v45 = vpack.c.bf16 %v534_v42, %v533_v41  ;;  %v553_v46 = vpack.c.bf16 %v536_v44, %v535_v43  ;;  %v537_v47 = vld [vmem:[%s3678_s30 + $0xf0] sm:$0xff]  ;;  %v538_v48 = vld [vmem:[%s3678_s30 + $0xf8] sm:$0xff]  ;;  %437 = vst.msk [vmem:[#allocation2 + $0x120] sm:$0x1] %vm424_vm2, %v5275_v50  ;;  %438 = vst.msk [vmem:[#allocation2 + $0x138] sm:$0x1] %vm424_vm2, %v5275_v50  ;;  %3343 = vmatpush3.bf16.msra.mxu1 %v3525_v54  ;;  %v3887_v51 = vrot.slane %v923_v59, %v1596_v30 }
  0x1d   : > { %v554_v49 = vpack.c.bf16 %v538_v48, %v537_v47  ;;  %439 = vst.msk [vmem:[#allocation2 + $0x150] sm:$0x1] %vm424_vm2, %v5275_v50  ;;  %440 = vst.msk [vmem:[#allocation2 + $0x168] sm:$0x1] %vm424_vm2, %v5275_v50  ;;  %v3841_v62 = vld [vmem:[%s5265_s3] ss:$0 sm:$0xff] }
  0x1e   : > { %3309 = vmatmul.mubr.msk.bf16.gmra.mrb[4].mxu0 %vm461_vm0, %v542_v15  ;;  %441 = vst.msk [vmem:[#allocation2 + $0x180] sm:$0x1] %vm424_vm2, %v5275_v50  ;;  %444 = vst.msk [vmem:[#allocation2 + $0x29] sm:$0x1] %vm424_vm2, %v5275_v50  ;;  %v961_v7 = vld [vmem:[#allocation2] sm:$0xff]  ;;  %v962_v20 = vld [vmem:[#allocation2 + $0x8] sm:$0xff] }
  0x1f   : > { %3312 = vmatprep.mubr.msk.bf16.mxu0 %vm461_vm0, %v543_v16  ;;  %445 = vst.msk [vmem:[#allocation2 + $0x41] sm:$0x1] %vm424_vm2, %v5275_v50  ;;  %446 = vst.msk [vmem:[#allocation2 + $0x59] sm:$0x1] %vm424_vm2, %v5275_v50  ;;  %v1061_v13 = vld [vmem:[#allocation2 + $0x1] sm:$0xff]  ;;  %s3592_s26 = smov 96  }
  0x20   : > { %447 = vst.msk [vmem:[#allocation2 + $0x71] sm:$0x1] %vm424_vm2, %v5275_v50  ;;  %448 = vst.msk [vmem:[#allocation2 + $0x89] sm:$0x1] %vm424_vm2, %v5275_v50  ;;  %v1161_v17 = vld [vmem:[#allocation2 + $0x2] sm:$0xff]  ;;  %vm2607_vm6 = vcmask 785408  }
  0x21   : > { %449 = vst.msk [vmem:[#allocation2 + $0xa1] sm:$0x1] %vm424_vm2, %v5275_v50  ;;  %450 = vst.msk [vmem:[#allocation2 + $0xb9] sm:$0x1] %vm424_vm2, %v5275_v50  ;;  %v1197_v32 = vmul.f32 %v3856_v14, %v1161_v17  ;;  %vm2938_vm7 = vcmask 1041409   ;;  %vm2941_vm8 = vcmask 1042434  }
  0x22   : > { %451 = vst.msk [vmem:[#allocation2 + $0xd1] sm:$0x1] %vm424_vm2, %v5275_v50  ;;  %452 = vst.msk [vmem:[#allocation2 + $0xe9] sm:$0x1] %vm424_vm2, %v5275_v50  ;;  %vm2944_vm9 = vcmask 1043459   ;;  %vm2947_vm10 = vcmask 1044484  }
  0x23   : > { %453 = vst.msk [vmem:[#allocation2 + $0x101] sm:$0x1] %vm424_vm2, %v5275_v50  ;;  %454 = vst.msk [vmem:[#allocation2 + $0x119] sm:$0x1] %vm424_vm2, %v5275_v50  ;;  %vm2950_vm11 = vcmask 1045509   ;;  %vm2953_vm12 = vcmask 1046534  }
  0x24   : > { %455 = vst.msk [vmem:[#allocation2 + $0x131] sm:$0x1] %vm424_vm2, %v5275_v50  ;;  %456 = vst.msk [vmem:[#allocation2 + $0x149] sm:$0x1] %vm424_vm2, %v5275_v50  ;;  %vm2956_vm13 = vcmask 1047559   ;;  %s3215_s29 = sshll.u32 %s5444_s22, 5 }
  0x25   : > { %457 = vst.msk [vmem:[#allocation2 + $0x161] sm:$0x1] %vm424_vm2, %v5275_v50  ;;  %458 = vst.msk [vmem:[#allocation2 + $0x179] sm:$0x1] %vm424_vm2, %v5275_v50  ;;  %s413_s15 = scalar_lea.vmem %s5274_s12, %s3215_s29 }
  0x26   : > { %3313 = vmatmul.mubr.msk.bf16.gmra.mrb[8].mxu0 %vm461_vm0, %v544_v21  ;;  %459 = vst.msk [vmem:[#allocation2 + $0x191] sm:$0x1] %vm424_vm2, %v5275_v50  ;;  %442 = vst.msk [vmem:[#allocation2 + $0x198] sm:$0x1] %vm424_vm2, %v5275_v50 }
  0x27   : > { %3316 = vmatprep.mubr.msk.bf16.mxu0 %vm461_vm0, %v545_v22  ;;  %419 = vst.msk [vmem:[#allocation2 + $0x10] sm:$0x3] %vm418_vm3, %v5275_v50  ;;  %423 = vst.msk [vmem:[#allocation2 + $0x1a8] sm:$0x3] %vm418_vm3, %v5275_v50  ;;  %v997_v22 = vmul.f32 %v3847_v4, %v961_v7 }
  0x28   : > { %443 = vst.msk [vmem:[#allocation2 + $0x11] sm:$0x1] %vm424_vm2, %v5275_v50  ;;  %460 = vst.msk [vmem:[#allocation2 + $0x1a9] sm:$0x1] %vm424_vm2, %v5275_v50 }
  0x2e   : > { %3317 = vmatmul.mubr.msk.bf16.gmra.mrb[12].mxu0 %vm461_vm0, %v546_v27  ;;  %v1062_v24 = vld [vmem:[#allocation2 + $0x9] sm:$0xff]  ;;  %v1097_v27 = vmul.f32 %v3850_v8, %v1061_v13 }
  0x2f   : > { %3320 = vmatprep.mubr.msk.bf16.mxu0 %vm461_vm0, %v547_v28  ;;  %v1162_v25 = vld [vmem:[#allocation2 + $0xa] sm:$0xff]  ;;  %v1098_v37 = vmul.f32 %v3850_v8, %v1062_v24 }
  0x30   : > { %v1198_v38 = vmul.f32 %v3856_v14, %v1162_v25 }
  0x36   : > { %3321 = vmatmul.mubr.msk.bf16.gmra.mrb[16].mxu0 %vm461_vm0, %v548_v33 }
  0x37   : > { %3324 = vmatprep.mubr.msk.bf16.mxu0 %vm461_vm0, %v549_v34  ;;  %v998_v34 = vmul.f32 %v3847_v4, %v962_v20 }
  0x3e   : > { %3325 = vmatmul.mubr.msk.bf16.gmra.mrb[20].mxu0 %vm461_vm0, %v550_v39 }
  0x3f   : > { %3328 = vmatprep.mubr.msk.bf16.mxu0 %vm461_vm0, %v551_v40 }
  0x46   : > { %3329 = vmatmul.mubr.msk.bf16.gmra.mrb[24].mxu0 %vm461_vm0, %v552_v45  ;;  %v3881_v45 = vrot.slane %v923_v59, %v1496_v26 }
  0x47   : > { %3332 = vmatprep.mubr.msk.bf16.mxu0 %vm461_vm0, %v553_v46 }
  0x4e   : > { %3333 = vmatmul.mubr.msk.bf16.gmra.mrb[28].mxu0 %vm461_vm0, %v554_v49  ;;  %v3885_v49 = vrot.slane %v923_v59, %v1395_v29 }
  0xe9   : > { %v3306_v61 = vpop.f32.mrb[0].mxu0 }
  0xea   : > { %v789_v1 = vmul.f32 %v3306_v61, %v3831_v57  ;;  %v653_v2 = vpop.f32.mrb[1].mxu0 }
  0xeb   : > { %v787_v3 = vmul.f32 %v3831_v57, %v653_v2  ;;  %v3307_v5 = vpop.f32.mrb[2].mxu0 }
  0xec   : > { %v828_v6 = vadd.f32 %v3841_v62, %v789_v1  ;;  %v790_v9 = vmul.f32 %v3307_v5, %v3831_v57  ;;  %v656_v10 = vpop.f32.mrb[3].mxu0 }
  0xed   : > { %v826_v12 = vadd.f32 %v3841_v62, %v787_v3  ;;  %v788_v15 = vmul.f32 %v3831_v57, %v656_v10 }
  0xee   : > { %v860_v16 = vmax.f32 %v828_v6, 0.0  ;;  %v829_v19 = vadd.f32 %v3841_v62, %v790_v9 }
  0xef   : > { %v858_v21 = vmax.f32 %v826_v12, 0.0  ;;  %v827_v23 = vadd.f32 %v3841_v62, %v788_v15 }
  0xf0   : > { %893 = vst.msk [vmem:[#allocation2 + $0x31] sm:$0xff] %vm415_vm1, %v860_v16  ;;  %v861_v28 = vmax.f32 %v829_v19, 0.0  ;;  %v3892_v56 = vmul.f32 %v3853_v11, %v860_v16 }
  0xf1   : > { %891 = vst.msk [vmem:[#allocation2 + $0x19] sm:$0xff] %vm415_vm1, %v858_v21  ;;  %v929_v31 = vmul.f32 %v3853_v11, %v858_v21  ;;  %v859_v33 = vmax.f32 %v827_v23, 0.0  ;;  %v3310_v35 = vpop.f32.mrb[4].mxu0 }
  0xf2   : > { %894 = vst.msk [vmem:[#allocation2 + $0x39] sm:$0xff] %vm415_vm1, %v861_v28  ;;  %v793_v39 = vmul.f32 %v3310_v35, %v3831_v57  ;;  %v669_v40 = vpop.f32.mrb[5].mxu0  ;;  %v3895_v58 = vmul.f32 %v3853_v11, %v861_v28 }
  0xf3   : > { %v1029_v41 = vadd.f32 %v997_v22, %v929_v31  ;;  %892 = vst.msk [vmem:[#allocation2 + $0x21] sm:$0xff] %vm415_vm1, %v859_v33  ;;  %v930_v42 = vmul.f32 %v3853_v11, %v859_v33  ;;  %v791_v43 = vmul.f32 %v3831_v57, %v669_v40  ;;  %v3311_v44 = vpop.f32.mrb[6].mxu0 }
  0xf4   : > { %v832_v46 = vadd.f32 %v3841_v62, %v793_v39  ;;  %v794_v47 = vmul.f32 %v3311_v44, %v3831_v57  ;;  %v672_v48 = vpop.f32.mrb[7].mxu0 }
  0xf5   : > { %v1129_v52 = vadd.f32 %v1097_v27, %v1029_v41  ;;  %v1030_v53 = vadd.f32 %v998_v34, %v930_v42  ;;  %v830_v54 = vadd.f32 %v3841_v62, %v791_v43  ;;  %v792_v55 = vmul.f32 %v3831_v57, %v672_v48 }
  0xf6   : > { %v864_v60 = vmax.f32 %v832_v46, 0.0  ;;  %v833_v61 = vadd.f32 %v3841_v62, %v794_v47 }
  0xf7   : > { %v1229_v63 = vadd.f32 %v1197_v32, %v1129_v52  ;;  %v1130_v0 = vadd.f32 %v1098_v37, %v1030_v53  ;;  %v862_v1 = vmax.f32 %v830_v54, 0.0  ;;  %v3898_v59 = vld [vmem:[#allocation2 + $0x30] sm:$0xff]  ;;  %v831_v3 = vadd.f32 %v3841_v62, %v792_v55 }
  0xf8   : > { %v3900_v2 = vld [vmem:[#allocation2 + $0x31] sm:$0xff]  ;;  %897 = vst.msk [vmem:[#allocation2 + $0x61] sm:$0xff] %vm415_vm1, %v864_v60  ;;  %v3907_v6 = vmul.f32 %v3853_v11, %v864_v60  ;;  %v1001_v7 = vmul.f32 %v3847_v4, %v3898_v59  ;;  %v865_v10 = vmax.f32 %v833_v61, 0.0 }
  0xf9   : > { %v3903_v5 = vld [vmem:[#allocation2 + $0x18] sm:$0xff]  ;;  %v1101_v9 = vmul.f32 %v3850_v8, %v3900_v2  ;;  %v1230_v13 = vadd.f32 %v1198_v38, %v1130_v0  ;;  %895 = vst.msk [vmem:[#allocation2 + $0x49] sm:$0xff] %vm415_vm1, %v862_v1  ;;  %v933_v15 = vmul.f32 %v3853_v11, %v862_v1  ;;  %v863_v17 = vmax.f32 %v831_v3, 0.0  ;;  %v3314_v20 = vpop.f32.mrb[8].mxu0 }
  0xfa   : > { %v1297_v12 = vmul.f32 %v3872_v36, %v3903_v5  ;;  %v3917_v16 = vld [vmem:[#allocation2 + $0x32] sm:$0xff]  ;;  %v3923_v21 = vld [vmem:[#allocation2 + $0x20] sm:$0xff]  ;;  %898 = vst.msk [vmem:[#allocation2 + $0x69] sm:$0xff] %vm415_vm1, %v865_v10  ;;  %v3929_v23 = vmul.f32 %v3853_v11, %v865_v10  ;;  %v685_v27 = vpop.f32.mrb[9].mxu0  ;;  %v797_v35 = vmul.f32 %v3314_v20, %v3831_v57 }
  0xfb   : > { %v3919_v18 = vld [vmem:[#allocation2 + $0x38] sm:$0xff]  ;;  %v1201_v22 = vmul.f32 %v3856_v14, %v3917_v16  ;;  %v1298_v29 = vmul.f32 %v3872_v36, %v3923_v21  ;;  %v1033_v30 = vadd.f32 %v1001_v7, %v933_v15  ;;  %896 = vst.msk [vmem:[#allocation2 + $0x51] sm:$0xff] %vm415_vm1, %v863_v17  ;;  %v934_v31 = vmul.f32 %v3853_v11, %v863_v17  ;;  %v3315_v32 = vpop.f32.mrb[10].mxu0  ;;  %v3950_v40 = vld [vmem:[#allocation2 + $0x22] sm:$0xff] }
  0xfc   : > { %v3921_v19 = vld [vmem:[#allocation2 + $0x39] sm:$0xff]  ;;  %5326 = vst [vmem:[#allocation4_spill] sm:$0xff] %v3929_v23  ;;  %v1002_v24 = vmul.f32 %v3847_v4, %v3919_v18  ;;  %v3937_v28 = vadd.f32 %v1297_v12, %v1229_v63  ;;  %v795_v37 = vmul.f32 %v3831_v57, %v685_v27  ;;  %v798_v38 = vmul.f32 %v3315_v32, %v3831_v57  ;;  %v688_v39 = vpop.f32.mrb[11].mxu0 }
  0xfd   : > { %v1102_v25 = vmul.f32 %v3850_v8, %v3921_v19  ;;  %v3935_v26 = vld [vmem:[#allocation2 + $0x3a] sm:$0xff]  ;;  %v3952_v41 = vadd.f32 %v1298_v29, %v1230_v13  ;;  %v1133_v42 = vadd.f32 %v1101_v9, %v1033_v30  ;;  %v796_v44 = vmul.f32 %v3831_v57, %v688_v39 }
  0xfe   : > { %v3943_v33 = vld [vmem:[#allocation2 + $0x1a] sm:$0xff]  ;;  %v1202_v34 = vmul.f32 %v3856_v14, %v3935_v26  ;;  %v1034_v43 = vadd.f32 %v1002_v24, %v934_v31  ;;  %v836_v46 = vadd.f32 %v3841_v62, %v797_v35  ;;  %v834_v47 = vadd.f32 %v3841_v62, %v795_v37 }
  0xff   : > { %v837_v48 = vadd.f32 %v3841_v62, %v798_v38  ;;  %v1397_v52 = vmul.f32 %v3885_v49, %v3943_v33  ;;  %v1233_v53 = vadd.f32 %v1201_v22, %v1133_v42  ;;  %v3960_v55 = vld [vmem:[#allocation2 + $0x60] sm:$0xff]  ;;  %v835_v61 = vadd.f32 %v3841_v62, %v796_v44 }
 0x100   : > { %v1134_v54 = vadd.f32 %v1102_v25, %v1034_v43  ;;  %v3962_v60 = vld [vmem:[#allocation2 + $0x61] sm:$0xff]  ;;  %v1398_v63 = vmul.f32 %v3885_v49, %v3950_v40  ;;  %v868_v1 = vmax.f32 %v836_v46, 0.0  ;;  %v866_v3 = vmax.f32 %v834_v47, 0.0 }
 0x101   : > { %v3967_v0 = vld [vmem:[#allocation2 + $0x48] sm:$0xff]  ;;  %v1005_v7 = vmul.f32 %v3847_v4, %v3960_v55  ;;  %v1105_v9 = vmul.f32 %v3850_v8, %v3962_v60  ;;  %v869_v17 = vmax.f32 %v837_v48, 0.0  ;;  %v867_v20 = vmax.f32 %v835_v61, 0.0  ;;  %v3318_v24 = vpop.f32.mrb[12].mxu0 }
 0x102   : > { %v1301_v10 = vmul.f32 %v3872_v36, %v3967_v0  ;;  %v1234_v12 = vadd.f32 %v1202_v34, %v1134_v54  ;;  %v3975_v13 = vld [vmem:[#allocation2 + $0x68] sm:$0xff]  ;;  %v3981_v25 = vld [vmem:[#allocation2 + $0x50] sm:$0xff]  ;;  %901 = vst.msk [vmem:[#allocation2 + $0x91] sm:$0xff] %vm415_vm1, %v868_v1  ;;  %v3989_v30 = vmul.f32 %v3853_v11, %v868_v1  ;;  %899 = vst.msk [vmem:[#allocation2 + $0x79] sm:$0xff] %vm415_vm1, %v866_v3  ;;  %v701_v35 = vpop.f32.mrb[13].mxu0 }
 0x103   : > { %5327 = vst [vmem:[#allocation5_spill] sm:$0xff] %v3975_v13  ;;  %v3977_v15 = vld [vmem:[#allocation2 + $0x62] sm:$0xff]  ;;  %v3983_v27 = vld [vmem:[#allocation2 + $0x52] sm:$0xff]  ;;  %v1503_v29 = vmul.f32 %v3881_v45, %v3975_v13  ;;  %v937_v31 = vmul.f32 %v3853_v11, %v866_v3  ;;  %v3995_v34 = vld [vmem:[#allocation2 + $0x6a] sm:$0xff]  ;;  %v1302_v38 = vmul.f32 %v3872_v36, %v3981_v25  ;;  %v4005_v42 = vmul.f32 %v3853_v11, %v869_v17  ;;  %v3319_v43 = vpop.f32.mrb[14].mxu0 }
 0x104   : > { %v3979_v22 = vld [vmem:[#allocation2 + $0x69] sm:$0xff]  ;;  %5328 = vst [vmem:[#allocation6_spill] sm:$0xff] %v3989_v30  ;;  %v1205_v32 = vmul.f32 %v3856_v14, %v3977_v15  ;;  %v3997_v37 = vadd.f32 %v1301_v10, %v1233_v53  ;;  %v1402_v39 = vmul.f32 %v3885_v49, %v3983_v27  ;;  %902 = vst.msk [vmem:[#allocation2 + $0x99] sm:$0xff] %vm415_vm1, %v869_v17  ;;  %v704_v53 = vpop.f32.mrb[15].mxu0 }
 0x105   : > { %5329 = vst [vmem:[#allocation7_spill] sm:$0xff] %v4005_v42  ;;  %900 = vst.msk [vmem:[#allocation2 + $0x81] sm:$0xff] %vm415_vm1, %v867_v20  ;;  %v1037_v44 = vadd.f32 %v1005_v7, %v937_v31  ;;  %v938_v46 = vmul.f32 %v3853_v11, %v867_v20  ;;  %v1006_v47 = vmul.f32 %v3975_v13, %v3847_v4 }
 0x106   : > { %v1106_v48 = vmul.f32 %v3850_v8, %v3979_v22  ;;  %v1334_v54 = vadd.f32 %v1302_v38, %v1234_v12  ;;  %v1206_v61 = vmul.f32 %v3856_v14, %v3995_v34  ;;  %v801_v1 = vmul.f32 %v3318_v24, %v3831_v57 }
 0x107   : > { %v799_v3 = vmul.f32 %v3831_v57, %v701_v35  ;;  %v1137_v10 = vadd.f32 %v1105_v9, %v1037_v44  ;;  %v1038_v17 = vadd.f32 %v1006_v47, %v938_v46  ;;  %v802_v7 = vmul.f32 %v3319_v43, %v3831_v57 }
 0x108   : > { %v800_v20 = vmul.f32 %v3831_v57, %v704_v53  ;;  %v1434_v31 = vadd.f32 %v1402_v39, %v1334_v54  ;;  %v840_v50 = vadd.f32 %v3841_v62, %v801_v1  ;;  %v4022_v12 = vadd.f32 %v1397_v52, %v3937_v28 }
 0x109   : > { %v838_v42 = vadd.f32 %v3841_v62, %v799_v3  ;;  %v1237_v38 = vadd.f32 %v1205_v32, %v1137_v10  ;;  %v1138_v30 = vadd.f32 %v1106_v48, %v1038_v17  ;;  %v841_v24 = vadd.f32 %v3841_v62, %v802_v7  ;;  %v4028_v44 = vld [vmem:[#allocation2 + $0x78] sm:$0xff]  ;;  %v4030_v39 = vld [vmem:[#allocation2 + $0x90] sm:$0xff]  ;;  %v3322_v53 = vpop.f32.mrb[16].mxu0 }
 0x10a   : > { %v839_v35 = vadd.f32 %v3841_v62, %v800_v20  ;;  %v4026_v9 = vadd.f32 %v1503_v29, %v1434_v31  ;;  %5330 = vst [vmem:[#allocation8_spill] sm:$0xff] %v4028_v44  ;;  %v872_v43 = vmax.f32 %v840_v50, 0.0  ;;  %5331 = vst [vmem:[#allocation9_spill] sm:$0xff] %v4030_v39  ;;  %v4032_v47 = vld [vmem:[#allocation2 + $0x91] sm:$0xff]  ;;  %v4035_v28 = vadd.f32 %v1398_v63, %v3952_v41  ;;  %v717_v1 = vpop.f32.mrb[17].mxu0 }
 0x10b   : > { %v870_v46 = vmax.f32 %v838_v42, 0.0  ;;  %5332 = vst [vmem:[#allocation10_spill] sm:$0xff] %v4032_v47  ;;  %v1305_v52 = vmul.f32 %v3872_v36, %v4028_v44  ;;  %v1238_v32 = vadd.f32 %v1206_v61, %v1138_v30  ;;  %v1471_v54 = vld [vmem:[#allocation2 + $0x98] sm:$0xff]  ;;  %v1009_v50 = vmul.f32 %v3847_v4, %v4030_v39  ;;  %v3323_v7 = vpop.f32.mrb[18].mxu0 }
 0x10c   : > { %v4039_v48 = vld [vmem:[#allocation2 + $0x80] sm:$0xff]  ;;  %v1109_v42 = vmul.f32 %v3850_v8, %v4032_v47  ;;  %v1507_v30 = vmul.f32 %v3881_v45, %v1471_v54  ;;  %905 = vst.msk [vmem:[#allocation2 + $0xc1] sm:$0xff] %vm415_vm1, %v872_v43  ;;  %v4054_v61 = vmul.f32 %v3853_v11, %v872_v43  ;;  %v4057_v3 = vld [vmem:[#allocation2 + $0x92] sm:$0xff]  ;;  %v873_v39 = vmax.f32 %v841_v24, 0.0 }
 0x10d   : > { %5333 = vst [vmem:[#allocation11_spill] sm:$0xff] %v4039_v48  ;;  %v4041_v29 = vld [vmem:[#allocation2 + $0x82] sm:$0xff]  ;;  %v1306_v41 = vmul.f32 %v3872_v36, %v4039_v48  ;;  %903 = vst.msk [vmem:[#allocation2 + $0xa9] sm:$0xff] %vm415_vm1, %v870_v46  ;;  %v4059_v10 = vld [vmem:[#allocation2 + $0x99] sm:$0xff]  ;;  %v4063_v20 = vadd.f32 %v1305_v52, %v1237_v38  ;;  %v941_v31 = vmul.f32 %v3853_v11, %v870_v46 }
 0x10e   : > { %5334 = vst [vmem:[#allocation12_spill] sm:$0xff] %v4041_v29  ;;  %v1406_v63 = vmul.f32 %v3885_v49, %v4041_v29  ;;  %5335 = vst [vmem:[#allocation13_spill] sm:$0xff] %v4054_v61  ;;  %v4061_v17 = vld [vmem:[#allocation2 + $0x9a] sm:$0xff]  ;;  %v1209_v47 = vmul.f32 %v3856_v14, %v4057_v3  ;;  %v720_v29 = vpop.f32.mrb[19].mxu0  ;;  %v871_v61 = vmax.f32 %v839_v35, 0.0  ;;  %v1010_v48 = vmul.f32 %v1471_v54, %v3847_v4 }
 0x10f   : > { %5336 = vst [vmem:[#allocation14_spill] sm:$0xff] %v4057_v3  ;;  %5337 = vst [vmem:[#allocation15_spill] sm:$0xff] %v4059_v10  ;;  %v1338_v43 = vadd.f32 %v1306_v41, %v1238_v32  ;;  %v1110_v44 = vmul.f32 %v3850_v8, %v4059_v10  ;;  %v1041_v13 = vadd.f32 %v1009_v50, %v941_v31 }
 0x110   : > { %5338 = vst [vmem:[#allocation16_spill] sm:$0xff] %v4061_v17  ;;  %5339 = vst [vmem:[#allocation17_spill] sm:$0xff] %v4063_v20  ;;  %v4073_v38 = vmul.f32 %v3853_v11, %v873_v39  ;;  %v1210_v46 = vmul.f32 %v3856_v14, %v4061_v17  ;;  %v805_v52 = vmul.f32 %v3322_v53, %v3831_v57 }
 0x111   : > { %906 = vst.msk [vmem:[#allocation2 + $0xc9] sm:$0xff] %vm415_vm1, %v873_v39  ;;  %v1438_v24 = vadd.f32 %v1406_v63, %v1338_v43  ;;  %904 = vst.msk [vmem:[#allocation2 + $0xb1] sm:$0xff] %vm415_vm1, %v871_v61  ;;  %v942_v35 = vmul.f32 %v3853_v11, %v871_v61  ;;  %v803_v32 = vmul.f32 %v3831_v57, %v717_v1  ;;  %v3326_v61 = vpop.f32.mrb[20].mxu0 }
 0x112   : > { %5340 = vst [vmem:[#allocation18_spill] sm:$0xff] %v4073_v38  ;;  %v806_v54 = vmul.f32 %v3323_v7, %v3831_v57  ;;  %v1141_v50 = vadd.f32 %v1109_v42, %v1041_v13  ;;  %v844_v41 = vadd.f32 %v3841_v62, %v805_v52  ;;  %v804_v39 = vmul.f32 %v3831_v57, %v720_v29  ;;  %v733_v52 = vpop.f32.mrb[21].mxu0 }
 0x113   : > { %v1498_v31 = vmul.f32 %v3881_v45, %v3898_v59  ;;  %v4086_v38 = vadd.f32 %v1507_v30, %v1438_v24  ;;  %v1042_v53 = vadd.f32 %v1010_v48, %v942_v35  ;;  %v842_v63 = vadd.f32 %v3841_v62, %v803_v32  ;;  %v4092_v13 = vld [vmem:[#allocation2 + $0xc0] sm:$0xff]  ;;  %v4103_v32 = vpop.f32.mrb[22].mxu0 }
 0x114   : > { %v845_v43 = vadd.f32 %v3841_v62, %v806_v54  ;;  %v1241_v17 = vadd.f32 %v1209_v47, %v1141_v50  ;;  %v4090_v1 = vld [vmem:[#allocation2 + $0xa8] sm:$0xff]  ;;  %v876_v7 = vmax.f32 %v844_v41, 0.0  ;;  %5343 = vst [vmem:[#allocation21_spill] sm:$0xff] %v4092_v13  ;;  %v843_v29 = vadd.f32 %v3841_v62, %v804_v39  ;;  %v4111_v3 = vpop.f32.mrb[23].mxu0 }
 0x115   : > { %5341 = vst [vmem:[#allocation19_spill] sm:$0xff] %v4086_v38  ;;  %5342 = vst [vmem:[#allocation20_spill] sm:$0xff] %v4090_v1  ;;  %v4094_v42 = vld [vmem:[#allocation2 + $0xc1] sm:$0xff]  ;;  %v1499_v30 = vmul.f32 %v3881_v45, %v3919_v18  ;;  %v1309_v48 = vmul.f32 %v3872_v36, %v4090_v1  ;;  %v1142_v24 = vadd.f32 %v1110_v44, %v1042_v53  ;;  %v874_v35 = vmax.f32 %v842_v63, 0.0 }
 0x116   : > { %5344 = vst [vmem:[#allocation22_spill] sm:$0xff] %v4094_v42  ;;  %v1013_v47 = vmul.f32 %v3847_v4, %v4092_v13  ;;  %909 = vst.msk [vmem:[#allocation2 + $0xf1] sm:$0xff] %vm415_vm1, %v876_v7  ;;  %v4107_v54 = vmul.f32 %v3853_v11, %v876_v7  ;;  %v1113_v50 = vmul.f32 %v3850_v8, %v4094_v42  ;;  %v877_v41 = vmax.f32 %v845_v43, 0.0 }
 0x117   : > { %v875_v39 = vmax.f32 %v843_v29, 0.0  ;;  %v4113_v1 = vadd.f32 %v1309_v48, %v1241_v17  ;;  %v1242_v44 = vadd.f32 %v1210_v46, %v1142_v24  ;;  %907 = vst.msk [vmem:[#allocation2 + $0xd9] sm:$0xff] %vm415_vm1, %v874_v35  ;;  %v945_v63 = vmul.f32 %v3853_v11, %v874_v35 }
 0x118   : > { %5345 = vst [vmem:[#allocation23_spill] sm:$0xff] %v4107_v54  ;;  %v1475_v53 = vld [vmem:[#allocation2 + $0xc8] sm:$0xff]  ;;  %v1530_v7 = vadd.f32 %v1498_v31, %v4022_v12  ;;  %v4122_v54 = vld [vmem:[#allocation2 + $0xb0] sm:$0xff]  ;;  %910 = vst.msk [vmem:[#allocation2 + $0xf9] sm:$0xff] %vm415_vm1, %v877_v41  ;;  %v4131_v46 = vmul.f32 %v3853_v11, %v877_v41  ;;  %v1598_v42 = vmul.f32 %v3887_v51, %v3900_v2 }
 0x119   : > { %5346 = vst [vmem:[#allocation24_spill] sm:$0xff] %v4113_v1  ;;  %v4117_v13 = vld [vmem:[#allocation2 + $0xc2] sm:$0xff]  ;;  %5349 = vst [vmem:[#allocation27_spill] sm:$0xff] %v4122_v54  ;;  %v4124_v43 = vld [vmem:[#allocation2 + $0xb2] sm:$0xff]  ;;  %v1511_v29 = vmul.f32 %v3881_v45, %v1475_v53  ;;  %v946_v48 = vmul.f32 %v3853_v11, %v875_v39  ;;  %v1310_v12 = vmul.f32 %v3872_v36, %v4122_v54  ;;  %v4156_v54 = vpop.f32.mrb[24].mxu0 }
 0x11a   : > { %5347 = vst [vmem:[#allocation25_spill] sm:$0xff] %v4117_v13  ;;  %v4119_v38 = vld [vmem:[#allocation2 + $0xc9] sm:$0xff]  ;;  %5350 = vst [vmem:[#allocation28_spill] sm:$0xff] %v4124_v43  ;;  %v1213_v17 = vmul.f32 %v3856_v14, %v4117_v13  ;;  %v1410_v31 = vmul.f32 %v3885_v49, %v4124_v43  ;;  %v1045_v35 = vadd.f32 %v1013_v47, %v945_v63  ;;  %v4145_v41 = vld [vmem:[%s5266_s4 + $0x8] ss:$0 sm:$0xff] }
 0x11b   : > { %5348 = vst [vmem:[#allocation26_spill] sm:$0xff] %v4119_v38  ;;  %5351 = vst [vmem:[#allocation29_spill] sm:$0xff] %v4131_v46  ;;  %v4135_v24 = vld [vmem:[#allocation2 + $0xca] sm:$0xff]  ;;  %v1014_v13 = vmul.f32 %v1475_v53, %v3847_v4  ;;  %v1114_v46 = vmul.f32 %v3850_v8, %v4119_v38  ;;  %v1531_v1 = vadd.f32 %v1499_v30, %v4035_v28  ;;  %v4163_v30 = vpop.f32.mrb[25].mxu0 }
 0x11c   : > { %908 = vst.msk [vmem:[#allocation2 + $0xe1] sm:$0xff] %vm415_vm1, %v875_v39  ;;  %5352 = vst [vmem:[#allocation30_spill] sm:$0xff] %v4135_v24  ;;  %v1214_v39 = vmul.f32 %v3856_v14, %v4135_v24  ;;  %v1342_v43 = vadd.f32 %v1310_v12, %v1242_v44  ;;  %v1145_v47 = vadd.f32 %v1113_v50, %v1045_v35 }
 0x11d   : > { %v1046_v63 = vadd.f32 %v1014_v13, %v946_v48  ;;  %v1599_v53 = vmul.f32 %v3887_v51, %v3921_v19  ;;  %v1630_v20 = vadd.f32 %v1598_v42, %v1530_v7  ;;  %v1698_v38 = vmul.f32 %v4145_v41, %v3917_v16  ;;  %v4168_v19 = vld [vmem:[%s5267_s5] ss:$0 sm:$0xff]  ;;  %v4170_v42 = vld [vmem:[#allocation2 + $0xf0] sm:$0xff]  ;;  %v4172_v7 = vpop.f32.mrb[26].mxu0 }
 0x11e   : > { %v1699_v24 = vmul.f32 %v4145_v41, %v3935_v26  ;;  %v809_v28 = vmul.f32 %v3326_v61, %v3831_v57  ;;  %v1442_v2 = vadd.f32 %v1410_v31, %v1342_v43  ;;  %v1245_v44 = vadd.f32 %v1213_v17, %v1145_v47  ;;  %5353 = vst [vmem:[#allocation31_spill] sm:$0xff] %v4170_v42  ;;  %v1277_v48 = vld [vmem:[#allocation2 + $0xd8] sm:$0xff]  ;;  %v4177_v61 = vld [vmem:[%s5268_s6] ss:$0 sm:$0xff]  ;;  %v4185_v31 = vpop.f32.mrb[27].mxu0 }
 0x11f   : > { %v1146_v50 = vadd.f32 %v1114_v46, %v1046_v63  ;;  %v1631_v13 = vadd.f32 %v1599_v53, %v1531_v1  ;;  %v1730_v12 = vadd.f32 %v1698_v38, %v1630_v20  ;;  %v807_v1 = vmul.f32 %v3831_v57, %v733_v52  ;;  %v4183_v46 = vld [vmem:[#allocation2 + $0xf1] sm:$0xff]  ;;  %v4211_v23 = vld [vmem:[#allocation2 + $0xf9] sm:$0xff] }
 0x120   : > { %v848_v43 = vadd.f32 %v3841_v62, %v809_v28  ;;  %v1017_v17 = vmul.f32 %v3847_v4, %v4170_v42  ;;  %5354 = vst [vmem:[#allocation32_spill] sm:$0xff] %v4183_v46  ;;  %v4187_v35 = vadd.f32 %v1511_v29, %v1442_v2  ;;  %v1313_v20 = vmul.f32 %v3872_v36, %v1277_v48  ;;  %v1479_v53 = vld [vmem:[#allocation2 + $0xf8] sm:$0xff] }
 0x121   : > { %v1246_v38 = vadd.f32 %v1214_v39, %v1146_v50  ;;  %v1731_v28 = vadd.f32 %v1699_v24, %v1631_v13  ;;  %v1515_v10 = vmul.f32 %v3881_v45, %v1479_v53  ;;  %v1769_v29 = vmul.f32 %v4168_v19, %v1730_v12  ;;  %v4200_v2 = vld [vmem:[#allocation2 + $0xf2] sm:$0xff]  ;;  %5360 = vst [vmem:[#allocation38_spill] sm:$0xff] %v4211_v23 }
 0x122   : > { %5355 = vst [vmem:[#allocation33_spill] sm:$0xff] %v4187_v35  ;;  %5358 = vst [vmem:[#allocation36_spill] sm:$0xff] %v4200_v2  ;;  %v4202_v48 = vadd.f32 %v1313_v20, %v1245_v44  ;;  %v880_v50 = vmax.f32 %v848_v43, 0.0  ;;  %v846_v35 = vadd.f32 %v3841_v62, %v807_v1  ;;  %v810_v1 = vmul.f32 %v4103_v32, %v3831_v57  ;;  %v4220_v20 = vld [vmem:[#allocation2 + $0xfa] sm:$0xff] }
 0x123   : > { %v4190_v47 = vld [vmem:[#allocation2 + $0xe0] sm:$0xff]  ;;  %v1770_v39 = vmul.f32 %v4168_v19, %v1731_v28  ;;  %v1808_v13 = vadd.f32 %v4177_v61, %v1769_v29  ;;  %v808_v29 = vmul.f32 %v3831_v57, %v4111_v3 }
 0x124   : > { %5356 = vst [vmem:[#allocation34_spill] sm:$0xff] %v4190_v47  ;;  %v4192_v63 = vld [vmem:[#allocation2 + $0xe2] sm:$0xff]  ;;  %v1314_v52 = vmul.f32 %v3872_v36, %v4190_v47  ;;  %5359 = vst [vmem:[#allocation37_spill] sm:$0xff] %v4202_v48  ;;  %v1117_v47 = vmul.f32 %v3850_v8, %v4183_v46  ;;  %v4216_v44 = vmul.f32 %v3853_v11, %v880_v50  ;;  %v878_v43 = vmax.f32 %v846_v35, 0.0 }
 0x125   : > { %5357 = vst [vmem:[#allocation35_spill] sm:$0xff] %v4192_v63  ;;  %v1414_v42 = vmul.f32 %v3885_v49, %v4192_v63  ;;  %v1217_v63 = vmul.f32 %v3856_v14, %v4200_v2  ;;  %v1809_v12 = vadd.f32 %v4177_v61, %v1770_v39  ;;  %913 = vst.msk [vmem:[#allocation2 + $0x121] sm:$0xff] %vm415_vm1, %v880_v50 }
 0x126   : > { %v1346_v24 = vadd.f32 %v1314_v52, %v1246_v38  ;;  %5361 = vst [vmem:[#allocation39_spill] sm:$0xff] %v4216_v44  ;;  %v4222_v38 = vpop.f32.mrb[28].mxu0  ;;  %v1840_v52 = vmax.f32 %v1808_v13, 0.0  ;;  %v1018_v39 = vmul.f32 %v1479_v53, %v3847_v4  ;;  %911 = vst.msk [vmem:[#allocation2 + $0x109] sm:$0xff] %vm415_vm1, %v878_v43  ;;  %v949_v35 = vmul.f32 %v3853_v11, %v878_v43  ;;  %v1063_v44 = vld [vmem:[#allocation2 + $0x19] sm:$0xff] }
 0x127   : > { %5362 = vst [vmem:[#allocation40_spill] sm:$0xff] %v4222_v38  ;;  %v4227_v2 = vpop.f32.mrb[29].mxu0  ;;  %v1841_v48 = vmax.f32 %v1809_v12, 0.0  ;;  %v849_v32 = vadd.f32 %v3841_v62, %v810_v1  ;;  %v1118_v50 = vmul.f32 %v3850_v8, %v4211_v23  ;;  %v847_v3 = vadd.f32 %v3841_v62, %v808_v29 }
 0x128   : > { %v1446_v28 = vadd.f32 %v1414_v42, %v1346_v24  ;;  %5363 = vst [vmem:[#allocation41_spill] sm:$0xff] %v4227_v2  ;;  %v1064_v42 = vld [vmem:[#allocation2 + $0x21] sm:$0xff]  ;;  %v4234_v24 = vpop.f32.mrb[30].mxu0  ;;  %v1218_v53 = vmul.f32 %v3856_v14, %v4220_v20  ;;  %v999_v12 = vmul.f32 %v3903_v5, %v3847_v4  ;;  %v1049_v46 = vadd.f32 %v1017_v17, %v949_v35 }
 0x129   : > { %v4243_v43 = vpop.f32.mrb[31].mxu0  ;;  %v1872_v1 = vpack.c.bf16 %v1841_v48, %v1840_v52  ;;  %v881_v2 = vmax.f32 %v849_v32, 0.0  ;;  %v1000_v23 = vmul.f32 %v3923_v21, %v3847_v4  ;;  %v879_v38 = vmax.f32 %v847_v3, 0.0 }
 0x12a   : > { %v4236_v13 = vadd.f32 %v1515_v10, %v1446_v28  ;;  %v1031_v10 = vadd.f32 %v999_v12, %v3892_v56  ;;  %v1099_v28 = vmul.f32 %v3850_v8, %v1063_v44  ;;  %v1100_v29 = vmul.f32 %v3850_v8, %v1064_v42 }
 0x12b   : > { %3344 = vmatprep.mubr.msk.bf16.mxu1 %vm415_vm1, %v1872_v1  ;;  %914 = vst.msk [vmem:[#allocation2 + $0x129] sm:$0xff] %vm415_vm1, %v881_v2  ;;  %v4253_v5 = vmul.f32 %v3853_v11, %v881_v2  ;;  %v1032_v17 = vadd.f32 %v1000_v23, %v3895_v58  ;;  %v1199_v21 = vmul.f32 %v3943_v33, %v3856_v14  ;;  %912 = vst.msk [vmem:[#allocation2 + $0x111] sm:$0xff] %vm415_vm1, %v879_v38  ;;  %v4270_v33 = vld [vmem:[#allocation2 + $0x51] sm:$0xff] }
 0x12c   : > { %5364 = vst [vmem:[#allocation42_spill] sm:$0xff] %v4236_v13  ;;  %v1149_v13 = vadd.f32 %v1117_v47, %v1049_v46  ;;  %v950_v56 = vmul.f32 %v3853_v11, %v879_v38  ;;  %v1131_v48 = vadd.f32 %v1099_v28, %v1031_v10  ;;  %v1200_v44 = vmul.f32 %v3950_v40, %v3856_v14  ;;  %v4264_v47 = vld [vmem:[#allocation2 + $0x49] sm:$0xff] }
 0x12d   : > { %5365 = vst [vmem:[#allocation43_spill] sm:$0xff] %v4253_v5  ;;  %v1299_v46 = vmul.f32 %v3872_v36, %v3898_v59  ;;  %v1132_v52 = vadd.f32 %v1100_v29, %v1032_v17  ;;  %v1300_v58 = vmul.f32 %v3872_v36, %v3919_v18  ;;  %v1399_v23 = vmul.f32 %v3885_v49, %v3917_v16  ;;  %v4272_v38 = vld [vmem:[#allocation2 + $0x4a] sm:$0xff] }
 0x12e   : > { %v1249_v2 = vadd.f32 %v1217_v63, %v1149_v13  ;;  %v4274_v35 = vld [vmem:[#allocation2 + $0x108] sm:$0xff]  ;;  %v1050_v40 = vadd.f32 %v1018_v39, %v950_v56  ;;  %v1231_v32 = vadd.f32 %v1199_v21, %v1131_v48  ;;  %v1400_v59 = vmul.f32 %v3885_v49, %v3935_v26 }
 0x12f   : > { %v1500_v63 = vmul.f32 %v3881_v45, %v3967_v0  ;;  %v1317_v18 = vmul.f32 %v3872_v36, %v4274_v35  ;;  %v1232_v42 = vadd.f32 %v1200_v44, %v1132_v52  ;;  %v1501_v16 = vmul.f32 %v3881_v45, %v3981_v25 }
 0x130   : > { %v1600_v13 = vmul.f32 %v3887_v51, %v4264_v47  ;;  %v1150_v3 = vadd.f32 %v1118_v50, %v1050_v40  ;;  %v1331_v12 = vadd.f32 %v1299_v46, %v1231_v32  ;;  %v1601_v39 = vmul.f32 %v3887_v51, %v4270_v33 }
 0x131   : > { %v1700_v26 = vmul.f32 %v4145_v41, %v4272_v38  ;;  %v4290_v1 = vadd.f32 %v1317_v18, %v1249_v2  ;;  %v1332_v10 = vadd.f32 %v1300_v58, %v1232_v42  ;;  %v1701_v28 = vmul.f32 %v4145_v41, %v3983_v27  ;;  %v4314_v18 = vld [vmem:[#allocation2 + $0x120] sm:$0xff] }
 0x132   : > { %v1401_v29 = vmul.f32 %v4272_v38, %v3885_v49  ;;  %v1250_v17 = vadd.f32 %v1218_v53, %v1150_v3  ;;  %v1483_v21 = vld [vmem:[#allocation2 + $0x128] sm:$0xff]  ;;  %v1431_v56 = vadd.f32 %v1399_v23, %v1331_v12  ;;  %v1502_v50 = vmul.f32 %v3881_v45, %v3960_v55  ;;  %v4300_v44 = vld [vmem:[#allocation2 + $0x110] sm:$0xff] }
 0x133   : > { %5366 = vst [vmem:[#allocation44_spill] sm:$0xff] %v4290_v1  ;;  %v1602_v48 = vmul.f32 %v3887_v51, %v3962_v60  ;;  %v4302_v46 = vld [vmem:[#allocation2 + $0x112] sm:$0xff]  ;;  %v1519_v2 = vmul.f32 %v3881_v45, %v1483_v21  ;;  %v1432_v52 = vadd.f32 %v1400_v59, %v1332_v10  ;;  %v1603_v53 = vmul.f32 %v3887_v51, %v3979_v22 }
 0x134   : > { %v1433_v58 = vadd.f32 %v1401_v29, %v3997_v37  ;;  %v1318_v23 = vmul.f32 %v3872_v36, %v4300_v44  ;;  %v1418_v40 = vmul.f32 %v3885_v49, %v4302_v46  ;;  %v1532_v32 = vadd.f32 %v1500_v63, %v1431_v56  ;;  %v4323_v29 = vld [vmem:[#allocation2 + $0x121] sm:$0xff] }
 0x135   : > { %v1702_v60 = vmul.f32 %v4145_v41, %v3977_v15  ;;  %v1533_v42 = vadd.f32 %v1501_v16, %v1432_v52  ;;  %v1635_v59 = vadd.f32 %v1603_v53, %v4026_v9  ;;  %v1703_v37 = vmul.f32 %v4145_v41, %v3995_v34 }
 0x136   : > { %v1534_v3 = vadd.f32 %v1502_v50, %v1433_v58  ;;  %v1350_v22 = vadd.f32 %v1318_v23, %v1250_v17  ;;  %v1632_v12 = vadd.f32 %v1600_v13, %v1532_v32  ;;  %v813_v10 = vmul.f32 %v4156_v54, %v3831_v57  ;;  %v4329_v17 = vld [vmem:[#allocation2 + $0x122] sm:$0xff] }
 0x137   : > { %v811_v63 = vmul.f32 %v3831_v57, %v4163_v30  ;;  %v1633_v56 = vadd.f32 %v1601_v39, %v1533_v42  ;;  %v1735_v1 = vadd.f32 %v1703_v37, %v1635_v59  ;;  %v1021_v16 = vmul.f32 %v3847_v4, %v4314_v18 }
 0x138   : > { %v1634_v5 = vadd.f32 %v1602_v48, %v1534_v3  ;;  %v1450_v9 = vadd.f32 %v1418_v40, %v1350_v22  ;;  %v1732_v50 = vadd.f32 %v1700_v26, %v1632_v12  ;;  %v852_v52 = vadd.f32 %v3841_v62, %v813_v10  ;;  %v4351_v3 = vld [vmem:[#allocation2 + $0x129] sm:$0xff] }
 0x139   : > { %v850_v13 = vadd.f32 %v3841_v62, %v811_v63  ;;  %v1733_v54 = vadd.f32 %v1701_v28, %v1633_v56  ;;  %v1774_v30 = vmul.f32 %v4168_v19, %v1735_v1  ;;  %v1121_v39 = vmul.f32 %v3850_v8, %v4323_v29  ;;  %v4357_v10 = vld [vmem:[#allocation2 + $0x12a] sm:$0xff] }
 0x13a   : > { %v1734_v58 = vadd.f32 %v1702_v60, %v1634_v5  ;;  %v4334_v48 = vadd.f32 %v1519_v2, %v1450_v9  ;;  %v1771_v53 = vmul.f32 %v4168_v19, %v1732_v50  ;;  %v884_v23 = vmax.f32 %v852_v52, 0.0 }
 0x13b   : > { %v882_v40 = vmax.f32 %v850_v13, 0.0  ;;  %v1772_v26 = vmul.f32 %v4168_v19, %v1733_v54  ;;  %v1813_v42 = vadd.f32 %v4177_v61, %v1774_v30  ;;  %v1221_v5 = vmul.f32 %v3856_v14, %v4329_v17 }
 0x13c   : > { %v1773_v32 = vmul.f32 %v4168_v19, %v1734_v58  ;;  %v1810_v1 = vadd.f32 %v4177_v61, %v1771_v53  ;;  %917 = vst.msk [vmem:[#allocation2 + $0x151] sm:$0xff] %vm415_vm1, %v884_v23  ;;  %v4345_v28 = vmul.f32 %v3853_v11, %v884_v23  ;;  %v814_v60 = vmul.f32 %v4172_v7, %v3831_v57 }
 0x13d   : > { %915 = vst.msk [vmem:[#allocation2 + $0x139] sm:$0xff] %vm415_vm1, %v882_v40  ;;  %v953_v2 = vmul.f32 %v3853_v11, %v882_v40  ;;  %v1811_v59 = vadd.f32 %v4177_v61, %v1772_v26  ;;  %v1845_v22 = vmax.f32 %v1813_v42, 0.0  ;;  %v812_v12 = vmul.f32 %v3831_v57, %v4185_v31 }
 0x13e   : > { %5367 = vst [vmem:[#allocation45_spill] sm:$0xff] %v4345_v28  ;;  %v1812_v37 = vadd.f32 %v4177_v61, %v1773_v32  ;;  %v1842_v63 = vmax.f32 %v1810_v1, 0.0  ;;  %v853_v9 = vadd.f32 %v3841_v62, %v814_v60  ;;  %v1022_v50 = vmul.f32 %v1483_v21, %v3847_v4 }
 0x13f   : > { %v1053_v56 = vadd.f32 %v1021_v16, %v953_v2  ;;  %v1843_v52 = vmax.f32 %v1811_v59, 0.0  ;;  %v851_v13 = vadd.f32 %v3841_v62, %v812_v12  ;;  %v1122_v54 = vmul.f32 %v3850_v8, %v4351_v3  ;;  %v4394_v59 = vld [vmem:[#allocation2 + $0x79] sm:$0xff] }
 0x140   : > { %v1844_v7 = vmax.f32 %v1812_v37, 0.0  ;;  %v885_v30 = vmax.f32 %v853_v9, 0.0  ;;  %v1222_v57 = vmul.f32 %v3856_v14, %v4357_v10  ;;  %v1003_v31 = vmul.f32 %v3967_v0, %v3847_v4 }
 0x141   : > { %v1153_v58 = vadd.f32 %v1121_v39, %v1053_v56  ;;  %v1873_v16 = vpack.c.bf16 %v1843_v52, %v1842_v63  ;;  %v883_v23 = vmax.f32 %v851_v13, 0.0  ;;  %v1004_v21 = vmul.f32 %v3981_v25, %v3847_v4  ;;  %v5370_v25 = vld [vmem:[#allocation4_spill] sm:$0xff] }
 0x142   : > { %v1874_v53 = vpack.c.bf16 %v1845_v22, %v1844_v7  ;;  %918 = vst.msk [vmem:[#allocation2 + $0x159] sm:$0xff] %vm415_vm1, %v885_v30  ;;  %v4372_v62 = vmul.f32 %v3853_v11, %v885_v30  ;;  %v1035_v39 = vadd.f32 %v1003_v31, %v3907_v6  ;;  %v1103_v26 = vmul.f32 %v4264_v47, %v3850_v8  ;;  %v4400_v63 = vld [vmem:[#allocation2 + $0x81] sm:$0xff] }
 0x143   : > { %v1253_v40 = vadd.f32 %v1221_v5, %v1153_v58  ;;  %3345 = vmatmul.mubr.msk.bf16.vlgmr.msra.gmra.mrb[0].mxu1 %vm415_vm1, %v1873_v16  ;;  %916 = vst.msk [vmem:[#allocation2 + $0x141] sm:$0xff] %vm415_vm1, %v883_v23  ;;  %v954_v32 = vmul.f32 %v3853_v11, %v883_v23  ;;  %v1036_v42 = vadd.f32 %v1004_v21, %v5370_v25  ;;  %v4402_v56 = vld [vmem:[#allocation2 + $0x7a] sm:$0xff] }
 0x144   : > { %5368 = vst [vmem:[#allocation46_spill] sm:$0xff] %v4372_v62  ;;  %v4378_v0 = vld [vmem:[#allocation2 + $0x138] sm:$0xff]  ;;  %v1104_v5 = vmul.f32 %v4270_v33, %v3850_v8  ;;  %v1203_v1 = vmul.f32 %v4272_v38, %v3856_v14  ;;  %3348 = vmatprep.mubr.msk.bf16.mxu1 %vm415_vm1, %v1874_v53  ;;  %v1135_v47 = vadd.f32 %v1103_v26, %v1035_v39  ;;  %v5371_v33 = vld [vmem:[#allocation5_spill] sm:$0xff]  ;;  %v5373_v52 = vld [vmem:[#allocation8_spill] sm:$0xff] }
 0x145   : > { %5369 = vst [vmem:[#allocation47_spill] sm:$0xff] %v4378_v0  ;;  %v1321_v6 = vmul.f32 %v3872_v36, %v4378_v0  ;;  %v1204_v2 = vmul.f32 %v3983_v27, %v3856_v14  ;;  %v1303_v60 = vmul.f32 %v3872_v36, %v3960_v55  ;;  %v1054_v37 = vadd.f32 %v1022_v50, %v954_v32  ;;  %v5374_v58 = vld [vmem:[#allocation11_spill] sm:$0xff]  ;;  %v5375_v23 = vld [vmem:[#allocation12_spill] sm:$0xff]  ;;  %v5377_v26 = vld [vmem:[#allocation9_spill] sm:$0xff] }
 0x146   : > { %v1136_v22 = vadd.f32 %v1104_v5, %v1036_v42  ;;  %v1304_v12 = vmul.f32 %v5371_v33, %v3872_v36  ;;  %v1403_v38 = vmul.f32 %v3885_v49, %v3977_v15  ;;  %v1235_v27 = vadd.f32 %v1203_v1, %v1135_v47  ;;  %v5381_v47 = vld [vmem:[#allocation15_spill] sm:$0xff]  ;;  %v5382_v33 = vld [vmem:[#allocation17_spill] sm:$0xff] }
 0x147   : > { %v4404_v9 = vadd.f32 %v1321_v6, %v1253_v40  ;;  %v1404_v55 = vmul.f32 %v3885_v49, %v3995_v34  ;;  %v1504_v50 = vmul.f32 %v3881_v45, %v5373_v52  ;;  %v1154_v7 = vadd.f32 %v1122_v54, %v1054_v37  ;;  %v5380_v6 = vld [vmem:[#allocation10_spill] sm:$0xff] }
 0x148   : > { %v1236_v13 = vadd.f32 %v1204_v2, %v1136_v22  ;;  %v1505_v30 = vmul.f32 %v3881_v45, %v5374_v58  ;;  %v1604_v15 = vmul.f32 %v3887_v51, %v4394_v59  ;;  %v1335_v31 = vadd.f32 %v1303_v60, %v1235_v27  ;;  %v4441_v27 = vld [vmem:[#allocation2 + $0x150] sm:$0xff] }
 0x149   : > { %5372 = vst [vmem:[#allocation4_spill] sm:$0xff] %v4404_v9  ;;  %v1605_v16 = vmul.f32 %v3887_v51, %v4400_v63  ;;  %v1704_v53 = vmul.f32 %v4145_v41, %v4402_v56  ;;  %v1705_v34 = vmul.f32 %v4145_v41, %v5375_v23  ;;  %v1254_v21 = vadd.f32 %v1222_v57, %v1154_v7  ;;  %v4420_v40 = vld [vmem:[#allocation2 + $0x158] sm:$0xff] }
 0x14a   : > { %5376 = vst [vmem:[#allocation5_spill] sm:$0xff] %v4420_v40  ;;  %v1336_v54 = vadd.f32 %v1304_v12, %v1236_v13  ;;  %v1405_v39 = vmul.f32 %v4402_v56, %v3885_v49  ;;  %v1506_v32 = vmul.f32 %v3881_v45, %v5377_v26  ;;  %v4426_v25 = vld [vmem:[#allocation2 + $0x140] sm:$0xff]  ;;  %v1523_v5 = vmul.f32 %v3881_v45, %v4420_v40  ;;  %v5383_v7 = vld [vmem:[#allocation19_spill] sm:$0xff]  ;;  %v5384_v13 = vld [vmem:[#allocation14_spill] sm:$0xff] }
 0x14b   : > { %5378 = vst [vmem:[#allocation8_spill] sm:$0xff] %v4426_v25  ;;  %v4428_v42 = vld [vmem:[#allocation2 + $0x142] sm:$0xff]  ;;  %v1435_v1 = vadd.f32 %v1403_v38, %v1335_v31  ;;  %v1606_v57 = vmul.f32 %v3887_v51, %v5380_v6  ;;  %v1607_v2 = vmul.f32 %v3887_v51, %v5381_v47  ;;  %v1322_v60 = vmul.f32 %v3872_v36, %v4426_v25 }
 0x14c   : > { %5379 = vst [vmem:[#allocation11_spill] sm:$0xff] %v4428_v42  ;;  %v1422_v37 = vmul.f32 %v3885_v49, %v4428_v42  ;;  %v1436_v22 = vadd.f32 %v1404_v55, %v1336_v54  ;;  %v1437_v12 = vadd.f32 %v1405_v39, %v5382_v33  ;;  %v1706_v31 = vmul.f32 %v4145_v41, %v5384_v13  ;;  %v5385_v6 = vld [vmem:[#allocation16_spill] sm:$0xff]  ;;  %v4452_v33 = vld [vmem:[#allocation2 + $0x151] sm:$0xff] }
 0x14d   : > { %v1536_v52 = vadd.f32 %v1504_v50, %v1435_v1  ;;  %v1639_v38 = vadd.f32 %v1607_v2, %v5383_v7  ;;  %v1707_v47 = vmul.f32 %v4145_v41, %v5385_v6  ;;  %v1354_v62 = vadd.f32 %v1322_v60, %v1254_v21  ;;  %v3544_v55 = vld [vmem:[%s5264_s2] ss:$0 sm:$0xff]  ;;  %v5387_v2 = vld [vmem:[#allocation41_spill] sm:$0xff]  ;;  %v4460_v60 = vld [vmem:[#allocation2 + $0x152] sm:$0xff] }
 0x14e   : > { %v1537_v28 = vadd.f32 %v1505_v30, %v1436_v22  ;;  %v1538_v9 = vadd.f32 %v1506_v32, %v1437_v12  ;;  %v5386_v54 = vld [vmem:[#allocation40_spill] sm:$0xff]  ;;  %v815_v7 = vmul.f32 %v3544_v55, %v5387_v2  ;;  %v1025_v42 = vmul.f32 %v3847_v4, %v4441_v27  ;;  %5388 = vst [vmem:[#allocation12_spill] sm:$0xff] %v4460_v60 }
 0x14f   : > { %v817_v39 = vmul.f32 %v3544_v55, %v5386_v54  ;;  %v1636_v50 = vadd.f32 %v1604_v15, %v1536_v52  ;;  %v1739_v1 = vadd.f32 %v1707_v47, %v1639_v38  ;;  %v1454_v25 = vadd.f32 %v1422_v37, %v1354_v62  ;;  %v3545_v30 = vld [vmem:[%s5265_s3] ss:$0 sm:$0xff] }
 0x150   : > { %v1637_v0 = vadd.f32 %v1605_v16, %v1537_v28  ;;  %v1638_v21 = vadd.f32 %v1606_v57, %v1538_v9  ;;  %v854_v15 = vadd.f32 %v3545_v30, %v815_v7  ;;  %v1125_v52 = vmul.f32 %v3850_v8, %v4452_v33 }
 0x151   : > { %v856_v32 = vadd.f32 %v3545_v30, %v817_v39  ;;  %v1736_v22 = vadd.f32 %v1704_v53, %v1636_v50  ;;  %v1778_v12 = vmul.f32 %v4168_v19, %v1739_v1  ;;  %v4465_v38 = vadd.f32 %v1523_v5, %v1454_v25  ;;  %v4484_v1 = vld [vmem:[#allocation2 + $0x15a] sm:$0xff] }
 0x152   : > { %v1737_v47 = vadd.f32 %v1705_v34, %v1637_v0  ;;  %v1738_v62 = vadd.f32 %v1706_v31, %v1638_v21  ;;  %v886_v57 = vmax.f32 %v854_v15, 0.0  ;;  %v1225_v37 = vmul.f32 %v3856_v14, %v4460_v60  ;;  %v4478_v34 = vld [vmem:[#allocation2 + $0x159] sm:$0xff]  ;;  %5391 = vst [vmem:[#allocation15_spill] sm:$0xff] %v4484_v1  ;;  %v5411_v60 = vld [vmem:[#allocation18_spill] sm:$0xff] }
 0x153   : > { %5389 = vst [vmem:[#allocation9_spill] sm:$0xff] %v4465_v38  ;;  %v888_v28 = vmax.f32 %v856_v32, 0.0  ;;  %v1775_v9 = vmul.f32 %v4168_v19, %v1736_v22  ;;  %v1817_v16 = vadd.f32 %v4177_v61, %v1778_v12  ;;  %v818_v0 = vmul.f32 %v3544_v55, %v4234_v24  ;;  %v971_v32 = vld [vmem:[#allocation2 + $0x78] sm:$0xff] }
 0x154   : > { %v1776_v53 = vmul.f32 %v4168_v19, %v1737_v47  ;;  %v1777_v54 = vmul.f32 %v4168_v19, %v1738_v62  ;;  %919 = vst.msk [vmem:[#allocation2 + $0x169] sm:$0xff] %vm415_vm1, %v886_v57  ;;  %v957_v39 = vmul.f32 %v3853_v11, %v886_v57  ;;  %v816_v50 = vmul.f32 %v3544_v55, %v4243_v43 }
 0x155   : > { %921 = vst.msk [vmem:[#allocation2 + $0x181] sm:$0xff] %vm415_vm1, %v888_v28  ;;  %v4475_v25 = vmul.f32 %v3853_v11, %v888_v28  ;;  %v1814_v5 = vadd.f32 %v4177_v61, %v1775_v9  ;;  %v1849_v31 = vmax.f32 %v1817_v16, 0.0  ;;  %v857_v21 = vadd.f32 %v3545_v30, %v818_v0 }
 0x156   : > { %v1815_v2 = vadd.f32 %v4177_v61, %v1776_v53  ;;  %v1816_v7 = vadd.f32 %v4177_v61, %v1777_v54  ;;  %v1026_v24 = vmul.f32 %v4420_v40, %v3847_v4  ;;  %v1057_v12 = vadd.f32 %v1025_v42, %v957_v39  ;;  %v5410_v40 = vld [vmem:[#allocation13_spill] sm:$0xff] }
 0x157   : > { %5390 = vst [vmem:[#allocation10_spill] sm:$0xff] %v4475_v25  ;;  %v1846_v22 = vmax.f32 %v1814_v5, 0.0  ;;  %v855_v15 = vadd.f32 %v3545_v30, %v816_v50  ;;  %v1126_v47 = vmul.f32 %v3850_v8, %v4478_v34  ;;  %v889_v43 = vmax.f32 %v857_v21, 0.0  ;;  %v1272_v5 = vld [vmem:[#allocation2 + $0x98] sm:$0xff]  ;;  %v5393_v50 = vld [vmem:[#allocation6_spill] sm:$0xff] }
 0x158   : > { %v1847_v62 = vmax.f32 %v1815_v2, 0.0  ;;  %v1848_v28 = vmax.f32 %v1816_v7, 0.0  ;;  %v1226_v55 = vmul.f32 %v3856_v14, %v4484_v1  ;;  %v1157_v9 = vadd.f32 %v1125_v52, %v1057_v12  ;;  %v5394_v7 = vld [vmem:[#allocation7_spill] sm:$0xff] }
 0x159   : > { %v887_v16 = vmax.f32 %v855_v15, 0.0  ;;  %v1007_v57 = vmul.f32 %v3847_v4, %v971_v32  ;;  %v1008_v53 = vmul.f32 %v5374_v58, %v3847_v4  ;;  %922 = vst.msk [vmem:[#allocation2 + $0x189] sm:$0xff] %vm415_vm1, %v889_v43  ;;  %v4499_v42 = vmul.f32 %v3853_v11, %v889_v43 }
 0x15a   : > { %v1875_v54 = vpack.c.bf16 %v1847_v62, %v1846_v22  ;;  %v1876_v0 = vpack.c.bf16 %v1849_v31, %v1848_v28  ;;  %v1107_v30 = vmul.f32 %v4394_v59, %v3850_v8  ;;  %v1257_v39 = vadd.f32 %v1225_v37, %v1157_v9  ;;  %v1572_v62 = vld [vmem:[#allocation2 + $0xa9] sm:$0xff] }
 0x15b   : > { %5392 = vst [vmem:[#allocation17_spill] sm:$0xff] %v4499_v42  ;;  %920 = vst.msk [vmem:[#allocation2 + $0x171] sm:$0xff] %vm415_vm1, %v887_v16  ;;  %v958_v52 = vmul.f32 %v3853_v11, %v887_v16  ;;  %v1039_v2 = vadd.f32 %v1007_v57, %v5393_v50  ;;  %v1040_v58 = vadd.f32 %v1008_v53, %v5394_v7  ;;  %v4508_v31 = vld [vmem:[#allocation2 + $0x168] sm:$0xff]  ;;  %v5398_v53 = vld [vmem:[#allocation27_spill] sm:$0xff] }
 0x15c   : > { %3349 = vmatmul.mubr.msk.bf16.gmra.mrb[4].mxu1 %vm415_vm1, %v1875_v54  ;;  %5395 = vst [vmem:[#allocation19_spill] sm:$0xff] %v4508_v31  ;;  %v1108_v21 = vmul.f32 %v4400_v63, %v3850_v8  ;;  %v1207_v59 = vmul.f32 %v4402_v56, %v3856_v14  ;;  %v1208_v37 = vmul.f32 %v5375_v23, %v3856_v14  ;;  %v1573_v63 = vld [vmem:[#allocation2 + $0xb1] sm:$0xff] }
 0x15d   : > { %v1307_v11 = vmul.f32 %v3872_v36, %v5377_v26  ;;  %3352 = vmatprep.mubr.msk.bf16.mxu1 %vm415_vm1, %v1876_v0  ;;  %v1325_v32 = vmul.f32 %v3872_v36, %v4508_v31  ;;  %v1058_v22 = vadd.f32 %v1026_v24, %v958_v52  ;;  %v1139_v12 = vadd.f32 %v1107_v30, %v1039_v2  ;;  %v1672_v28 = vld [vmem:[#allocation2 + $0xaa] sm:$0xff]  ;;  %v5396_v26 = vld [vmem:[#allocation20_spill] sm:$0xff] }
 0x15e   : > { %v1308_v15 = vmul.f32 %v3872_v36, %v1272_v5  ;;  %v1140_v43 = vadd.f32 %v1108_v21, %v1040_v58  ;;  %v1407_v56 = vmul.f32 %v3885_v49, %v5384_v13  ;;  %v1408_v23 = vmul.f32 %v3885_v49, %v5385_v6  ;;  %v5400_v2 = vld [vmem:[#allocation28_spill] sm:$0xff]  ;;  %v5408_v42 = vld [vmem:[#allocation30_spill] sm:$0xff] }
 0x15f   : > { %v1508_v9 = vmul.f32 %v3881_v45, %v5396_v26  ;;  %v4528_v16 = vadd.f32 %v1325_v32, %v1257_v39  ;;  %v1158_v57 = vadd.f32 %v1126_v47, %v1058_v22  ;;  %v1239_v24 = vadd.f32 %v1207_v59, %v1139_v12 }
 0x160   : > { %v1509_v54 = vmul.f32 %v3881_v45, %v5398_v53  ;;  %v1240_v0 = vadd.f32 %v1208_v37, %v1140_v43  ;;  %v1608_v30 = vmul.f32 %v3887_v51, %v1572_v62  ;;  %v1609_v5 = vmul.f32 %v3887_v51, %v1573_v63  ;;  %v4535_v50 = vld [vmem:[#allocation2 + $0x188] sm:$0xff]  ;;  %v976_v53 = vld [vmem:[#allocation2 + $0xb0] sm:$0xff] }
 0x161   : > { %5397 = vst [vmem:[#allocation14_spill] sm:$0xff] %v4528_v16  ;;  %v1708_v13 = vmul.f32 %v4145_v41, %v1672_v28  ;;  %v1258_v52 = vadd.f32 %v1226_v55, %v1158_v57  ;;  %5399 = vst [vmem:[#allocation16_spill] sm:$0xff] %v4535_v50  ;;  %v1339_v6 = vadd.f32 %v1307_v11, %v1239_v24  ;;  %v5403_v37 = vld [vmem:[#allocation21_spill] sm:$0xff]  ;;  %v5404_v55 = vld [vmem:[#allocation22_spill] sm:$0xff] }
 0x162   : > { %v1709_v39 = vmul.f32 %v4145_v41, %v5400_v2  ;;  %v1409_v47 = vmul.f32 %v1672_v28, %v3885_v49  ;;  %v4540_v7 = vld [vmem:[#allocation2 + $0x170] sm:$0xff]  ;;  %v1527_v21 = vmul.f32 %v3881_v45, %v4535_v50  ;;  %v1340_v59 = vadd.f32 %v1308_v15, %v1240_v0  ;;  %v975_v11 = vld [vmem:[#allocation2 + $0xa8] sm:$0xff]  ;;  %v5405_v57 = vld [vmem:[#allocation24_spill] sm:$0xff] }
 0x163   : > { %5401 = vst [vmem:[#allocation40_spill] sm:$0xff] %v4540_v7  ;;  %v4542_v58 = vld [vmem:[#allocation2 + $0x172] sm:$0xff]  ;;  %v1510_v32 = vmul.f32 %v3881_v45, %v5403_v37  ;;  %v1610_v22 = vmul.f32 %v3887_v51, %v5404_v55  ;;  %v1326_v12 = vmul.f32 %v3872_v36, %v4540_v7  ;;  %v1439_v26 = vadd.f32 %v1407_v56, %v1339_v6  ;;  %v5407_v0 = vld [vmem:[#allocation25_spill] sm:$0xff] }
 0x164   : > { %5402 = vst [vmem:[#allocation41_spill] sm:$0xff] %v4542_v58  ;;  %v1426_v43 = vmul.f32 %v3885_v49, %v4542_v58  ;;  %v1441_v24 = vadd.f32 %v1409_v47, %v5405_v57  ;;  %v1440_v2 = vadd.f32 %v1408_v23, %v1340_v59  ;;  %v5406_v50 = vld [vmem:[#allocation26_spill] sm:$0xff]  ;;  %v1710_v37 = vmul.f32 %v4145_v41, %v5407_v0  ;;  %v5409_v56 = vld [vmem:[#allocation33_spill] sm:$0xff] }
 0x165   : > { %v1611_v15 = vmul.f32 %v3887_v51, %v5406_v50  ;;  %v1711_v55 = vmul.f32 %v4145_v41, %v5408_v42  ;;  %v1358_v25 = vadd.f32 %v1326_v12, %v1258_v52  ;;  %v1540_v16 = vadd.f32 %v1508_v9, %v1439_v26 }
 0x166   : > { %v1542_v7 = vadd.f32 %v1510_v32, %v1441_v24  ;;  %v1011_v31 = vmul.f32 %v3847_v4, %v975_v11  ;;  %v1541_v58 = vadd.f32 %v1509_v54, %v1440_v2  ;;  %v1012_v47 = vmul.f32 %v3847_v4, %v976_v53  ;;  %v1176_v32 = vld [vmem:[#allocation2 + $0xb2] sm:$0xff]  ;;  %v1275_v11 = vld [vmem:[#allocation2 + $0xc0] sm:$0xff]  ;;  %v1276_v53 = vld [vmem:[#allocation2 + $0xc8] sm:$0xff] }
 0x167   : > { %v1643_v6 = vadd.f32 %v1611_v15, %v5409_v56  ;;  %v1111_v23 = vmul.f32 %v1572_v62, %v3850_v8  ;;  %v1458_v59 = vadd.f32 %v1426_v43, %v1358_v25  ;;  %v1640_v50 = vadd.f32 %v1608_v30, %v1540_v16  ;;  %v1576_v43 = vld [vmem:[#allocation2 + $0xd9] sm:$0xff]  ;;  %v1577_v56 = vld [vmem:[#allocation2 + $0xe1] sm:$0xff] }
 0x168   : > { %v1642_v57 = vadd.f32 %v1610_v22, %v1542_v7  ;;  %v1043_v0 = vadd.f32 %v1011_v31, %v5410_v40  ;;  %v1641_v38 = vadd.f32 %v1609_v5, %v1541_v58  ;;  %v1044_v52 = vadd.f32 %v1012_v47, %v5411_v60  ;;  %v1375_v31 = vld [vmem:[#allocation2 + $0xc2] sm:$0xff] }
 0x169   : > { %v1743_v1 = vadd.f32 %v1711_v55, %v1643_v6  ;;  %v1112_v9 = vmul.f32 %v1573_v63, %v3850_v8  ;;  %v4568_v54 = vadd.f32 %v1527_v21, %v1458_v59  ;;  %v1740_v12 = vadd.f32 %v1708_v13, %v1640_v50  ;;  %v1676_v6 = vld [vmem:[#allocation2 + $0xda] sm:$0xff] }
 0x16a   : > { %v1742_v26 = vadd.f32 %v1710_v37, %v1642_v57  ;;  %v1143_v24 = vadd.f32 %v1111_v23, %v1043_v0  ;;  %v1741_v62 = vadd.f32 %v1709_v39, %v1641_v38  ;;  %v1211_v40 = vmul.f32 %v1672_v28, %v3856_v14 }
 0x16b   : > { %v1782_v25 = vmul.f32 %v4168_v19, %v1743_v1  ;;  %v1144_v16 = vadd.f32 %v1112_v9, %v1044_v52  ;;  %v1779_v30 = vmul.f32 %v4168_v19, %v1740_v12  ;;  %v1212_v63 = vmul.f32 %v3856_v14, %v1176_v32  ;;  %v1476_v1 = vld [vmem:[#allocation2 + $0xd8] sm:$0xff]  ;;  %v5412_v52 = vld [vmem:[#allocation34_spill] sm:$0xff] }
 0x16c   : > { %v1781_v60 = vmul.f32 %v4168_v19, %v1742_v26  ;;  %v1311_v5 = vmul.f32 %v3872_v36, %v1275_v11  ;;  %v1780_v13 = vmul.f32 %v4168_v19, %v1741_v62  ;;  %v1243_v58 = vadd.f32 %v1211_v40, %v1143_v24  ;;  %v5413_v62 = vld [vmem:[#allocation35_spill] sm:$0xff]  ;;  %v980_v40 = vld [vmem:[#allocation2 + $0xe0] sm:$0xff] }
 0x16d   : > { %v1821_v7 = vadd.f32 %v4177_v61, %v1782_v25  ;;  %v1312_v38 = vmul.f32 %v3872_v36, %v1276_v53  ;;  %v1818_v39 = vadd.f32 %v4177_v61, %v1779_v30  ;;  %v1244_v21 = vadd.f32 %v1212_v63, %v1144_v16  ;;  %v5414_v30 = vld [vmem:[#allocation31_spill] sm:$0xff]  ;;  %v5415_v63 = vld [vmem:[#allocation32_spill] sm:$0xff] }
 0x16e   : > { %v1820_v28 = vadd.f32 %v4177_v61, %v1781_v60  ;;  %v1411_v22 = vmul.f32 %v3885_v49, %v1375_v31  ;;  %v1819_v2 = vadd.f32 %v4177_v61, %v1780_v13  ;;  %v1343_v37 = vadd.f32 %v1311_v5, %v1243_v58  ;;  %v5416_v13 = vld [vmem:[#allocation38_spill] sm:$0xff] }
 0x16f   : > { %v1853_v15 = vmax.f32 %v1821_v7, 0.0  ;;  %v1412_v55 = vmul.f32 %v3885_v49, %v5408_v42  ;;  %v1850_v47 = vmax.f32 %v1818_v39, 0.0  ;;  %v1344_v59 = vadd.f32 %v1312_v38, %v1244_v21  ;;  %v5417_v38 = vld [vmem:[#allocation37_spill] sm:$0xff] }
 0x170   : > { %v1852_v23 = vmax.f32 %v1820_v28, 0.0  ;;  %v1512_v50 = vmul.f32 %v3881_v45, %v1476_v1  ;;  %v1851_v57 = vmax.f32 %v1819_v2, 0.0  ;;  %v1443_v0 = vadd.f32 %v1411_v22, %v1343_v37  ;;  %v5418_v28 = vld [vmem:[#allocation36_spill] sm:$0xff] }
 0x171   : > { %v1513_v9 = vmul.f32 %v3881_v45, %v5412_v52  ;;  %v1612_v32 = vmul.f32 %v3887_v51, %v1576_v43  ;;  %v1444_v12 = vadd.f32 %v1412_v55, %v1344_v59  ;;  %v1613_v26 = vmul.f32 %v3887_v51, %v1577_v56 }
 0x172   : > { %v1878_v11 = vpack.c.bf16 %v1853_v15, %v1852_v23  ;;  %v1712_v42 = vmul.f32 %v4145_v41, %v1676_v6  ;;  %v1877_v24 = vpack.c.bf16 %v1851_v57, %v1850_v47  ;;  %v1544_v53 = vadd.f32 %v1512_v50, %v1443_v0  ;;  %v5419_v15 = vld [vmem:[#allocation42_spill] sm:$0xff]  ;;  %v1180_v23 = vld [vmem:[#allocation2 + $0xe2] sm:$0xff] }
 0x173   : > { %v1713_v25 = vmul.f32 %v4145_v41, %v5413_v62  ;;  %v1413_v16 = vmul.f32 %v1676_v6, %v3885_v49  ;;  %v1545_v31 = vadd.f32 %v1513_v9, %v1444_v12  ;;  %v1514_v60 = vmul.f32 %v3881_v45, %v5414_v30 }
 0x174   : > { %v1614_v5 = vmul.f32 %v3887_v51, %v5415_v63  ;;  %v1615_v7 = vmul.f32 %v3887_v51, %v5416_v13  ;;  %3353 = vmatmul.mubr.msk.bf16.gmra.mrb[8].mxu1 %vm415_vm1, %v1877_v24  ;;  %v1644_v58 = vadd.f32 %v1612_v32, %v1544_v53  ;;  %v1714_v21 = vmul.f32 %v4145_v41, %v5418_v28  ;;  %v5420_v32 = vld [vmem:[#allocation23_spill] sm:$0xff]  ;;  %v5421_v24 = vld [vmem:[#allocation29_spill] sm:$0xff] }
 0x175   : > { %v1445_v39 = vadd.f32 %v1413_v16, %v5417_v38  ;;  %v1715_v22 = vmul.f32 %v4145_v41, %v4220_v20  ;;  %3356 = vmatprep.mubr.msk.bf16.mxu1 %vm415_vm1, %v1878_v11  ;;  %v1645_v2 = vadd.f32 %v1613_v26, %v1545_v31  ;;  %v1015_v55 = vmul.f32 %v1476_v1, %v3847_v4  ;;  %v1280_v26 = vld [vmem:[#allocation2 + $0xf8] sm:$0xff] }
 0x176   : > { %v1647_v37 = vadd.f32 %v1615_v7, %v5419_v15  ;;  %v1016_v47 = vmul.f32 %v3847_v4, %v980_v40  ;;  %v1744_v59 = vadd.f32 %v1712_v42, %v1644_v58  ;;  %v1115_v57 = vmul.f32 %v1576_v43, %v3850_v8  ;;  %v1580_v58 = vld [vmem:[#allocation2 + $0x109] sm:$0xff] }
 0x177   : > { %v1546_v50 = vadd.f32 %v1514_v60, %v1445_v39  ;;  %v1116_v0 = vmul.f32 %v1577_v56, %v3850_v8  ;;  %v1745_v52 = vadd.f32 %v1713_v25, %v1645_v2  ;;  %v1047_v12 = vadd.f32 %v1015_v55, %v5420_v32  ;;  %v1581_v2 = vld [vmem:[#allocation2 + $0x111] sm:$0xff] }
 0x178   : > { %v1747_v9 = vadd.f32 %v1715_v22, %v1647_v37  ;;  %v1048_v11 = vadd.f32 %v1016_v47, %v5421_v24  ;;  %v1783_v53 = vmul.f32 %v4168_v19, %v1744_v59  ;;  %v1215_v1 = vmul.f32 %v1676_v6, %v3856_v14  ;;  %v1680_v47 = vld [vmem:[#allocation2 + $0x10a] sm:$0xff] }
 0x179   : > { %v1646_v62 = vadd.f32 %v1614_v5, %v1546_v50  ;;  %v1216_v16 = vmul.f32 %v3856_v14, %v1180_v23  ;;  %v1784_v42 = vmul.f32 %v4168_v19, %v1745_v52  ;;  %v1147_v40 = vadd.f32 %v1115_v57, %v1047_v12 }
 0x17a   : > { %v1786_v43 = vmul.f32 %v4168_v19, %v1747_v9  ;;  %v1148_v56 = vadd.f32 %v1116_v0, %v1048_v11  ;;  %v1822_v25 = vadd.f32 %v4177_v61, %v1783_v53  ;;  %v1315_v60 = vmul.f32 %v3872_v36, %v5414_v30  ;;  %v983_v11 = vld [vmem:[#allocation2 + $0x108] sm:$0xff] }
 0x17b   : > { %v1746_v31 = vadd.f32 %v1714_v21, %v1646_v62  ;;  %v1316_v63 = vmul.f32 %v3872_v36, %v1280_v26  ;;  %v1823_v5 = vadd.f32 %v4177_v61, %v1784_v42  ;;  %v1247_v13 = vadd.f32 %v1215_v1, %v1147_v40  ;;  %v984_v62 = vld [vmem:[#allocation2 + $0x110] sm:$0xff] }
 0x17c   : > { %v1825_v6 = vadd.f32 %v4177_v61, %v1786_v43  ;;  %v1248_v7 = vadd.f32 %v1216_v16, %v1148_v56  ;;  %v1854_v38 = vmax.f32 %v1822_v25, 0.0  ;;  %v1415_v22 = vmul.f32 %v3885_v49, %v5418_v28  ;;  %v5422_v16 = vld [vmem:[#allocation44_spill] sm:$0xff] }
 0x17d   : > { %v1785_v39 = vmul.f32 %v4168_v19, %v1746_v31  ;;  %v1416_v21 = vmul.f32 %v3885_v49, %v4220_v20  ;;  %v1855_v30 = vmax.f32 %v1823_v5, 0.0  ;;  %v1347_v37 = vadd.f32 %v1315_v60, %v1247_v13 }
 0x17e   : > { %v1857_v15 = vmax.f32 %v1825_v6, 0.0  ;;  %v1348_v55 = vadd.f32 %v1316_v63, %v1248_v7  ;;  %v1516_v59 = vmul.f32 %v3881_v45, %v4274_v35  ;;  %v1517_v50 = vmul.f32 %v3881_v45, %v4300_v44  ;;  %v5423_v7 = vld [vmem:[#allocation39_spill] sm:$0xff] }
 0x17f   : > { %v1824_v23 = vadd.f32 %v4177_v61, %v1785_v39  ;;  %v1616_v57 = vmul.f32 %v3887_v51, %v1580_v58  ;;  %v1879_v28 = vpack.c.bf16 %v1855_v30, %v1854_v38  ;;  %v1447_v0 = vadd.f32 %v1415_v22, %v1347_v37  ;;  %v1284_v37 = vld [vmem:[#allocation2 + $0x128] sm:$0xff] }
 0x180   : > { %v1448_v52 = vadd.f32 %v1416_v21, %v1348_v55  ;;  %v1617_v20 = vmul.f32 %v3887_v51, %v1581_v2  ;;  %v1716_v32 = vmul.f32 %v4145_v41, %v1680_v47  ;;  %v1717_v12 = vmul.f32 %v4145_v41, %v4302_v46  ;;  %v5424_v21 = vld [vmem:[#allocation43_spill] sm:$0xff] }
 0x181   : > { %v1856_v9 = vmax.f32 %v1824_v23, 0.0  ;;  %v1417_v24 = vmul.f32 %v1680_v47, %v3885_v49  ;;  %3357 = vmatmul.mubr.msk.bf16.gmra.mrb[12].mxu1 %vm415_vm1, %v1879_v28  ;;  %v1548_v35 = vadd.f32 %v1516_v59, %v1447_v0  ;;  %v1518_v26 = vmul.f32 %v3881_v45, %v4314_v18 }
 0x182   : > { %v1549_v44 = vadd.f32 %v1517_v50, %v1448_v52  ;;  %v1618_v53 = vmul.f32 %v3887_v51, %v4323_v29  ;;  %v1619_v46 = vmul.f32 %v3887_v51, %v4351_v3  ;;  %v1718_v43 = vmul.f32 %v4145_v41, %v4329_v17  ;;  %v1184_v3 = vld [vmem:[#allocation2 + $0x112] sm:$0xff] }
 0x183   : > { %v1880_v1 = vpack.c.bf16 %v1857_v15, %v1856_v9  ;;  %v1449_v42 = vadd.f32 %v1417_v24, %v5422_v16  ;;  %v1648_v40 = vadd.f32 %v1616_v57, %v1548_v35  ;;  %v1719_v25 = vmul.f32 %v4145_v41, %v4357_v10 }
 0x184   : > { %v1649_v56 = vadd.f32 %v1617_v20, %v1549_v44  ;;  %v1019_v31 = vmul.f32 %v3847_v4, %v983_v11  ;;  %v1651_v60 = vadd.f32 %v1619_v46, %v4334_v48  ;;  %v1020_v63 = vmul.f32 %v3847_v4, %v984_v62  ;;  %v4674_v20 = vld [vmem:[%s5267_s5] ss:$0 sm:$0xff] }
 0x185   : > { %3360 = vmatprep.mubr.msk.bf16.mxu1 %vm415_vm1, %v1880_v1  ;;  %v1550_v29 = vadd.f32 %v1518_v26, %v1449_v42  ;;  %v1119_v5 = vmul.f32 %v1580_v58, %v3850_v8  ;;  %v1748_v6 = vadd.f32 %v1716_v32, %v1648_v40  ;;  %v1120_v39 = vmul.f32 %v1581_v2, %v3850_v8  ;;  %v1585_v26 = vld [vmem:[#allocation2 + $0x141] sm:$0xff]  ;;  %v4685_v62 = vld [vmem:[%s5268_s6] ss:$0 sm:$0xff]  ;;  %v5425_v42 = vld [vmem:[#allocation47_spill] sm:$0xff] }
 0x186   : > { %v1749_v13 = vadd.f32 %v1717_v12, %v1649_v56  ;;  %v1051_v38 = vadd.f32 %v1019_v31, %v5423_v7  ;;  %v1751_v41 = vadd.f32 %v1719_v25, %v1651_v60  ;;  %v1052_v30 = vadd.f32 %v1020_v63, %v5424_v21  ;;  %v1584_v12 = vld [vmem:[#allocation2 + $0x139] sm:$0xff]  ;;  %v4697_v60 = vld [vmem:[%s5266_s4 + $0x8] ss:$0 sm:$0xff] }
 0x187   : > { %v1650_v22 = vadd.f32 %v1618_v53, %v1550_v29  ;;  %v1219_v15 = vmul.f32 %v1680_v47, %v3856_v14  ;;  %v1787_v48 = vmul.f32 %v4168_v19, %v1748_v6  ;;  %v1220_v58 = vmul.f32 %v3856_v14, %v1184_v3  ;;  %v1684_v53 = vld [vmem:[#allocation2 + $0x13a] sm:$0xff] }
 0x188   : > { %v1788_v55 = vmul.f32 %v4168_v19, %v1749_v13  ;;  %v1151_v23 = vadd.f32 %v1119_v5, %v1051_v38  ;;  %v1790_v50 = vmul.f32 %v4168_v19, %v1751_v41  ;;  %v1152_v57 = vadd.f32 %v1120_v39, %v1052_v30  ;;  %v5426_v40 = vld [vmem:[#allocation8_spill] sm:$0xff]  ;;  %v5427_v3 = vld [vmem:[#allocation11_spill] sm:$0xff] }
 0x189   : > { %v1750_v59 = vadd.f32 %v1718_v43, %v1650_v22  ;;  %v1319_v2 = vmul.f32 %v3872_v36, %v4314_v18  ;;  %v1826_v28 = vadd.f32 %v4177_v61, %v1787_v48  ;;  %v1320_v52 = vmul.f32 %v3872_v36, %v1284_v37  ;;  %v5428_v30 = vld [vmem:[#allocation4_spill] sm:$0xff] }
 0x18a   : > { %v1827_v0 = vadd.f32 %v4177_v61, %v1788_v55  ;;  %v1251_v47 = vadd.f32 %v1219_v15, %v1151_v23  ;;  %v1829_v19 = vadd.f32 %v4177_v61, %v1790_v50  ;;  %v1252_v32 = vadd.f32 %v1220_v58, %v1152_v57  ;;  %v5429_v37 = vld [vmem:[#allocation12_spill] sm:$0xff]  ;;  %v5430_v55 = vld [vmem:[#allocation15_spill] sm:$0xff] }
 0x18b   : > { %v1789_v9 = vmul.f32 %v4674_v20, %v1750_v59  ;;  %v1419_v18 = vmul.f32 %v3885_v49, %v4329_v17  ;;  %v1858_v24 = vmax.f32 %v1826_v28, 0.0  ;;  %v1420_v44 = vmul.f32 %v3885_v49, %v4357_v10  ;;  %v5431_v59 = vld [vmem:[#allocation9_spill] sm:$0xff] }
 0x18c   : > { %v1859_v11 = vmax.f32 %v1827_v0, 0.0  ;;  %v1351_v35 = vadd.f32 %v1319_v2, %v1251_v47  ;;  %v1861_v1 = vmax.f32 %v1829_v19, 0.0  ;;  %v1352_v16 = vadd.f32 %v1320_v52, %v1252_v32  ;;  %v5433_v32 = vld [vmem:[#allocation46_spill] sm:$0xff] }
 0x18d   : > { %v1828_v61 = vadd.f32 %v4685_v62, %v1789_v9  ;;  %v1520_v17 = vmul.f32 %v3881_v45, %v5425_v42  ;;  %v1521_v56 = vmul.f32 %v3881_v45, %v5426_v40  ;;  %v1620_v10 = vmul.f32 %v3887_v51, %v1584_v12  ;;  %v5432_v9 = vld [vmem:[#allocation45_spill] sm:$0xff] }
 0x18e   : > { %v1881_v46 = vpack.c.bf16 %v1859_v11, %v1858_v24  ;;  %v1451_v43 = vadd.f32 %v1419_v18, %v1351_v35  ;;  %v1452_v31 = vadd.f32 %v1420_v44, %v1352_v16  ;;  %v1621_v29 = vmul.f32 %v3887_v51, %v1585_v26 }
 0x18f   : > { %v1860_v25 = vmax.f32 %v1828_v61, 0.0  ;;  %v1720_v63 = vmul.f32 %v4697_v60, %v1684_v53  ;;  %v1721_v6 = vmul.f32 %v4697_v60, %v5427_v3  ;;  %v1421_v13 = vmul.f32 %v1684_v53, %v3885_v49 }
 0x190   : > { %3361 = vmatmul.mubr.msk.bf16.gmra.mrb[16].mxu1 %vm415_vm1, %v1881_v46  ;;  %v1552_v5 = vadd.f32 %v1520_v17, %v1451_v43  ;;  %v1522_v7 = vmul.f32 %v3881_v45, %v4441_v27  ;;  %v1553_v39 = vadd.f32 %v1521_v56, %v1452_v31  ;;  %v1622_v22 = vmul.f32 %v3887_v51, %v4452_v33  ;;  %v5434_v46 = vld [vmem:[#allocation5_spill] sm:$0xff] }
 0x191   : > { %v1882_v38 = vpack.c.bf16 %v1861_v1, %v1860_v25  ;;  %v1623_v41 = vmul.f32 %v3887_v51, %v4478_v34  ;;  %v1453_v15 = vadd.f32 %v1421_v13, %v5428_v30  ;;  %v1722_v48 = vmul.f32 %v4697_v60, %v5429_v37  ;;  %v1588_v25 = vld [vmem:[#allocation2 + $0x169] sm:$0xff] }
 0x192   : > { %v1652_v21 = vadd.f32 %v1620_v10, %v1552_v5  ;;  %v1723_v23 = vmul.f32 %v4697_v60, %v5430_v55  ;;  %v1653_v58 = vadd.f32 %v1621_v29, %v1553_v39  ;;  %v1023_v33 = vmul.f32 %v5425_v42, %v3847_v4 }
 0x193   : > { %3364 = vmatprep.mubr.msk.bf16.mxu1 %vm415_vm1, %v1882_v38  ;;  %v1655_v50 = vadd.f32 %v1623_v41, %v5431_v59  ;;  %v1024_v34 = vmul.f32 %v5426_v40, %v3847_v4  ;;  %v1554_v2 = vadd.f32 %v1522_v7, %v1453_v15  ;;  %v1123_v28 = vmul.f32 %v1584_v12, %v3850_v8  ;;  %v1688_v38 = vld [vmem:[#allocation2 + $0x16a] sm:$0xff] }
 0x194   : > { %v1752_v57 = vadd.f32 %v1720_v63, %v1652_v21  ;;  %v1124_v0 = vmul.f32 %v1585_v26, %v3850_v8  ;;  %v1753_v47 = vadd.f32 %v1721_v6, %v1653_v58  ;;  %v1055_v19 = vadd.f32 %v1023_v33, %v5432_v9  ;;  %v5436_v21 = vld [vmem:[#allocation40_spill] sm:$0xff] }
 0x195   : > { %v1755_v52 = vadd.f32 %v1723_v23, %v1655_v50  ;;  %v1056_v18 = vadd.f32 %v1024_v34, %v5433_v32  ;;  %v1654_v11 = vadd.f32 %v1622_v22, %v1554_v2  ;;  %v1223_v35 = vmul.f32 %v1684_v53, %v3856_v14  ;;  %v5435_v22 = vld [vmem:[#allocation19_spill] sm:$0xff]  ;;  %v1591_v50 = vld [vmem:[#allocation2 + $0x189] sm:$0xff] }
 0x196   : > { %v1791_v24 = vmul.f32 %v4674_v20, %v1752_v57  ;;  %v1224_v44 = vmul.f32 %v5427_v3, %v3856_v14  ;;  %v1792_v61 = vmul.f32 %v4674_v20, %v1753_v47  ;;  %v1155_v1 = vadd.f32 %v1123_v28, %v1055_v19  ;;  %v1690_v33 = vld [vmem:[#allocation2 + $0x182] sm:$0xff]  ;;  %v1691_v47 = vld [vmem:[#allocation2 + $0x18a] sm:$0xff] }
 0x197   : > { %v1794_v12 = vmul.f32 %v4674_v20, %v1755_v52  ;;  %v1156_v26 = vadd.f32 %v1124_v0, %v1056_v18  ;;  %v1754_v42 = vadd.f32 %v1722_v48, %v1654_v11  ;;  %v1323_v17 = vmul.f32 %v3872_v36, %v4441_v27  ;;  %v1589_v27 = vld [vmem:[#allocation2 + $0x171] sm:$0xff]  ;;  %v1590_v48 = vld [vmem:[#allocation2 + $0x181] sm:$0xff] }
 0x198   : > { %v1830_v16 = vadd.f32 %v4685_v62, %v1791_v24  ;;  %v1324_v43 = vmul.f32 %v5434_v46, %v3872_v36  ;;  %v1831_v53 = vadd.f32 %v4685_v62, %v1792_v61  ;;  %v1255_v56 = vadd.f32 %v1223_v35, %v1155_v1  ;;  %v5437_v2 = vld [vmem:[#allocation41_spill] sm:$0xff]  ;;  %v5438_v24 = vld [vmem:[#allocation14_spill] sm:$0xff] }
 0x199   : > { %v1833_v40 = vadd.f32 %v4685_v62, %v1794_v12  ;;  %v1256_v10 = vadd.f32 %v1224_v44, %v1156_v26  ;;  %v1793_v29 = vmul.f32 %v4674_v20, %v1754_v42  ;;  %v1423_v63 = vmul.f32 %v3885_v49, %v5429_v37  ;;  %v1490_v37 = vld [vmem:[#allocation2 + $0x180] sm:$0xff] }
 0x19a   : > { %v1862_v31 = vmax.f32 %v1830_v16, 0.0  ;;  %v1424_v5 = vmul.f32 %v3885_v49, %v5430_v55  ;;  %v1863_v3 = vmax.f32 %v1831_v53, 0.0  ;;  %v1355_v13 = vadd.f32 %v1323_v17, %v1255_v56 }
 0x19b   : > { %v1865_v6 = vmax.f32 %v1833_v40, 0.0  ;;  %v1356_v7 = vadd.f32 %v1324_v43, %v1256_v10  ;;  %v1832_v39 = vadd.f32 %v4685_v62, %v1793_v29  ;;  %v1524_v41 = vmul.f32 %v3881_v45, %v5435_v22  ;;  %v5439_v40 = vld [vmem:[#allocation10_spill] sm:$0xff] }
 0x19c   : > { %v1525_v30 = vmul.f32 %v3881_v45, %v5436_v21  ;;  %v1624_v15 = vmul.f32 %v3887_v51, %v1588_v25  ;;  %v1883_v23 = vpack.c.bf16 %v1863_v3, %v1862_v31  ;;  %v1455_v55 = vadd.f32 %v1423_v63, %v1355_v13  ;;  %v5440_v63 = vld [vmem:[#allocation17_spill] sm:$0xff] }
 0x19d   : > { %v1456_v58 = vadd.f32 %v1424_v5, %v1356_v7  ;;  %v1625_v59 = vmul.f32 %v3887_v51, %v1589_v27  ;;  %v1864_v34 = vmax.f32 %v1832_v39, 0.0  ;;  %v1724_v57 = vmul.f32 %v4697_v60, %v1688_v38 }
 0x19e   : > { %v1725_v28 = vmul.f32 %v4697_v60, %v5437_v2  ;;  %v1425_v0 = vmul.f32 %v1688_v38, %v3885_v49  ;;  %3365 = vmatmul.mubr.msk.bf16.gmra.mrb[20].mxu1 %vm415_vm1, %v1883_v23  ;;  %v1556_v52 = vadd.f32 %v1524_v41, %v1455_v55  ;;  %v1526_v19 = vmul.f32 %v3881_v45, %v1490_v37  ;;  %v1493_v55 = vld [vmem:[#allocation2 + $0x1a0] sm:$0xff] }
 0x19f   : > { %v1557_v9 = vadd.f32 %v1525_v30, %v1456_v58  ;;  %v1626_v32 = vmul.f32 %v3887_v51, %v1590_v48  ;;  %v1884_v18 = vpack.c.bf16 %v1865_v6, %v1864_v34  ;;  %v1627_v35 = vmul.f32 %v3887_v51, %v1591_v50  ;;  %v1492_v30 = vld [vmem:[#allocation2 + $0x198] sm:$0xff] }
 0x1a0   : > { %v1457_v11 = vadd.f32 %v1425_v0, %v5438_v24  ;;  %v1726_v44 = vmul.f32 %v4697_v60, %v1690_v33  ;;  %v1656_v61 = vadd.f32 %v1624_v15, %v1556_v52  ;;  %v1727_v1 = vmul.f32 %v4697_v60, %v1691_v47  ;;  %v1592_v58 = vld [vmem:[#allocation2 + $0x199] sm:$0xff] }
 0x1a1   : > { %v1657_v12 = vadd.f32 %v1625_v59, %v1557_v9  ;;  %v1027_v26 = vmul.f32 %v5435_v22, %v3847_v4  ;;  %3368 = vmatprep.mubr.msk.bf16.mxu1 %vm415_vm1, %v1884_v18  ;;  %v1659_v42 = vadd.f32 %v1627_v35, %v4568_v54  ;;  %v1028_v17 = vmul.f32 %v5436_v21, %v3847_v4  ;;  %v1692_v52 = vld [vmem:[#allocation2 + $0x19a] sm:$0xff]  ;;  %v1693_v18 = vld [vmem:[#allocation2 + $0x1a2] sm:$0xff] }
 0x1a2   : > { %v1558_v16 = vadd.f32 %v1526_v19, %v1457_v11  ;;  %v1127_v46 = vmul.f32 %v1588_v25, %v3850_v8  ;;  %v1756_v43 = vadd.f32 %v1724_v57, %v1656_v61  ;;  %v1128_v10 = vmul.f32 %v1589_v27, %v3850_v8  ;;  %v1593_v57 = vld [vmem:[#allocation2 + $0x1a1] sm:$0xff] }
 0x1a3   : > { %v1757_v53 = vadd.f32 %v1725_v28, %v1657_v12  ;;  %v1059_v56 = vadd.f32 %v1027_v26, %v5439_v40  ;;  %v1759_v29 = vadd.f32 %v1727_v1, %v1659_v42  ;;  %v1060_v5 = vadd.f32 %v1028_v17, %v5440_v63 }
 0x1a4   : > { %v1658_v31 = vadd.f32 %v1626_v32, %v1558_v16  ;;  %v1227_v3 = vmul.f32 %v1688_v38, %v3856_v14  ;;  %v1795_v6 = vmul.f32 %v4674_v20, %v1756_v43  ;;  %v1228_v4 = vmul.f32 %v5437_v2, %v3856_v14  ;;  %v5441_v38 = vld [vmem:[#allocation16_spill] sm:$0xff] }
 0x1a5   : > { %v1796_v54 = vmul.f32 %v4674_v20, %v1757_v53  ;;  %v1159_v13 = vadd.f32 %v1127_v46, %v1059_v56  ;;  %v1798_v7 = vmul.f32 %v4674_v20, %v1759_v29  ;;  %v1160_v39 = vadd.f32 %v1128_v10, %v1060_v5  ;;  %v4842_v56 = vld [vmem:[%s5271_s9] ss:$0 sm:$0xff] }
 0x1a6   : > { %v1758_v25 = vadd.f32 %v1726_v44, %v1658_v31  ;;  %v1327_v8 = vmul.f32 %v1490_v37, %v3872_v36  ;;  %v1834_v27 = vadd.f32 %v4685_v62, %v1795_v6  ;;  %v1328_v21 = vmul.f32 %v5441_v38, %v3872_v36  ;;  %v3552_v38 = vld [vmem:[%s3678_s30 + $0x8] sm:$0xff] }
 0x1a7   : > { %v1835_v22 = vadd.f32 %v4685_v62, %v1796_v54  ;;  %v1259_v41 = vadd.f32 %v1227_v3, %v1159_v13  ;;  %v1837_v48 = vadd.f32 %v4685_v62, %v1798_v7  ;;  %v1260_v14 = vadd.f32 %v1228_v4, %v1160_v39  ;;  %v3549_v4 = vld [vmem:[%s3678_s30 + $0x10] sm:$0xff]  ;;  %v3550_v39 = vld [vmem:[%s3678_s30] sm:$0xff] }
 0x1a8   : > { %v1797_v15 = vmul.f32 %v4674_v20, %v1758_v25  ;;  %v1427_v23 = vmul.f32 %v1690_v33, %v3885_v49  ;;  %v1866_v59 = vmax.f32 %v1834_v27, 0.0  ;;  %v1428_v34 = vmul.f32 %v1691_v47, %v3885_v49 }
 0x1a9   : > { %v1867_v37 = vmax.f32 %v1835_v22, 0.0  ;;  %v1359_v50 = vadd.f32 %v1327_v8, %v1259_v41  ;;  %v1869_v28 = vmax.f32 %v1837_v48, 0.0  ;;  %v1360_v36 = vadd.f32 %v1328_v21, %v1260_v14  ;;  %v3551_v22 = vld [vmem:[%s3678_s30 + $0x18] sm:$0xff] }
 0x1aa   : > { %v1836_v2 = vadd.f32 %v4685_v62, %v1797_v15  ;;  %v1528_v0 = vmul.f32 %v3881_v45, %v1492_v30  ;;  %v1529_v32 = vmul.f32 %v3881_v45, %v1493_v55  ;;  %v1628_v33 = vmul.f32 %v3887_v51, %v1592_v58 }
 0x1ab   : > { %v1885_v9 = vpack.c.bf16 %v1867_v37, %v1866_v59  ;;  %v1459_v19 = vadd.f32 %v1427_v23, %v1359_v50  ;;  %v1460_v11 = vadd.f32 %v1428_v34, %v1360_v36  ;;  %v1629_v35 = vmul.f32 %v3887_v51, %v1593_v57 }
 0x1ac   : > { %v1868_v24 = vmax.f32 %v1836_v2, 0.0  ;;  %v1728_v47 = vmul.f32 %v4697_v60, %v1692_v52  ;;  %v1729_v12 = vmul.f32 %v4697_v60, %v1693_v18  ;;  %v5442_v60 = vmov 0.0   ;;  %v3553_v52 = vld [vmem:[%s3678_s30 + $0x30] sm:$0xff] }
 0x1ad   : > { %3369 = vmatmul.mubr.msk.bf16.gmra.mrb[24].mxu1 %vm415_vm1, %v1885_v9  ;;  %v1560_v49 = vadd.f32 %v1528_v0, %v1459_v19  ;;  %v1561_v61 = vadd.f32 %v1529_v32, %v1460_v11  ;;  %472 = vst.msk [vmem:[#allocation3 + $0x18] sm:$0x1] %vm470_vm4, %v5442_v60  ;;  %473 = vst.msk [vmem:[#allocation3 + $0x30] sm:$0x1] %vm470_vm4, %v5442_v60  ;;  %v3554_v32 = vld [vmem:[%s3678_s30 + $0x20] sm:$0xff] }
 0x1ae   : > { %v1886_v44 = vpack.c.bf16 %v1869_v28, %v1868_v24  ;;  %471 = vst.msk [vmem:[#allocation3] sm:$0x1] %vm470_vm4, %v5442_v60  ;;  %474 = vst.msk [vmem:[#allocation3 + $0x48] sm:$0x1] %vm470_vm4, %v5442_v60  ;;  %v3555_v24 = vld [vmem:[%s3678_s30 + $0x38] sm:$0xff] }
 0x1af   : > { %v1660_v1 = vadd.f32 %v1628_v33, %v1560_v49  ;;  %v1661_v45 = vadd.f32 %v1629_v35, %v1561_v61  ;;  %475 = vst.msk [vmem:[#allocation3 + $0x60] sm:$0x1] %vm470_vm4, %v5442_v60  ;;  %476 = vst.msk [vmem:[#allocation3 + $0x78] sm:$0x1] %vm470_vm4, %v5442_v60  ;;  %v3556_v35 = vld [vmem:[%s3678_s30 + $0x28] sm:$0xff] }
 0x1b0   : > { %3372 = vmatprep.mubr.msk.bf16.mxu1 %vm415_vm1, %v1886_v44  ;;  %477 = vst.msk [vmem:[#allocation3 + $0x90] sm:$0x1] %vm470_vm4, %v5442_v60  ;;  %478 = vst.msk [vmem:[#allocation3 + $0xa8] sm:$0x1] %vm470_vm4, %v5442_v60 }
 0x1b1   : > { %v1760_v26 = vadd.f32 %v1728_v47, %v1660_v1  ;;  %v1761_v16 = vadd.f32 %v1729_v12, %v1661_v45  ;;  %479 = vst.msk [vmem:[#allocation3 + $0xc0] sm:$0x1] %vm470_vm4, %v5442_v60  ;;  %480 = vst.msk [vmem:[#allocation3 + $0xd8] sm:$0x1] %vm470_vm4, %v5442_v60 }
 0x1b2   : > { %481 = vst.msk [vmem:[#allocation3 + $0xf0] sm:$0x1] %vm470_vm4, %v5442_v60  ;;  %482 = vst.msk [vmem:[#allocation3 + $0x108] sm:$0x1] %vm470_vm4, %v5442_v60 }
 0x1b3   : > { %v1799_v42 = vmul.f32 %v4674_v20, %v1760_v26  ;;  %v1800_v17 = vmul.f32 %v4674_v20, %v1761_v16  ;;  %483 = vst.msk [vmem:[#allocation3 + $0x120] sm:$0x1] %vm470_vm4, %v5442_v60  ;;  %484 = vst.msk [vmem:[#allocation3 + $0x138] sm:$0x1] %vm470_vm4, %v5442_v60  ;;  %v4837_v20 = vld [vmem:[%s5270_s8] ss:$0 sm:$0xff] }
 0x1b4   : > { %485 = vst.msk [vmem:[#allocation3 + $0x150] sm:$0x1] %vm470_vm4, %v5442_v60  ;;  %486 = vst.msk [vmem:[#allocation3 + $0x168] sm:$0x1] %vm470_vm4, %v5442_v60 }
 0x1b5   : > { %v1838_v51 = vadd.f32 %v4685_v62, %v1799_v42  ;;  %v1839_v46 = vadd.f32 %v4685_v62, %v1800_v17  ;;  %487 = vst.msk [vmem:[#allocation3 + $0x180] sm:$0x1] %vm470_vm4, %v5442_v60 }
 0x1b6   : > { %465 = vst.msk [vmem:[#allocation3 + $0x10] sm:$0x3] %vm464_vm5, %v5442_v60 }
 0x1b7   : > { %v1870_v43 = vmax.f32 %v1838_v51, 0.0  ;;  %v1871_v53 = vmax.f32 %v1839_v46, 0.0 }
 0x1b9   : > { %v1887_v40 = vpack.c.bf16 %v1871_v53, %v1870_v43 }
 0x1bb   : > { %3373 = vmatmul.mubr.msk.bf16.gmra.mrb[28].mxu1 %vm415_vm1, %v1887_v40 }
 0x216   : > { %v3346_v62 = vpop.f32.mrb[0].mxu1 }
 0x217   : > { %v2138_v10 = vmul.f32 %v3346_v62, %v4837_v20  ;;  %v2002_v31 = vpop.f32.mrb[1].mxu1  ;;  %v3557_v62 = vld [vmem:[%s3678_s30 + $0x50] sm:$0xff] }
 0x218   : > { %v2136_v29 = vmul.f32 %v4837_v20, %v2002_v31  ;;  %v3347_v63 = vpop.f32.mrb[2].mxu1 }
 0x219   : > { %v2177_v5 = vadd.f32 %v4842_v56, %v2138_v10  ;;  %v2139_v3 = vmul.f32 %v3347_v63, %v4837_v20  ;;  %v2005_v6 = vpop.f32.mrb[3].mxu1 }
 0x21a   : > { %v2175_v54 = vadd.f32 %v4842_v56, %v2136_v29  ;;  %v2137_v13 = vmul.f32 %v4837_v20, %v2005_v6  ;;  %v3558_v29 = vld [vmem:[%s3678_s30 + $0x40] sm:$0xff] }
 0x21b   : > { %v2209_v25 = vadd.f32 %v3549_v4, %v2177_v5  ;;  %v2178_v7 = vadd.f32 %v4842_v56, %v2139_v3  ;;  %v3559_v3 = vld [vmem:[%s3678_s30 + $0x58] sm:$0xff] }
 0x21c   : > { %v2207_v8 = vadd.f32 %v3550_v39, %v2175_v54  ;;  %v2176_v27 = vadd.f32 %v4842_v56, %v2137_v13  ;;  %v3560_v54 = vld [vmem:[%s3678_s30 + $0x48] sm:$0xff] }
 0x21d   : > { %2242 = vst.msk [vmem:[#allocation3 + $0x31] sm:$0xff] %vm461_vm0, %v2209_v25  ;;  %v2210_v41 = vadd.f32 %v3551_v22, %v2178_v7 }
 0x21e   : > { %2240 = vst.msk [vmem:[#allocation3 + $0x19] sm:$0xff] %vm461_vm0, %v2207_v8  ;;  %v2208_v21 = vadd.f32 %v3552_v38, %v2176_v27 }
 0x21f   : > { %2243 = vst.msk [vmem:[#allocation3 + $0x39] sm:$0xff] %vm461_vm0, %v2210_v41 }
 0x220   : > { %2241 = vst.msk [vmem:[#allocation3 + $0x21] sm:$0xff] %vm461_vm0, %v2208_v21 }
 0x226   : > { %v2344_v30 = vld [vmem:[#allocation3 + $0x32] ss:$2 sm:$0xff]  ;;  %v2310_v15 = vld [vmem:[#allocation3 + $0x31] ss:$2 sm:$0xff] }
 0x227   : > { %v2342_v48 = vld [vmem:[#allocation3 + $0x1a] ss:$2 sm:$0xff]  ;;  %v2308_v14 = vld [vmem:[#allocation3 + $0x19] ss:$2 sm:$0xff] }
 0x228   : > { %v3410_v23 = vpack.i.bf16 %v2344_v30, %v2342_v48  ;;  %v3400_v55 = vpack.i.bf16 %v2310_v15, %v2308_v14  ;;  %v3561_v48 = vld [vmem:[%s3678_s30 + $0x70] sm:$0xff] }
 0x22a   : > { %3411 = vrot.lane.b32.xlu1 %v3410_v23, %s3590_s17  ;;  %3401 = vrot.lane.b32.xlu0 %v3400_v55, %s3591_s18 }
 0x22f   : > { %v3350_v58 = vpop.f32.mrb[4].mxu1 }
 0x230   : > { %v2142_v59 = vmul.f32 %v3350_v58, %v4837_v20  ;;  %v2018_v37 = vpop.f32.mrb[5].mxu1  ;;  %v3562_v58 = vld [vmem:[%s3678_s30 + $0x60] sm:$0xff] }
 0x231   : > { %v2140_v50 = vmul.f32 %v4837_v20, %v2018_v37  ;;  %v3351_v34 = vpop.f32.mrb[6].mxu1 }
 0x232   : > { %v2181_v57 = vadd.f32 %v4842_v56, %v2142_v59  ;;  %v2143_v2 = vmul.f32 %v3351_v34, %v4837_v20  ;;  %v2021_v28 = vpop.f32.mrb[7].mxu1 }
 0x233   : > { %v2179_v36 = vadd.f32 %v4842_v56, %v2140_v50  ;;  %v2141_v0 = vmul.f32 %v4837_v20, %v2021_v28  ;;  %v3564_v28 = vld [vmem:[%s3678_s30 + $0x68] sm:$0xff] }
 0x234   : > { %v2213_v9 = vadd.f32 %v3553_v52, %v2181_v57  ;;  %v2182_v19 = vadd.f32 %v4842_v56, %v2143_v2  ;;  %v3563_v57 = vld [vmem:[%s3678_s30 + $0x78] sm:$0xff] }
 0x235   : > { %v2211_v33 = vadd.f32 %v3554_v32, %v2179_v36  ;;  %v2180_v18 = vadd.f32 %v4842_v56, %v2141_v0 }
 0x236   : > { %2246 = vst.msk [vmem:[#allocation3 + $0x61] sm:$0xff] %vm461_vm0, %v2213_v9  ;;  %v2214_v11 = vadd.f32 %v3555_v24, %v2182_v19 }
 0x237   : > { %2244 = vst.msk [vmem:[#allocation3 + $0x49] sm:$0xff] %vm461_vm0, %v2211_v33  ;;  %v2212_v49 = vadd.f32 %v3556_v35, %v2180_v18 }
 0x238   : > { %2247 = vst.msk [vmem:[#allocation3 + $0x69] sm:$0xff] %vm461_vm0, %v2214_v11 }
 0x239   : > { %2245 = vst.msk [vmem:[#allocation3 + $0x51] sm:$0xff] %vm461_vm0, %v2212_v49 }
 0x23f   : > { %v2348_v47 = vld [vmem:[#allocation3 + $0x62] ss:$2 sm:$0xff]  ;;  %v2314_v44 = vld [vmem:[#allocation3 + $0x61] ss:$2 sm:$0xff] }
 0x240   : > { %v2346_v61 = vld [vmem:[#allocation3 + $0x4a] ss:$2 sm:$0xff]  ;;  %v2312_v12 = vld [vmem:[#allocation3 + $0x49] ss:$2 sm:$0xff] }
 0x241   : > { %v3415_v1 = vpack.i.bf16 %v2348_v47, %v2346_v61  ;;  %v3405_v45 = vpack.i.bf16 %v2314_v44, %v2312_v12  ;;  %v3565_v12 = vld [vmem:[%s3678_s30 + $0x90] sm:$0xff] }
 0x243   : > { %3416 = vrot.lane.b32.xlu1 %v3415_v1, %s3590_s17  ;;  %3406 = vrot.lane.b32.xlu0 %v3405_v45, %s3591_s18 }
 0x247   : > { %v3354_v26 = vpop.f32.mrb[8].mxu1 }
 0x248   : > { %v2146_v16 = vmul.f32 %v3354_v26, %v4837_v20  ;;  %v2034_v42 = vpop.f32.mrb[9].mxu1 }
 0x249   : > { %v2144_v17 = vmul.f32 %v4837_v20, %v2034_v42  ;;  %v3355_v51 = vpop.f32.mrb[10].mxu1  ;;  %v3566_v42 = vld [vmem:[%s3678_s30 + $0x80] sm:$0xff] }
 0x24a   : > { %v2185_v46 = vadd.f32 %v4842_v56, %v2146_v16  ;;  %v2147_v43 = vmul.f32 %v3355_v51, %v4837_v20  ;;  %v2037_v53 = vpop.f32.mrb[11].mxu1 }
 0x24b   : > { %v2183_v40 = vadd.f32 %v4842_v56, %v2144_v17  ;;  %v2145_v60 = vmul.f32 %v4837_v20, %v2037_v53  ;;  %v3568_v53 = vld [vmem:[%s3678_s30 + $0x88] sm:$0xff] }
 0x24c   : > { %v2217_v10 = vadd.f32 %v3557_v62, %v2185_v46  ;;  %v2186_v31 = vadd.f32 %v4842_v56, %v2147_v43  ;;  %v3567_v46 = vld [vmem:[%s3678_s30 + $0x98] sm:$0xff] }
 0x24d   : > { %v2215_v63 = vadd.f32 %v3558_v29, %v2183_v40  ;;  %v2184_v5 = vadd.f32 %v4842_v56, %v2145_v60 }
 0x24e   : > { %2250 = vst.msk [vmem:[#allocation3 + $0x91] sm:$0xff] %vm461_vm0, %v2217_v10  ;;  %v2218_v6 = vadd.f32 %v3559_v3, %v2186_v31 }
 0x24f   : > { %2248 = vst.msk [vmem:[#allocation3 + $0x79] sm:$0xff] %vm461_vm0, %v2215_v63  ;;  %v2216_v13 = vadd.f32 %v3560_v54, %v2184_v5 }
 0x250   : > { %2251 = vst.msk [vmem:[#allocation3 + $0x99] sm:$0xff] %vm461_vm0, %v2218_v6 }
 0x251   : > { %2249 = vst.msk [vmem:[#allocation3 + $0x81] sm:$0xff] %vm461_vm0, %v2216_v13 }
 0x254   : > { %v3358_v4 = vpop.f32.mrb[12].mxu1 }
 0x255   : > { %v2150_v25 = vmul.f32 %v3358_v4, %v4837_v20  ;;  %v2050_v7 = vpop.f32.mrb[13].mxu1 }
 0x256   : > { %v2148_v39 = vmul.f32 %v4837_v20, %v2050_v7  ;;  %v3359_v8 = vpop.f32.mrb[14].mxu1 }
 0x257   : > { %v2189_v27 = vadd.f32 %v4842_v56, %v2150_v25  ;;  %v2151_v22 = vmul.f32 %v3359_v8, %v4837_v20  ;;  %v2053_v41 = vpop.f32.mrb[15].mxu1  ;;  %v2318_v38 = vld [vmem:[#allocation3 + $0x91] ss:$2 sm:$0xff]  ;;  %v2352_v34 = vld [vmem:[#allocation3 + $0x92] ss:$2 sm:$0xff] }
 0x258   : > { %v2187_v21 = vadd.f32 %v4842_v56, %v2148_v39  ;;  %v2149_v30 = vmul.f32 %v4837_v20, %v2053_v41  ;;  %v2316_v15 = vld [vmem:[#allocation3 + $0x79] ss:$2 sm:$0xff]  ;;  %v2350_v50 = vld [vmem:[#allocation3 + $0x7a] ss:$2 sm:$0xff] }
 0x259   : > { %v2221_v14 = vadd.f32 %v3561_v48, %v2189_v27  ;;  %v2190_v23 = vadd.f32 %v4842_v56, %v2151_v22  ;;  %v3420_v55 = vpack.i.bf16 %v2318_v38, %v2316_v15  ;;  %v3425_v0 = vpack.i.bf16 %v2352_v34, %v2350_v50  ;;  %v3569_v27 = vld [vmem:[%s3678_s30 + $0xb0] sm:$0xff]  ;;  %v3570_v38 = vld [vmem:[%s3678_s30 + $0xa0] sm:$0xff]  ;;  %v3571_v15 = vld [vmem:[%s3678_s30 + $0xb8] sm:$0xff] }
 0x25a   : > { %v2219_v59 = vadd.f32 %v3562_v58, %v2187_v21  ;;  %v2188_v37 = vadd.f32 %v4842_v56, %v2149_v30 }
 0x25b   : > { %2254 = vst.msk [vmem:[#allocation3 + $0xc1] sm:$0xff] %vm461_vm0, %v2221_v14  ;;  %v2222_v2 = vadd.f32 %v3563_v57, %v2190_v23  ;;  %3421 = vrot.lane.b32.xlu0 %v3420_v55, %s3591_s18  ;;  %v3572_v23 = vld [vmem:[%s3678_s30 + $0xa8] sm:$0xff] }
 0x25c   : > { %2252 = vst.msk [vmem:[#allocation3 + $0xa9] sm:$0xff] %vm461_vm0, %v2219_v59  ;;  %v2220_v36 = vadd.f32 %v3564_v28, %v2188_v37 }
 0x25d   : > { %2255 = vst.msk [vmem:[#allocation3 + $0xc9] sm:$0xff] %vm461_vm0, %v2222_v2 }
 0x25e   : > { %2253 = vst.msk [vmem:[#allocation3 + $0xb1] sm:$0xff] %vm461_vm0, %v2220_v36 }
 0x25f   : > { %3426 = vrot.lane.b32.xlu0 %v3425_v0, %s3590_s17 }
 0x263   : > { %v3362_v52 = vpop.f32.mrb[16].mxu1 }
 0x264   : > { %v2154_v9 = vmul.f32 %v3362_v52, %v4837_v20  ;;  %v2066_v19 = vpop.f32.mrb[17].mxu1  ;;  %v2322_v18 = vld [vmem:[#allocation3 + $0xc1] ss:$2 sm:$0xff]  ;;  %v2356_v16 = vld [vmem:[#allocation3 + $0xc2] ss:$2 sm:$0xff] }
 0x265   : > { %v2152_v32 = vmul.f32 %v4837_v20, %v2066_v19  ;;  %v3363_v33 = vpop.f32.mrb[18].mxu1  ;;  %v2320_v49 = vld [vmem:[#allocation3 + $0xa9] ss:$2 sm:$0xff]  ;;  %v2354_v26 = vld [vmem:[#allocation3 + $0xaa] ss:$2 sm:$0xff] }
 0x266   : > { %v2193_v24 = vadd.f32 %v4842_v56, %v2154_v9  ;;  %v2155_v11 = vmul.f32 %v3363_v33, %v4837_v20  ;;  %v2069_v35 = vpop.f32.mrb[19].mxu1  ;;  %v3430_v61 = vpack.i.bf16 %v2322_v18, %v2320_v49  ;;  %v3435_v60 = vpack.i.bf16 %v2356_v16, %v2354_v26 }
 0x267   : > { %v2191_v47 = vadd.f32 %v4842_v56, %v2152_v32  ;;  %v2153_v44 = vmul.f32 %v4837_v20, %v2069_v35  ;;  %v3573_v32 = vld [vmem:[%s3678_s30 + $0xd0] sm:$0xff]  ;;  %v3574_v35 = vld [vmem:[%s3678_s30 + $0xc0] sm:$0xff] }
 0x268   : > { %v2225_v1 = vadd.f32 %v3565_v12, %v2193_v24  ;;  %v2194_v45 = vadd.f32 %v4842_v56, %v2155_v11  ;;  %3431 = vrot.lane.b32.xlu1 %v3430_v61, %s3591_s18  ;;  %v3576_v12 = vld [vmem:[%s3678_s30 + $0xc8] sm:$0xff] }
 0x269   : > { %v2223_v17 = vadd.f32 %v3566_v42, %v2191_v47  ;;  %v2192_v51 = vadd.f32 %v4842_v56, %v2153_v44  ;;  %v3575_v44 = vld [vmem:[%s3678_s30 + $0xd8] sm:$0xff] }
 0x26a   : > { %2258 = vst.msk [vmem:[#allocation3 + $0xf1] sm:$0xff] %vm461_vm0, %v2225_v1  ;;  %v2226_v43 = vadd.f32 %v3567_v46, %v2194_v45 }
 0x26b   : > { %2256 = vst.msk [vmem:[#allocation3 + $0xd9] sm:$0xff] %vm461_vm0, %v2223_v17  ;;  %v2224_v40 = vadd.f32 %v3568_v53, %v2192_v51 }
 0x26c   : > { %2259 = vst.msk [vmem:[#allocation3 + $0xf9] sm:$0xff] %vm461_vm0, %v2226_v43  ;;  %3436 = vrot.lane.b32.xlu1 %v3435_v60, %s3590_s17 }
 0x26d   : > { %2257 = vst.msk [vmem:[#allocation3 + $0xe1] sm:$0xff] %vm461_vm0, %v2224_v40 }
 0x271   : > { %v3366_v62 = vpop.f32.mrb[20].mxu1 }
 0x272   : > { %v2158_v10 = vmul.f32 %v3366_v62, %v4837_v20  ;;  %v2082_v31 = vpop.f32.mrb[21].mxu1 }
 0x273   : > { %v2326_v29 = vld [vmem:[#allocation3 + $0xf1] ss:$2 sm:$0xff]  ;;  %v2156_v63 = vmul.f32 %v4837_v20, %v2082_v31  ;;  %v3367_v5 = vpop.f32.mrb[22].mxu1  ;;  %v2360_v8 = vld [vmem:[#allocation3 + $0xf2] ss:$2 sm:$0xff] }
 0x274   : > { %v2324_v3 = vld [vmem:[#allocation3 + $0xd9] ss:$2 sm:$0xff]  ;;  %v2197_v6 = vadd.f32 %v4842_v56, %v2158_v10  ;;  %v2159_v54 = vmul.f32 %v3367_v5, %v4837_v20  ;;  %v2085_v13 = vpop.f32.mrb[23].mxu1  ;;  %v2358_v39 = vld [vmem:[#allocation3 + $0xda] ss:$2 sm:$0xff] }
 0x275   : > { %v3440_v4 = vpack.i.bf16 %v2326_v29, %v2324_v3  ;;  %v2195_v25 = vadd.f32 %v4842_v56, %v2156_v63  ;;  %v2157_v7 = vmul.f32 %v4837_v20, %v2085_v13  ;;  %v3445_v14 = vpack.i.bf16 %v2360_v8, %v2358_v39  ;;  %v3577_v5 = vld [vmem:[%s3678_s30 + $0xf0] sm:$0xff] }
 0x276   : > { %v2229_v22 = vadd.f32 %v3569_v27, %v2197_v6  ;;  %v2198_v41 = vadd.f32 %v4842_v56, %v2159_v54  ;;  %v3578_v54 = vld [vmem:[%s3678_s30 + $0xe0] sm:$0xff]  ;;  %v2306_v27 = vld [vmem:[#allocation3 + $0x1] ss:$2 sm:$0xff] }
 0x277   : > { %3441 = vrot.lane.b32.xlu0 %v3440_v4, %s3591_s18  ;;  %v2227_v21 = vadd.f32 %v3570_v38, %v2195_v25  ;;  %v2196_v30 = vadd.f32 %v4842_v56, %v2157_v7  ;;  %v3579_v25 = vld [vmem:[%s3678_s30 + $0xf8] sm:$0xff] }
 0x278   : > { %2262 = vst.msk [vmem:[#allocation3 + $0x121] sm:$0xff] %vm461_vm0, %v2229_v22  ;;  %v2230_v48 = vadd.f32 %v3571_v15, %v2198_v41  ;;  %v2276_v15 = vld [vmem:[#allocation3 + $0x30] ss:$2 sm:$0xff] }
 0x279   : > { %2260 = vst.msk [vmem:[#allocation3 + $0x109] sm:$0xff] %vm461_vm0, %v2227_v21  ;;  %v2228_v55 = vadd.f32 %v3572_v23, %v2196_v30  ;;  %v3526_v23 = vld [vmem:[%s5272_s10 + $0x40] sm:$0xff]  }
 0x27a   : > { %2263 = vst.msk [vmem:[#allocation3 + $0x129] sm:$0xff] %vm461_vm0, %v2230_v48  ;;  %3254 = vmatprep.subr.bf16.mxu0 %v3526_v23 }
 0x27b   : > { %3446 = vrot.lane.b32.xlu0 %v3445_v14, %s3590_s17  ;;  %2261 = vst.msk [vmem:[#allocation3 + $0x111] sm:$0xff] %vm461_vm0, %v2228_v55  ;;  %v3527_v55 = vld [vmem:[%s5272_s10] sm:$0xff]  }
 0x27c   : > { %3255 = vmatpush3.bf16.msra.mxu0 %v3527_v55 }
 0x280   : > { %v3370_v58 = vpop.f32.mrb[24].mxu1 }
 0x281   : > { %v2162_v59 = vmul.f32 %v3370_v58, %v4837_v20  ;;  %v2098_v37 = vpop.f32.mrb[25].mxu1  ;;  %v2330_v57 = vld [vmem:[#allocation3 + $0x121] ss:$2 sm:$0xff]  ;;  %v2364_v11 = vld [vmem:[#allocation3 + $0x122] ss:$2 sm:$0xff]  ;;  %v3528_v58 = vld [vmem:[%s5272_s10 + $0x48] sm:$0xff]  }
 0x282   : > { %v2160_v50 = vmul.f32 %v4837_v20, %v2098_v37  ;;  %v3371_v34 = vpop.f32.mrb[26].mxu1  ;;  %v2328_v0 = vld [vmem:[#allocation3 + $0x109] ss:$2 sm:$0xff]  ;;  %v2362_v24 = vld [vmem:[#allocation3 + $0x10a] ss:$2 sm:$0xff]  ;;  %3256 = vmatprep.subr.bf16.mxu0 %v3528_v58 }
 0x283   : > { %v2201_v2 = vadd.f32 %v4842_v56, %v2162_v59  ;;  %v2163_v28 = vmul.f32 %v3371_v34, %v4837_v20  ;;  %v2101_v36 = vpop.f32.mrb[27].mxu1  ;;  %v3450_v19 = vpack.i.bf16 %v2330_v57, %v2328_v0  ;;  %v3455_v45 = vpack.i.bf16 %v2364_v11, %v2362_v24  ;;  %v2340_v34 = vld [vmem:[#allocation3 + $0x2] ss:$2 sm:$0xff]  ;;  %v3538_v11 = vld [vmem:[%s5272_s10 + $0x28] sm:$0xff]  }
 0x284   : > { %v2199_v52 = vadd.f32 %v4842_v56, %v2160_v50  ;;  %v2161_v9 = vmul.f32 %v4837_v20, %v2101_v36  ;;  %v3533_v50 = vld [vmem:[%s5272_s10 + $0x80] sm:$0xff]   ;;  %v3530_v36 = vld [vmem:[%s5272_s10 + $0x50] sm:$0xff]  }
 0x285   : > { %v2233_v33 = vadd.f32 %v3573_v32, %v2201_v2  ;;  %v2202_v18 = vadd.f32 %v4842_v56, %v2163_v28  ;;  %3451 = vrot.lane.b32.xlu1 %v3450_v19, %s3591_s18  ;;  %v3529_v2 = vld [vmem:[%s5272_s10 + $0x8] sm:$0xff]   ;;  %3376 = vmatprep.subr.bf16.mxu1 %v3533_v50  ;;  %v3534_v19 = vld [vmem:[%s5272_s10 + $0x18] sm:$0xff]   ;;  %v3535_v32 = vld [vmem:[%s5272_s10 + $0x60] sm:$0xff]  }
 0x286   : > { %v2231_v49 = vadd.f32 %v3574_v35, %v2199_v52  ;;  %v2200_v47 = vadd.f32 %v4842_v56, %v2161_v9  ;;  %3377 = vmatpush3.bf16.msra.mxu1 %v3533_v50  ;;  %3257 = vmatpush3.bf16.msra.mxu0 %v3529_v2  ;;  %v3531_v52 = vld [vmem:[%s5272_s10 + $0x10] sm:$0xff]   ;;  %v3532_v9 = vld [vmem:[%s5272_s10 + $0x58] sm:$0xff]  }
 0x287   : > { %2266 = vst.msk [vmem:[#allocation3 + $0x151] sm:$0xff] %vm461_vm0, %v2233_v33  ;;  %v2234_v61 = vadd.f32 %v3575_v44, %v2202_v18  ;;  %3258 = vmatprep.subr.bf16.mxu0 %v3530_v36  ;;  %v3536_v33 = vld [vmem:[%s5272_s10 + $0x20] sm:$0xff]   ;;  %v3537_v18 = vld [vmem:[%s5272_s10 + $0x68] sm:$0xff]  }
 0x288   : > { %2264 = vst.msk [vmem:[#allocation3 + $0x139] sm:$0xff] %vm461_vm0, %v2231_v49  ;;  %v2232_v1 = vadd.f32 %v3576_v12, %v2200_v47  ;;  %v2274_v35 = vld [vmem:[#allocation3 + $0x18] ss:$2 sm:$0xff] }
 0x289   : > { %2267 = vst.msk [vmem:[#allocation3 + $0x159] sm:$0xff] %vm461_vm0, %v2234_v61  ;;  %3456 = vrot.lane.b32.xlu1 %v3455_v45, %s3590_s17  ;;  %v3539_v49 = vld [vmem:[%s5272_s10 + $0x70] sm:$0xff]  }
 0x28a   : > { %2265 = vst.msk [vmem:[#allocation3 + $0x141] sm:$0xff] %vm461_vm0, %v2232_v1  ;;  %3259 = vmatpush3.bf16.msra.mxu0 %v3531_v52  ;;  %v3543_v1 = vld [vmem:[%s5272_s10 + $0x88] sm:$0xff]  }
 0x28b   : > { %3260 = vmatprep.subr.bf16.mxu0 %v3532_v9  ;;  %3378 = vmatprep.subr.bf16.mxu1 %v3543_v1 }
 0x28c   : > { %3379 = vmatpush3.bf16.msra.mxu1 %v3543_v1 }
 0x28e   : > { %v3374_v26 = vpop.f32.mrb[28].mxu1  ;;  %3261 = vmatpush3.bf16.msra.mxu0 %v3534_v19  ;;  %v2292_v19 = vld [vmem:[#allocation3 + $0xf0] ss:$2 sm:$0xff] }
 0x28f   : > { %v2166_v16 = vmul.f32 %v3374_v26, %v4837_v20  ;;  %v2114_v42 = vpop.f32.mrb[29].mxu1  ;;  %3262 = vmatprep.subr.bf16.mxu0 %v3535_v32 }
 0x290   : > { %v2334_v17 = vld [vmem:[#allocation3 + $0x151] ss:$2 sm:$0xff]  ;;  %v2164_v51 = vmul.f32 %v4837_v20, %v2114_v42  ;;  %v3375_v46 = vpop.f32.mrb[30].mxu1  ;;  %v2368_v63 = vld [vmem:[#allocation3 + $0x152] ss:$2 sm:$0xff] }
 0x291   : > { %v2332_v43 = vld [vmem:[#allocation3 + $0x139] ss:$2 sm:$0xff]  ;;  %v2205_v53 = vadd.f32 %v4842_v56, %v2166_v16  ;;  %v2167_v40 = vmul.f32 %v3375_v46, %v4837_v20  ;;  %v2117_v60 = vpop.f32.mrb[31].mxu1  ;;  %v2366_v29 = vld [vmem:[#allocation3 + $0x13a] ss:$2 sm:$0xff] }
 0x292   : > { %v3460_v62 = vpack.i.bf16 %v2334_v17, %v2332_v43  ;;  %v2203_v10 = vadd.f32 %v4842_v56, %v2164_v51  ;;  %v2165_v31 = vmul.f32 %v4837_v20, %v2117_v60  ;;  %v3465_v39 = vpack.i.bf16 %v2368_v63, %v2366_v29  ;;  %v3580_v20 = vld [vmem:[%s3678_s30 + $0xe8] sm:$0xff]  ;;  %3263 = vmatpush3.bf16.msra.mxu0 %v3536_v33  ;;  %v2278_v17 = vld [vmem:[#allocation3 + $0x48] ss:$2 sm:$0xff]  ;;  %v3540_v46 = vld [vmem:[%s5272_s10 + $0x30] sm:$0xff]  }
 0x293   : > { %v2237_v3 = vadd.f32 %v3577_v5, %v2205_v53  ;;  %v2206_v6 = vadd.f32 %v4842_v56, %v2167_v40  ;;  %3264 = vmatprep.subr.bf16.mxu0 %v3537_v18  ;;  %v2280_v51 = vld [vmem:[#allocation3 + $0x60] ss:$2 sm:$0xff] }
 0x294   : > { %3461 = vrot.lane.b32.xlu0 %v3460_v62, %s3591_s18  ;;  %v2235_v13 = vadd.f32 %v3578_v54, %v2203_v10  ;;  %v2204_v4 = vadd.f32 %v4842_v56, %v2165_v31  ;;  %v3541_v40 = vld [vmem:[%s5272_s10 + $0x78] sm:$0xff]   ;;  %v2290_v33 = vld [vmem:[#allocation3 + $0xd8] ss:$2 sm:$0xff] }
 0x295   : > { %2270 = vst.msk [vmem:[#allocation3 + $0x181] sm:$0xff] %vm461_vm0, %v2237_v3  ;;  %v2238_v7 = vadd.f32 %v3579_v25, %v2206_v6  ;;  %v3542_v29 = vld [vmem:[%s5272_s10 + $0x38] sm:$0xff]  }
 0x296   : > { %2268 = vst.msk [vmem:[#allocation3 + $0x169] sm:$0xff] %vm461_vm0, %v2235_v13  ;;  %v2236_v8 = vadd.f32 %v3580_v20, %v2204_v4  ;;  %3265 = vmatpush3.bf16.msra.mxu0 %v3538_v11  ;;  %v2296_v18 = vld [vmem:[#allocation3 + $0x120] ss:$2 sm:$0xff] }
 0x297   : > { %2271 = vst.msk [vmem:[#allocation3 + $0x189] sm:$0xff] %vm461_vm0, %v2238_v7  ;;  %3266 = vmatprep.subr.bf16.mxu0 %v3539_v49 }
 0x298   : > { %3466 = vrot.lane.b32.xlu0 %v3465_v39, %s3590_s17  ;;  %2269 = vst.msk [vmem:[#allocation3 + $0x171] sm:$0xff] %vm461_vm0, %v2236_v8  ;;  %v2284_v39 = vld [vmem:[#allocation3 + $0x90] ss:$2 sm:$0xff] }
 0x299   : > { %v2282_v8 = vld [vmem:[#allocation3 + $0x78] ss:$2 sm:$0xff] }
 0x29a   : > { %3267 = vmatpush3.bf16.msra.mxu0 %v3540_v46 }
 0x29b   : > { %3268 = vmatprep.subr.bf16.mxu0 %v3541_v40 }
 0x29c   : > { %2390 = vrot.lane.b32.xlu0 %v2306_v27, %s3591_s18  ;;  %v4988_v22 = vpop.permute.xlu1 %3411  ;;  %v3402_v56 = vpop.permute.xlu0 %3401  ;;  %v2288_v27 = vld [vmem:[#allocation3 + $0xc0] ss:$2 sm:$0xff] }
 0x29d   : > { %v3404_v38 = vunpack.i.h.bf16 %v3402_v56  ;;  %v3414_v30 = vunpack.i.h.bf16 %v4988_v22  ;;  %v3403_v24 = vunpack.i.l.bf16 %v3402_v56  ;;  %v3413_v47 = vunpack.i.l.bf16 %v4988_v22  ;;  %v2286_v22 = vld [vmem:[#allocation3 + $0xa8] ss:$2 sm:$0xff] }
 0x29e   : > { %v2338_v41 = vld [vmem:[#allocation3 + $0x181] ss:$2 sm:$0xff]  ;;  %v2372_v37 = vld [vmem:[#allocation3 + $0x182] ss:$2 sm:$0xff]  ;;  %3269 = vmatpush3.bf16.msra.mxu0 %v3542_v29 }
 0x29f   : > { %v2336_v21 = vld [vmem:[#allocation3 + $0x169] ss:$2 sm:$0xff]  ;;  %v2511_v14 = vsel %vm461_vm0, %v2276_v15, %v3404_v38  ;;  %v2370_v59 = vld [vmem:[#allocation3 + $0x16a] ss:$2 sm:$0xff]  ;;  %v2510_v44 = vsel %vm461_vm0, %v2274_v35, %v3403_v24 }
 0x2a0   : > { %v3470_v48 = vpack.i.bf16 %v2338_v41, %v2336_v21  ;;  %v5006_v57 = vsel %vm415_vm1, %v2511_v14, %v3414_v30  ;;  %v3475_v28 = vpack.i.bf16 %v2372_v37, %v2370_v59  ;;  %v2527_v62 = vsel %vm415_vm1, %v2510_v44, %v3413_v47  ;;  %v2294_v24 = vld [vmem:[#allocation3 + $0x108] ss:$2 sm:$0xff] }
 0x2a1   : > { %v3480_v0 = vpack.i.bf16 %v5006_v57, %v2340_v34  ;;  %v2300_v29 = vld [vmem:[#allocation3 + $0x150] ss:$2 sm:$0xff] }
 0x2a2   : > { %3471 = vrot.lane.b32.xlu1 %v3470_v48, %s3591_s18 }
 0x2a6   : > { %3476 = vrot.lane.b32.xlu1 %v3475_v28, %s3590_s17 }
 0x2aa   : > { %3481 = vrot.lane.b32.xlu1 %v3480_v0, %s3590_s17 }
 0x2b5   : > { %v3417_v61 = vpop.permute.xlu1 %3416  ;;  %v3407_v12 = vpop.permute.xlu0 %3406 }
 0x2b6   : > { %v3419_v45 = vunpack.i.h.bf16 %v3417_v61  ;;  %v3418_v26 = vunpack.i.l.bf16 %v3417_v61  ;;  %v3409_v16 = vunpack.i.h.bf16 %v3407_v12  ;;  %v3408_v42 = vunpack.i.l.bf16 %v3407_v12 }
 0x2b8   : > { %v2512_v43 = vsel %vm461_vm0, %v2278_v17, %v3408_v42  ;;  %v2513_v53 = vsel %vm461_vm0, %v2280_v51, %v3409_v16 }
 0x2b9   : > { %v5055_v60 = vsel %vm415_vm1, %v2513_v53, %v3419_v45  ;;  %v2529_v10 = vsel %vm415_vm1, %v2512_v43, %v3418_v26 }
 0x2ba   : > { %2585 = vrot.lane.b32.xlu1 %v5055_v60, %s3590_s17  ;;  %v3485_v31 = vpack.i.bf16 %v2529_v10, %v2527_v62 }
 0x2bc   : > { %3486 = vrot.lane.b32.xlu0 %v3485_v31, %s3592_s26 }
 0x2cd   : > { %v3422_v63 = vpop.permute.xlu0 %3421 }
 0x2ce   : > { %v3424_v6 = vunpack.i.h.bf16 %v3422_v63  ;;  %v3423_v54 = vunpack.i.l.bf16 %v3422_v63 }
 0x2d0   : > { %v2515_v38 = vsel %vm461_vm0, %v2284_v39, %v3424_v6  ;;  %v2514_v21 = vsel %vm461_vm0, %v2282_v8, %v3423_v54  ;;  %v2302_v6 = vld [vmem:[#allocation3 + $0x168] ss:$2 sm:$0xff] }
 0x2d1   : > { %v3427_v5 = vpop.permute.xlu0 %3426 }
 0x2d2   : > { %v3429_v25 = vunpack.i.h.bf16 %v3427_v5  ;;  %v3428_v7 = vunpack.i.l.bf16 %v3427_v5  ;;  %v2298_v5 = vld [vmem:[#allocation3 + $0x138] ss:$2 sm:$0xff] }
 0x2d4   : > { %v2531_v48 = vsel %vm415_vm1, %v2514_v21, %v3428_v7  ;;  %v5072_v23 = vsel %vm415_vm1, %v2515_v38, %v3429_v25  ;;  %v2272_v21 = vld [vmem:[#allocation3] ss:$2 sm:$0xff] }
 0x2da   : > { %v3432_v3 = vpop.permute.xlu1 %3431 }
 0x2db   : > { %v3434_v13 = vunpack.i.h.bf16 %v3432_v3  ;;  %v3433_v4 = vunpack.i.l.bf16 %v3432_v3  ;;  %v2304_v3 = vld [vmem:[#allocation3 + $0x180] ss:$2 sm:$0xff] }
 0x2dd   : > { %v2517_v30 = vsel %vm461_vm0, %v2288_v27, %v3434_v13  ;;  %v2516_v15 = vsel %vm461_vm0, %v2286_v22, %v3433_v4 }
 0x2de   : > { %v3437_v20 = vpop.permute.xlu1 %3436 }
 0x2df   : > { %v3439_v56 = vunpack.i.h.bf16 %v3437_v20  ;;  %v3438_v41 = vunpack.i.l.bf16 %v3437_v20 }
 0x2e1   : > { %v2533_v14 = vsel %vm415_vm1, %v2516_v15, %v3438_v41  ;;  %v5075_v55 = vsel %vm415_vm1, %v2517_v30, %v3439_v56 }
 0x2e2   : > { %v3490_v58 = vpack.i.bf16 %v2533_v14, %v2531_v48  ;;  %v3495_v59 = vpack.i.bf16 %v5075_v55, %v5072_v23 }
 0x2e4   : > { %3491 = vrot.lane.b32.xlu0 %v3490_v58, %s3592_s26  ;;  %3496 = vrot.lane.b32.xlu1 %v3495_v59, %s3590_s17 }
 0x2e9   : > { %v3442_v37 = vpop.permute.xlu0 %3441 }
 0x2ea   : > { %v3444_v2 = vunpack.i.h.bf16 %v3442_v37  ;;  %v3443_v28 = vunpack.i.l.bf16 %v3442_v37 }
 0x2ec   : > { %v2519_v49 = vsel %vm461_vm0, %v2292_v19, %v3444_v2  ;;  %v2518_v47 = vsel %vm461_vm0, %v2290_v33, %v3443_v28 }
 0x2ed   : > { %v3447_v50 = vpop.permute.xlu0 %3446 }
 0x2ee   : > { %v3449_v52 = vunpack.i.h.bf16 %v3447_v50  ;;  %v3448_v9 = vunpack.i.l.bf16 %v3447_v50 }
 0x2f0   : > { %v2535_v12 = vsel %vm415_vm1, %v2518_v47, %v3448_v9  ;;  %v5088_v45 = vsel %vm415_vm1, %v2519_v49, %v3449_v52 }
 0x2f7   : > { %v3452_v34 = vpop.permute.xlu1 %3451 }
 0x2f8   : > { %v3454_v36 = vunpack.i.h.bf16 %v3452_v34  ;;  %v3453_v0 = vunpack.i.l.bf16 %v3452_v34 }
 0x2fa   : > { %v2521_v44 = vsel %vm461_vm0, %v2296_v18, %v3454_v36  ;;  %v2520_v61 = vsel %vm461_vm0, %v2294_v24, %v3453_v0 }
 0x2fb   : > { %v3457_v32 = vpop.permute.xlu1 %3456 }
 0x2fc   : > { %v3459_v11 = vunpack.i.h.bf16 %v3457_v32  ;;  %v3458_v35 = vunpack.i.l.bf16 %v3457_v32 }
 0x2fe   : > { %v2537_v1 = vsel %vm415_vm1, %v2520_v61, %v3458_v35  ;;  %v5091_v26 = vsel %vm415_vm1, %v2521_v44, %v3459_v11 }
 0x2ff   : > { %v3500_v16 = vpack.i.bf16 %v2537_v1, %v2535_v12  ;;  %v3505_v42 = vpack.i.bf16 %v5091_v26, %v5088_v45 }
 0x301   : > { %3501 = vrot.lane.b32.xlu0 %v3500_v16, %s3592_s26  ;;  %3506 = vrot.lane.b32.xlu1 %v3505_v42, %s3590_s17 }
 0x306   : > { %v3462_v17 = vpop.permute.xlu0 %3461 }
 0x307   : > { %v3464_v43 = vunpack.i.h.bf16 %v3462_v17  ;;  %v3463_v53 = vunpack.i.l.bf16 %v3462_v17 }
 0x309   : > { %v2523_v4 = vsel %vm461_vm0, %v2300_v29, %v3464_v43  ;;  %v2522_v25 = vsel %vm461_vm0, %v2298_v5, %v3463_v53 }
 0x30a   : > { %v3467_v51 = vpop.permute.xlu0 %3466 }
 0x30b   : > { %v3469_v10 = vunpack.i.h.bf16 %v3467_v51  ;;  %v3468_v31 = vunpack.i.l.bf16 %v3467_v51 }
 0x30d   : > { %v5102_v20 = vsel %vm415_vm1, %v2523_v4, %v3469_v10  ;;  %v2539_v27 = vsel %vm415_vm1, %v2522_v25, %v3468_v31 }
 0x30e   : > { %v2391_v30 = vpop.permute.xlu0 %2390 }
 0x30f   : > { %v2509_v58 = vsel %vm461_vm0, %v2272_v21, %v2391_v30  ;;  %v5142_v21 = vld [vmem:[%s5273_s11] ss:$0 sm:$0xff] }
 0x314   : > { %v3472_v46 = vpop.permute.xlu1 %3471 }
 0x315   : > { %v3474_v40 = vunpack.i.h.bf16 %v3472_v46  ;;  %v3473_v62 = vunpack.i.l.bf16 %v3472_v46 }
 0x317   : > { %v2525_v7 = vsel %vm461_vm0, %v2304_v3, %v3474_v40  ;;  %v2524_v39 = vsel %vm461_vm0, %v2302_v6, %v3473_v62 }
 0x318   : > { %v3477_v63 = vpop.permute.xlu1 %3476 }
 0x319   : > { %v3479_v54 = vunpack.i.h.bf16 %v3477_v63  ;;  %v3478_v13 = vunpack.i.l.bf16 %v3477_v63 }
 0x31b   : > { %v2542_v8 = vsel %vm415_vm1, %v2525_v7, %v3479_v54  ;;  %v2541_v22 = vsel %vm415_vm1, %v2524_v39, %v3478_v13 }
 0x31c   : > { %v3515_v56 = vpack.i.bf16 %v2542_v8, %v5102_v20  ;;  %v3510_v41 = vpack.i.bf16 %v2541_v22, %v2539_v27  ;;  %v3482_v38 = vpop.permute.xlu1 %3481 }
 0x31d   : > { %v3484_v15 = vunpack.i.h.bf16 %v3482_v38  ;;  %v3483_v48 = vunpack.i.l.bf16 %v3482_v38 }
 0x31e   : > { %3516 = vrot.lane.b32.xlu1 %v3515_v56, %s3590_s17  ;;  %3511 = vrot.lane.b32.xlu0 %v3510_v41, %s3592_s26 }
 0x31f   : > { %v2526_v2 = vsel %vm415_vm1, %v2509_v58, %v3483_v48 }
 0x32c   : > { %v2586_v14 = vpop.permute.xlu1 %2585 }
 0x32d   : > { %v2626_v59 = vpack.c.bf16 %v2586_v14, %v3484_v15 }
 0x32e   : > { %v3487_v37 = vpop.permute.xlu0 %3486 }
 0x32f   : > { %v3489_v50 = vunpack.i.h.bf16 %v3487_v37  ;;  %v3488_v34 = vunpack.i.l.bf16 %v3487_v37  ;;  %3380 = vmatprep.mubr.msk.bf16.mxu1 %vm461_vm0, %v2626_v59 }
 0x331   : > { %v2609_v28 = vsel %vm2607_vm6, %v5006_v57, %v3489_v50  ;;  %v2608_v36 = vsel %vm2607_vm6, %v2526_v2, %v3488_v34  ;;  %v2616_v0 = vsel %vm415_vm1, %v3488_v34, %v3484_v15  ;;  %v2617_v52 = vsel %vm415_vm1, %v3489_v50, %v2586_v14 }
 0x332   : > { %v2624_v9 = vpack.c.bf16 %v2609_v28, %v2608_v36  ;;  %v2625_v19 = vpack.c.bf16 %v2617_v52, %v2616_v0 }
 0x334   : > { %2831 = vmatprep.mubr.bf16.mxu0 %v2625_v19 }
 0x335   : > { %2832 = vmatmul.mubr.bf16.vlgmr.msra.gmra.mrb[32].mxu0 %v2624_v9 }
 0x356   : > { %v3492_v32 = vpop.permute.xlu0 %3491  ;;  %v3497_v33 = vpop.permute.xlu1 %3496 }
 0x357   : > { %v3494_v18 = vunpack.i.h.bf16 %v3492_v32  ;;  %v3493_v24 = vunpack.i.l.bf16 %v3492_v32  ;;  %v3499_v11 = vunpack.i.h.bf16 %v3497_v33  ;;  %v3498_v35 = vunpack.i.l.bf16 %v3497_v33 }
 0x359   : > { %v2629_v49 = vpack.c.bf16 %v3499_v11, %v3498_v35  ;;  %v2618_v47 = vsel %vm415_vm1, %v3493_v24, %v3498_v35  ;;  %v2619_v57 = vsel %vm415_vm1, %v3494_v18, %v3499_v11  ;;  %v2610_v44 = vsel %vm2607_vm6, %v5055_v60, %v3493_v24 }
 0x35a   : > { %v2628_v61 = vpack.c.bf16 %v2619_v57, %v2618_v47  ;;  %v2611_v12 = vsel %vm2607_vm6, %v5072_v23, %v3494_v18 }
 0x35b   : > { %3381 = vmatmul.mubr.msk.bf16.vlgmr.msra.gmra.mrb[32].mxu1 %vm461_vm0, %v2629_v49  ;;  %v2627_v1 = vpack.c.bf16 %v2611_v12, %v2610_v44 }
 0x35c   : > { %2839 = vmatprep.mubr.bf16.mxu0 %v2628_v61 }
 0x35d   : > { %2840 = vmatmul.mubr.bf16.gmra.mrb[36].mxu0 %v2627_v1 }
 0x373   : > { %v3502_v16 = vpop.permute.xlu0 %3501  ;;  %v3507_v42 = vpop.permute.xlu1 %3506 }
 0x374   : > { %v3504_v17 = vunpack.i.h.bf16 %v3502_v16  ;;  %v3503_v51 = vunpack.i.l.bf16 %v3502_v16  ;;  %v3509_v46 = vunpack.i.h.bf16 %v3507_v42  ;;  %v3508_v43 = vunpack.i.l.bf16 %v3507_v42 }
 0x376   : > { %v2632_v53 = vpack.c.bf16 %v3509_v46, %v3508_v43  ;;  %v2620_v40 = vsel %vm415_vm1, %v3503_v51, %v3508_v43  ;;  %v2621_v60 = vsel %vm415_vm1, %v3504_v17, %v3509_v46  ;;  %v2612_v62 = vsel %vm2607_vm6, %v5075_v55, %v3503_v51 }
 0x377   : > { %v2631_v23 = vpack.c.bf16 %v2621_v60, %v2620_v40  ;;  %v2613_v10 = vsel %vm2607_vm6, %v5088_v45, %v3504_v17 }
 0x378   : > { %3384 = vmatprep.mubr.msk.bf16.mxu1 %vm461_vm0, %v2632_v53  ;;  %v2630_v31 = vpack.c.bf16 %v2613_v10, %v2612_v62 }
 0x379   : > { %2847 = vmatprep.mubr.bf16.mxu0 %v2631_v23 }
 0x37a   : > { %2848 = vmatmul.mubr.bf16.gmra.mrb[40].mxu0 %v2630_v31 }
 0x390   : > { %v3517_v29 = vpop.permute.xlu1 %3516  ;;  %v3512_v63 = vpop.permute.xlu0 %3511 }
 0x391   : > { %v3519_v5 = vunpack.i.h.bf16 %v3517_v29  ;;  %v3518_v3 = vunpack.i.l.bf16 %v3517_v29  ;;  %v3514_v6 = vunpack.i.h.bf16 %v3512_v63  ;;  %v3513_v54 = vunpack.i.l.bf16 %v3512_v63 }
 0x393   : > { %v2635_v13 = vpack.c.bf16 %v3519_v5, %v3518_v3  ;;  %v2622_v4 = vsel %vm415_vm1, %v3513_v54, %v3518_v3  ;;  %v2623_v55 = vsel %vm415_vm1, %v3514_v6, %v3519_v5  ;;  %v2614_v25 = vsel %vm2607_vm6, %v5091_v26, %v3513_v54 }
 0x394   : > { %v2634_v45 = vpack.c.bf16 %v2623_v55, %v2622_v4  ;;  %v2615_v7 = vsel %vm2607_vm6, %v5102_v20, %v3514_v6 }
 0x395   : > { %3385 = vmatmul.mubr.msk.bf16.gmra.mrb[36].mxu1 %vm461_vm0, %v2635_v13  ;;  %v2633_v39 = vpack.c.bf16 %v2615_v7, %v2614_v25 }
 0x396   : > { %2855 = vmatprep.mubr.bf16.mxu0 %v2634_v45 }
 0x397   : > { %2856 = vmatmul.mubr.bf16.gmra.mrb[44].mxu0 %v2633_v39 }
 0x408   : > { %v3270_v8 = vpop.f32.mrb[32].mxu0 }
 0x409   : > { %v3271_v27 = vpop.f32.mrb[33].mxu0 }
 0x40a   : > { %v3272_v22 = vadd.f32 %v3271_v27, %v3270_v8  ;;  %v3273_v56 = vpop.f32.mrb[34].mxu0 }
 0x40b   : > { %v3274_v41 = vpop.f32.mrb[35].mxu0 }
 0x40c   : > { %v3275_v38 = vadd.f32 %v3274_v41, %v3273_v56  ;;  %v2834_v30 = vadd.f32 %v3272_v22, %v5142_v21 }
 0x40e   : > { %v2837_v58 = vadd.f32 %v3275_v38, %v5142_v21 }
 0x42e   : > { %v3382_v26 = vpop.f32.mrb[32].mxu1 }
 0x42f   : > { %v2898_v20 = vpop.f32.mrb[33].mxu1 }
 0x430   : > { %v5145_v15 = vadd.f32 %v2898_v20, %v2834_v30  ;;  %v3276_v48 = vpop.f32.mrb[36].mxu0  ;;  %v3383_v14 = vpop.f32.mrb[34].mxu1 }
 0x431   : > { %v3277_v59 = vpop.f32.mrb[37].mxu0  ;;  %v2901_v37 = vpop.f32.mrb[35].mxu1 }
 0x432   : > { %v3278_v50 = vadd.f32 %v3277_v59, %v3276_v48  ;;  %v2902_v34 = vadd.f32 %v2901_v37, %v2837_v58  ;;  %v3279_v2 = vpop.f32.mrb[38].mxu0  ;;  %v2991_v28 = vrot.slane %v5145_v15, 3  ;;  %v2959_v36 = vrot.slane %v5145_v15, 1 }
 0x433   : > { %v3280_v0 = vpop.f32.mrb[39].mxu0  ;;  %v3055_v52 = vrot.slane %v5145_v15, 7  ;;  %v3023_v9 = vrot.slane %v5145_v15, 5  ;;  %v2976_v19 = vrot.slane %v5145_v15, 2  ;;  %v3040_v32 = vrot.slane %v5145_v15, 6 }
 0x434   : > { %v2842_v33 = vadd.f32 %v3278_v50, %v5142_v21  ;;  %v3281_v18 = vadd.f32 %v3280_v0, %v3279_v2  ;;  %v2992_v24 = vrot.slane %v2902_v34, 2  ;;  %v2960_v11 = vsel %vm2938_vm7, %v2902_v34, %v2959_v36 }
 0x435   : > { %v3056_v35 = vrot.slane %v2902_v34, 6  ;;  %v3024_v49 = vrot.slane %v2902_v34, 4  ;;  %v2977_v47 = vrot.slane %v2902_v34, 1  ;;  %v2937_v57 = vrot.slane %v2902_v34, 7 }
 0x436   : > { %v2907_v44 = vadd.f32 %v3382_v26, %v2842_v33  ;;  %v2845_v61 = vadd.f32 %v3281_v18, %v5142_v21  ;;  %v2993_v12 = vsel %vm2938_vm7, %v2992_v24, %v2991_v28  ;;  %v3041_v1 = vrot.slane %v2902_v34, 5 }
 0x437   : > { %v3057_v16 = vsel %vm2938_vm7, %v3056_v35, %v3055_v52  ;;  %v3025_v42 = vsel %vm2938_vm7, %v3024_v49, %v3023_v9  ;;  %v2978_v17 = vsel %vm2938_vm7, %v2977_v47, %v2976_v19  ;;  %v2939_v51 = vsel %vm2938_vm7, %v2937_v57, %v5145_v15 }
 0x438   : > { %v2910_v46 = vadd.f32 %v3383_v14, %v2845_v61  ;;  %v2994_v43 = vrot.slane %v2907_v44, 1  ;;  %v2961_v53 = vrot.slane %v2907_v44, 7  ;;  %v3058_v40 = vrot.slane %v2907_v44, 5 }
 0x439   : > { %v3026_v60 = vrot.slane %v2907_v44, 3  ;;  %v2979_v62 = vsel %vm2941_vm8, %v2907_v44, %v2978_v17  ;;  %v2940_v23 = vrot.slane %v2907_v44, 6  ;;  %v3042_v10 = vsel %vm2938_vm7, %v3041_v1, %v3040_v32 }
 0x43a   : > { %v2995_v31 = vsel %vm2941_vm8, %v2994_v43, %v2993_v12  ;;  %v2962_v29 = vsel %vm2941_vm8, %v2961_v53, %v2960_v11  ;;  %v2963_v63 = vrot.slane %v2910_v46, 6  ;;  %v3059_v5 = vsel %vm2941_vm8, %v3058_v40, %v3057_v16 }
 0x43b   : > { %v2996_v3 = vsel %vm2944_vm9, %v2910_v46, %v2995_v31  ;;  %v3060_v6 = vrot.slane %v2910_v46, 4  ;;  %v3027_v54 = vsel %vm2941_vm8, %v3026_v60, %v3025_v42  ;;  %v3028_v13 = vrot.slane %v2910_v46, 2 }
 0x43c   : > { %v2964_v4 = vsel %vm2944_vm9, %v2963_v63, %v2962_v29  ;;  %v2980_v55 = vrot.slane %v2910_v46, 7  ;;  %v2942_v25 = vsel %vm2941_vm8, %v2940_v23, %v2939_v51  ;;  %v2943_v45 = vrot.slane %v2910_v46, 5 }
 0x43d   : > { %v3061_v7 = vsel %vm2944_vm9, %v3060_v6, %v3059_v5  ;;  %v3029_v39 = vsel %vm2944_vm9, %v3028_v13, %v3027_v54  ;;  %v3043_v8 = vrot.slane %v2907_v44, 4  ;;  %v3045_v27 = vrot.slane %v2910_v46, 3 }
 0x43e   : > { %v2981_v22 = vsel %vm2944_vm9, %v2980_v55, %v2979_v62  ;;  %v5176_v56 = vsel %vm2944_vm9, %v2943_v45, %v2942_v25  ;;  %v3008_v41 = vrot.slane %v5145_v15, 4  ;;  %v3009_v38 = vrot.slane %v2902_v34, 3 }
 0x43f   : > { %v3044_v26 = vsel %vm2941_vm8, %v3043_v8, %v3042_v10  ;;  %v3011_v30 = vrot.slane %v2907_v44, 2  ;;  %v3013_v20 = vrot.slane %v2910_v46, 1 }
 0x440   : > { %v5181_v48 = vsel %vm2944_vm9, %v3045_v27, %v3044_v26  ;;  %v3010_v14 = vsel %vm2938_vm7, %v3009_v38, %v3008_v41 }
 0x441   : > { %v3012_v58 = vsel %vm2941_vm8, %v3011_v30, %v3010_v14 }
 0x442   : > { %v5186_v59 = vsel %vm2944_vm9, %v3013_v20, %v3012_v58 }
 0x44d   : > { %v3282_v37 = vpop.f32.mrb[40].mxu0 }
 0x44e   : > { %v3283_v50 = vpop.f32.mrb[41].mxu0 }
 0x44f   : > { %v3284_v2 = vadd.f32 %v3283_v50, %v3282_v37  ;;  %v3285_v28 = vpop.f32.mrb[42].mxu0 }
 0x450   : > { %v3286_v15 = vpop.f32.mrb[43].mxu0 }
 0x451   : > { %v3287_v34 = vadd.f32 %v3286_v15, %v3285_v28  ;;  %v2850_v0 = vadd.f32 %v3284_v2, %v5142_v21 }
 0x453   : > { %v2853_v33 = vadd.f32 %v3287_v34, %v5142_v21 }
 0x468   : > { %v3386_v36 = vpop.f32.mrb[36].mxu1 }
 0x469   : > { %v2914_v52 = vpop.f32.mrb[37].mxu1 }
 0x46a   : > { %v5189_v9 = vadd.f32 %v2914_v52, %v2850_v0  ;;  %v3288_v19 = vpop.f32.mrb[44].mxu0  ;;  %v3387_v32 = vpop.f32.mrb[38].mxu1 }
 0x46b   : > { %v3289_v18 = vpop.f32.mrb[45].mxu0  ;;  %v2917_v24 = vpop.f32.mrb[39].mxu1 }
 0x46c   : > { %v3290_v11 = vadd.f32 %v3289_v18, %v3288_v19  ;;  %v5192_v35 = vadd.f32 %v2917_v24, %v2853_v33  ;;  %v3291_v49 = vpop.f32.mrb[46].mxu0  ;;  %v2997_v47 = vrot.slane %v5189_v9, 7  ;;  %v2965_v57 = vrot.slane %v5189_v9, 5 }
 0x46d   : > { %v3292_v44 = vpop.f32.mrb[47].mxu0  ;;  %v3062_v61 = vrot.slane %v5189_v9, 3  ;;  %v3030_v12 = vrot.slane %v5189_v9, 1  ;;  %v2982_v1 = vrot.slane %v5189_v9, 6  ;;  %v2946_v16 = vrot.slane %v5189_v9, 4 }
 0x46e   : > { %v2858_v42 = vadd.f32 %v3290_v11, %v5142_v21  ;;  %v3293_v17 = vadd.f32 %v3292_v44, %v3291_v49  ;;  %v2998_v51 = vsel %vm2947_vm10, %v2997_v47, %v2996_v3  ;;  %v2999_v46 = vrot.slane %v5192_v35, 6 }
 0x46f   : > { %v2966_v43 = vsel %vm2947_vm10, %v2965_v57, %v2964_v4  ;;  %v2967_v53 = vrot.slane %v5192_v35, 4  ;;  %v3063_v40 = vsel %vm2947_vm10, %v3062_v61, %v3061_v7  ;;  %v3064_v60 = vrot.slane %v5192_v35, 2 }
 0x470   : > { %v2923_v62 = vadd.f32 %v3386_v36, %v2858_v42  ;;  %v2861_v23 = vadd.f32 %v3293_v17, %v5142_v21  ;;  %v3000_v10 = vsel %vm2950_vm11, %v2999_v46, %v2998_v51  ;;  %v3031_v31 = vsel %vm2947_vm10, %v3030_v12, %v3029_v39 }
 0x471   : > { %v2968_v29 = vsel %vm2950_vm11, %v2967_v53, %v2966_v43  ;;  %v3065_v63 = vsel %vm2950_vm11, %v3064_v60, %v3063_v40  ;;  %v3032_v5 = vsel %vm2950_vm11, %v5192_v35, %v3031_v31  ;;  %v2983_v3 = vsel %vm2947_vm10, %v2982_v1, %v2981_v22 }
 0x472   : > { %v2926_v6 = vadd.f32 %v3387_v32, %v2861_v23  ;;  %v3001_v54 = vrot.slane %v2923_v62, 5  ;;  %v2969_v13 = vrot.slane %v2923_v62, 3  ;;  %v3066_v4 = vrot.slane %v2923_v62, 1 }
 0x473   : > { %v3033_v55 = vrot.slane %v2923_v62, 7  ;;  %v2984_v21 = vrot.slane %v5192_v35, 5  ;;  %v2986_v25 = vrot.slane %v2923_v62, 4  ;;  %v2948_v45 = vsel %vm2947_vm10, %v2946_v16, %v5176_v56 }
 0x474   : > { %v3002_v7 = vsel %vm2953_vm12, %v3001_v54, %v3000_v10  ;;  %v3003_v39 = vrot.slane %v2926_v6, 4  ;;  %v2970_v8 = vsel %vm2953_vm12, %v2969_v13, %v2968_v29  ;;  %v2971_v27 = vrot.slane %v2926_v6, 2 }
 0x475   : > { %v3067_v41 = vsel %vm2953_vm12, %v3066_v4, %v3065_v63  ;;  %v3034_v22 = vsel %vm2953_vm12, %v3033_v55, %v3032_v5  ;;  %v3035_v38 = vrot.slane %v2926_v6, 6  ;;  %v2985_v26 = vsel %vm2950_vm11, %v2984_v21, %v2983_v3 }
 0x476   : > { %v3004_v30 = vsel %vm2956_vm13, %v3003_v39, %v3002_v7  ;;  %v2972_v20 = vsel %vm2956_vm13, %v2971_v27, %v2970_v8  ;;  %v3068_v14 = vsel %vm2956_vm13, %v2926_v6, %v3067_v41  ;;  %v2988_v56 = vrot.slane %v2926_v6, 3 }
 0x477   : > { %3005 = vrot.lane.b32.xlu1 %v3004_v30, %s3590_s17  ;;  %2973 = vrot.lane.b32.xlu0 %v2972_v20, %s3590_s17  ;;  %v3036_v58 = vsel %vm2956_vm13, %v3035_v38, %v3034_v22  ;;  %v2987_v37 = vsel %vm2953_vm12, %v2986_v25, %v2985_v26  ;;  %v2949_v50 = vrot.slane %v5192_v35, 3  ;;  %v2955_v2 = vrot.slane %v2926_v6, 1 }
 0x478   : > { %v2989_v28 = vsel %vm2956_vm13, %v2988_v56, %v2987_v37  ;;  %v2952_v15 = vrot.slane %v2923_v62, 2  ;;  %v3047_v34 = vrot.slane %v5189_v9, 2  ;;  %v3049_v36 = vrot.slane %v5192_v35, 1 }
 0x479   : > { %v2951_v0 = vsel %vm2950_vm11, %v2949_v50, %v2948_v45  ;;  %v3052_v52 = vrot.slane %v2926_v6, 7  ;;  %v3015_v19 = vsel %vm2947_vm10, %v5189_v9, %v5186_v59  ;;  %v3016_v32 = vrot.slane %v5192_v35, 7 }
 0x47a   : > { %v2954_v33 = vsel %vm2953_vm12, %v2952_v15, %v2951_v0  ;;  %v3048_v18 = vsel %vm2947_vm10, %v3047_v34, %v5181_v48  ;;  %v3018_v24 = vrot.slane %v2923_v62, 6  ;;  %v3020_v11 = vrot.slane %v2926_v6, 5 }
 0x47b   : > { %3069 = vrot.lane.b32.xlu1 %v3068_v14, %s3590_s17  ;;  %3037 = vrot.lane.b32.xlu0 %v3036_v58, %s3590_s17  ;;  %v2957_v49 = vsel %vm2956_vm13, %v2955_v2, %v2954_v33  ;;  %v3050_v47 = vsel %vm2950_vm11, %v3049_v36, %v3048_v18  ;;  %v3017_v57 = vsel %vm2950_vm11, %v3016_v32, %v3015_v19 }
 0x47c   : > { %v3051_v59 = vsel %vm2953_vm12, %v2923_v62, %v3050_v47  ;;  %v3019_v9 = vsel %vm2953_vm12, %v3018_v24, %v3017_v57 }
 0x47d   : > { %v3053_v35 = vsel %vm2956_vm13, %v3052_v52, %v3051_v59  ;;  %v3021_v48 = vsel %vm2956_vm13, %v3020_v11, %v3019_v9 }
 0x4e9   : > { %v3006_v44 = vpop.permute.xlu1 %3005  ;;  %v2974_v61 = vpop.permute.xlu0 %2973 }
 0x4ea   : > { %v3073_v12 = vsel %vm415_vm1, %v2989_v28, %v3006_v44  ;;  %v3072_v1 = vsel %vm415_vm1, %v2957_v49, %v2974_v61 }
 0x4eb   : > { %3077 = vst [vmem:[%s413_s15 + $0x8] sm:$0xff] %v3073_v12  ;;  %3076 = vst [vmem:[%s413_s15] sm:$0xff] %v3072_v1 }
 0x4ed   : > { %v3070_v16 = vpop.permute.xlu1 %3069  ;;  %v3038_v42 = vpop.permute.xlu0 %3037 }
 0x4ee   : > { %v3075_v17 = vsel %vm415_vm1, %v3053_v35, %v3070_v16  ;;  %v3074_v51 = vsel %vm415_vm1, %v3021_v48, %v3038_v42 }
 0x4ef   : > { %3079 = vst [vmem:[%s413_s15 + $0x18] sm:$0xff] %v3075_v17  ;;  %3078 = vst [vmem:[%s413_s15 + $0x10] sm:$0xff] %v3074_v51 }
 0x4f0 PF: > { %s22_s21 = sadd.s32 1, %s3587_s21  }
 0x4f1   : > { %p19_p4 = scmp.ge.s32.totalorder %s22_s21, 4  }
 0x4f3   :  { %21 = sbr.rel (!%p19_p4) target bundleno = 1 (0x1), region = 153 }

</bundles_post_ra>
